<compile_context>
chip_gen: v7x
topology: tpu7x:2x2x1
jax: 0.10.0
libtpu: 0.0.40
codegen_flags: <defaults>
</compile_context>

<pallas_src>
import functools

import jax
import jax.numpy as jnp
from jax import lax
from jax.experimental import pallas as pl
from jax.experimental.pallas import tpu as pltpu


# ----------------------------------------------------------------------------
# small helpers
# ----------------------------------------------------------------------------
def _round_up(x, m):
    return ((x + m - 1) // m) * m


def _cdiv(a, b):
    return -(-a // b)


def _pack_gate_weight(w, hp, in_dim_pad=None):
    """PyTorch (4H, in_dim) LSTM weight -> (in_dim[_pad], 4*Hp), each gate in
    its own Hp-wide lane tile (Hp is a multiple of 128), zero-padded."""
    four_h, in_dim = w.shape
    h = four_h // 4
    w4 = w.reshape(4, h, in_dim)
    w4 = jnp.pad(w4, ((0, 0), (0, hp - h), (0, 0)))
    out = w4.transpose(2, 0, 1).reshape(in_dim, 4 * hp)
    if in_dim_pad is not None and in_dim_pad > in_dim:
        out = jnp.pad(out, ((0, in_dim_pad - in_dim), (0, 0)))
    return out


def _pack_gate_bias(b, hp):
    h = b.shape[0] // 4
    b4 = jnp.pad(b.reshape(4, h), ((0, 0), (0, hp - h)))
    return b4.reshape(1, 4 * hp).astype(jnp.float32)


# ----------------------------------------------------------------------------
# Tiled linear kernel: y = x @ w + b   (lane-dense output tiles)
# ----------------------------------------------------------------------------
def _linear_kernel(x_ref, w_ref, b_ref, o_ref):
    o_ref[...] = (jnp.dot(x_ref[...], w_ref[...],
                          preferred_element_type=jnp.float32)
                  + b_ref[...]).astype(o_ref.dtype)


def pallas_linear(x, w, b, *, out_dtype=jnp.float32, tn_max=512, tv_max=1024):
    """x:(N,K), w:(K,V), b:(1,V) -> (N,V) in out_dtype.

    Tiled over rows and 128-lane-aligned output columns.  The grid is oriented
    so whichever operand is cheaper to re-stream sits on the inner axis (the
    other operand's HBM tile is DMA'd only once per outer step)."""
    N, K = x.shape
    V = w.shape[1]
    Np = _round_up(N, 8)
    tn = Np if Np <= tn_max else tn_max
    Np = _round_up(Np, tn)
    Vp = _round_up(V, 128)
    tv = Vp if Vp <= tv_max else tv_max
    Vp = _round_up(Vp, tv)

    xp = jnp.pad(x, ((0, Np - N), (0, 0))) if Np != N else x
    wp = jnp.pad(w, ((0, 0), (0, Vp - V))) if Vp != V else w
    bp = (jnp.pad(b, ((0, 0), (0, Vp - V))) if Vp != V else b).astype(jnp.float32)

    n_row = Np // tn
    n_col = Vp // tv
    x_isz = jnp.dtype(x.dtype).itemsize
    w_isz = jnp.dtype(w.dtype).itemsize
    o_isz = jnp.dtype(out_dtype).itemsize

    # Re-stream cost if W is resident (x re-read per column tile) vs if x is
    # resident (W re-read per row tile).  Pick the cheaper orientation; for the
    # vocab projection this makes the big (Hp, V) weight stream from HBM once.
    weight_resident = (n_col * Np * K * x_isz) <= (n_row * K * Vp * w_isz)
    if weight_resident:
        grid = (n_col, n_row)                       # rows innermost
        x_spec = pl.BlockSpec((tn, K), lambda i, j: (j, 0))
        w_spec = pl.BlockSpec((K, tv), lambda i, j: (0, i))
        b_spec = pl.BlockSpec((1, tv), lambda i, j: (0, i))
        o_spec = pl.BlockSpec((tn, tv), lambda i, j: (j, i))
    else:
        grid = (n_row, n_col)                       # cols innermost
        x_spec = pl.BlockSpec((tn, K), lambda i, j: (i, 0))
        w_spec = pl.BlockSpec((K, tv), lambda i, j: (0, j))
        b_spec = pl.BlockSpec((1, tv), lambda i, j: (0, j))
        o_spec = pl.BlockSpec((tn, tv), lambda i, j: (i, j))

    # Scoped-VMEM sized from the actual (double-buffered) tile footprint.
    vmem_need = 2 * (tn * K * x_isz + K * tv * w_isz + tv * 4 + tn * tv * o_isz)
    vmem_limit = int(min(max(vmem_need + (4 << 20), 16 << 20), 64 << 20))

    out = pl.pallas_call(
        _linear_kernel,
        out_shape=jax.ShapeDtypeStruct((Np, Vp), out_dtype),
        grid=grid,
        in_specs=[x_spec, w_spec, b_spec],
        out_specs=o_spec,
        compiler_params=pltpu.CompilerParams(
            dimension_semantics=("parallel", "parallel"),
            vmem_limit_bytes=vmem_limit),
    )(xp, wp, bp)
    if Np != N or Vp != V:
        out = out[:N, :V]
    return out


# ----------------------------------------------------------------------------
# Sequential 2-layer LSTM kernel, chunked over time, optionally sharded over
# batch (grid = (batch_shards, time_chunks)).  Layer-0 input projections (incl.
# bias) are precomputed (xp_ref); per step the kernel does the layer-0
# recurrent matmul plus ONE fused layer-1 matmul ([W_ih_l1; W_hh_l1]).
# Gate order i, f, g, o (PyTorch).  State lives in f32 VMEM scratch.
# ----------------------------------------------------------------------------
def _lstm_kernel(xp_ref, h0_ref, c0_ref, whh0_ref, w1_ref, b1_ref,
                 hseq_ref, hn_ref, cn_ref, h_st, c_st, *, seq_len, needs_mask):
    kk = pl.program_id(1)                     # time-chunk index
    T = xp_ref.shape[0]
    Hp = h_st.shape[-1]
    Bs = h_st.shape[1]

    @pl.when(kk == 0)
    def _():
        h_st[...] = h0_ref[...]
        c_st[...] = c0_ref[...]

    whh0 = whh0_ref[...]
    w1 = w1_ref[...]
    mxu_dtype = whh0.dtype
    # Hoisted bias broadcast (JAX does not CSE broadcast_in_dim; with an
    # unrolled loop it would otherwise be emitted T times per chunk).
    b1b = jnp.broadcast_to(b1_ref[...], (Bs, 4 * Hp)).astype(jnp.float32)

    def gate_math(gates, c_prev):
        # Gates are lane-aligned: each slice is a whole 128-lane tile.
        i = jax.nn.sigmoid(gates[:, 0 * Hp:1 * Hp])
        f = jax.nn.sigmoid(gates[:, 1 * Hp:2 * Hp])
        g = jnp.tanh(gates[:, 2 * Hp:3 * Hp])
        o = jax.nn.sigmoid(gates[:, 3 * Hp:4 * Hp])
        c_new = f * c_prev + i * g
        h_new = o * jnp.tanh(c_new)
        return h_new, c_new

    def step(t, carry):
        h_l0, c_l0, h_l1, c_l1 = carry
        # Layer 0: precomputed x@W_ih + b; only the recurrent matmul remains.
        g0 = xp_ref[t].astype(jnp.float32) + jnp.dot(
            h_l0.astype(mxu_dtype), whh0, preferred_element_type=jnp.float32)
        h0n, c0n = gate_math(g0, c_l0)
        # Layer 1: single fused matmul against [h_l0_new, h_l1_prev].
        x1 = jnp.concatenate([h0n.astype(mxu_dtype), h_l1.astype(mxu_dtype)],
                             axis=-1)
        g1 = jnp.dot(x1, w1, preferred_element_type=jnp.float32) + b1b
        h1n, c1n = gate_math(g1, c_l1)
        hseq_ref[t] = h1n.astype(hseq_ref.dtype)     # lane-dense store
        if needs_mask:
            # Padded time steps (Sp > S) must not advance the carried state.
            valid = (kk * T + t) < seq_len
            h0n = jnp.where(valid, h0n, h_l0)
            c0n = jnp.where(valid, c0n, c_l0)
            h1n = jnp.where(valid, h1n, h_l1)
            c1n = jnp.where(valid, c1n, c_l1)
        return (h0n, c0n, h1n, c1n)

    carry = (h_st[0], c_st[0], h_st[1], c_st[1])
    h_l0, c_l0, h_l1, c_l1 = lax.fori_loop(0, T, step, carry, unroll=True)

    h_st[0] = h_l0
    c_st[0] = c_l0
    h_st[1] = h_l1
    c_st[1] = c_l1

    @pl.when(kk == pl.num_programs(1) - 1)
    def _():
        hn_ref[...] = h_st[...]
        cn_ref[...] = c_st[...]


def _run_lstm(xproj, h0, c0, whh0, w1, b1, *, hseq_dtype=jnp.float32):
    S, Bp, G = xproj.shape
    Hp = G // 4

    # Chunk the time axis; pad S up to a multiple of the chunk instead of
    # degrading toward T=1 for awkward S (per-grid-step overhead ~0.35us).
    T = _cdiv(S, _cdiv(S, 16))
    Sp = _round_up(S, T)
    if Sp != S:
        xproj = jnp.pad(xproj, ((0, Sp - S), (0, 0), (0, 0)))
    nk = Sp // T

    # Optional batch sharding across TensorCores (useful on v7x, harmless on
    # single-TC chips).  Keep the sublane block a multiple of the packed tile.
    sub16 = (jnp.dtype(xproj.dtype).itemsize < 4
             or jnp.dtype(hseq_dtype).itemsize < 4)
    shard_unit = 16 if sub16 else 8
    nb = 2 if (Bp >= 2 * shard_unit and Bp % (2 * shard_unit) == 0) else 1
    Bs = Bp // nb

    # Weight residency: single-buffer the constant-index weights only when the
    # double-buffered footprint would be large (keeps Hp>=512 inside v7x VMEM).
    w_isz = jnp.dtype(whh0.dtype).itemsize
    weight_bytes = int(whh0.size + w1.size) * w_isz + int(b1.size) * 4
    single_buf = (2 * weight_bytes) > (24 << 20)

    def _wspec(shape):
        if single_buf:
            return pl.BlockSpec(shape, lambda b, k: (0, 0),
                                pipeline_mode=pl.Buffered(1))
        return pl.BlockSpec(shape, lambda b, k: (0, 0))

    x_isz = jnp.dtype(xproj.dtype).itemsize
    h_isz = jnp.dtype(hseq_dtype).itemsize
    state_bytes = 2 * Bs * Hp * 4
    vmem_need = (2 * T * Bs * G * x_isz                 # xproj blocks (2 bufs)
                 + (1 if single_buf else 2) * weight_bytes
                 + 2 * T * Bs * Hp * h_isz              # hseq out blocks
                 + 4 * 2 * state_bytes                  # h0/c0/hn/cn blocks
                 + 2 * state_bytes)                     # h/c scratch
    vmem_limit = int(min(max(vmem_need + (4 << 20), 16 << 20), 64 << 20))

    out_shapes = (
        jax.ShapeDtypeStruct((Sp, Bp, Hp), hseq_dtype),   # per-step top-layer h
        jax.ShapeDtypeStruct((2, Bp, Hp), jnp.float32),   # h_n
        jax.ShapeDtypeStruct((2, Bp, Hp), jnp.float32),   # c_n
    )
    kernel = functools.partial(_lstm_kernel, seq_len=S, needs_mask=(Sp != S))

    return pl.pallas_call(
        kernel,
        out_shape=out_shapes,
        grid=(nb, nk),
        in_specs=[
            pl.BlockSpec((T, Bs, G), lambda b, k: (k, b, 0)),    # xproj
            pl.BlockSpec((2, Bs, Hp), lambda b, k: (0, b, 0)),   # h0
            pl.BlockSpec((2, Bs, Hp), lambda b, k: (0, b, 0)),   # c0
            _wspec((Hp, G)),                                     # W_hh layer0
            _wspec((2 * Hp, G)),                                 # fused W layer1
            _wspec((1, G)),                                      # bias layer1
        ],
        out_specs=[
            pl.BlockSpec((T, Bs, Hp), lambda b, k: (k, b, 0)),
            pl.BlockSpec((2, Bs, Hp), lambda b, k: (0, b, 0)),
            pl.BlockSpec((2, Bs, Hp), lambda b, k: (0, b, 0)),
        ],
        scratch_shapes=[
            pltpu.VMEM((2, Bs, Hp), jnp.float32),   # h state (f32)
            pltpu.VMEM((2, Bs, Hp), jnp.float32),   # c state (f32)
        ],
        # Time axis MUST stay "arbitrary": state carry + final-state writeback
        # rely on sequential revisiting of the resident outputs per batch shard.
        compiler_params=pltpu.CompilerParams(
            dimension_semantics=("parallel", "arbitrary"),
            vmem_limit_bytes=vmem_limit),
    )(xproj, h0, c0, whh0, w1, b1)


# ----------------------------------------------------------------------------
# Parameter init (deterministic, PyTorch-like shapes) and forward pass.
# ----------------------------------------------------------------------------
def init_params(key, vocab_size, embedding_dim, hidden_dim):
    H, E, V = hidden_dim, embedding_dim, vocab_size
    ks = jax.random.split(key, 12)
    scale = 1.0 / jnp.sqrt(H)

    def u(k, shape):
        return jax.random.uniform(k, shape, jnp.float32, -scale, scale)

    return {
        "embedding": jax.random.normal(ks[0], (V, E), jnp.float32),
        "w_ih_l0": u(ks[1], (4 * H, E)),
        "w_hh_l0": u(ks[2], (4 * H, H)),
        "b_ih_l0": u(ks[3], (4 * H,)),
        "b_hh_l0": u(ks[4], (4 * H,)),
        "w_ih_l1": u(ks[5], (4 * H, H)),
        "w_hh_l1": u(ks[6], (4 * H, H)),
        "b_ih_l1": u(ks[7], (4 * H,)),
        "b_hh_l1": u(ks[8], (4 * H,)),
        "lin_w": u(ks[9], (V, H)),
        "lin_b": u(ks[10], (V,)),
    }


@functools.partial(jax.jit, static_argnames=("hidden_dim", "mxu_dtype"))
def poetry_forward(params, input_ids, hidden_dim, hidden=None,
                   mxu_dtype=jnp.bfloat16):
    """input_ids: (seq_len, batch) int32. Returns (logits, (h_n, c_n))."""
    S, B = input_ids.shape
    H = hidden_dim
    E = params["embedding"].shape[1]
    V = params["lin_w"].shape[0]

    Hp = _round_up(H, 128)    # lane-aligned gate tiles
    Bp = _round_up(B, 8)      # fill sublanes / MXU rows
    Ep = _round_up(E, 128)    # tile-aligned MXU contraction dim

    if hidden is None:
        h0 = jnp.zeros((2, Bp, Hp), jnp.float32)
        c0 = jnp.zeros((2, Bp, Hp), jnp.float32)
    else:
        h0_u, c0_u = hidden
        h0 = jnp.pad(h0_u.astype(jnp.float32),
                     ((0, 0), (0, Bp - B), (0, Hp - H)))
        c0 = jnp.pad(c0_u.astype(jnp.float32),
                     ((0, 0), (0, Bp - B), (0, Hp - H)))

    # Embedding lookup (glue gather).
    embeds = jnp.take(params["embedding"], input_ids, axis=0)      # (S, B, E)
    embeds = jnp.pad(embeds, ((0, 0), (0, Bp - B), (0, Ep - E)))   # (S, Bp, Ep)

    # Pack LSTM weights: gate-per-lane-tile layout; combined b_ih + b_hh;
    # layer-1 W_ih/W_hh fused into a single (2*Hp, 4*Hp) weight.
    wih0 = _pack_gate_weight(params["w_ih_l0"], Hp, in_dim_pad=Ep)  # (Ep, 4Hp)
    whh0 = _pack_gate_weight(params["w_hh_l0"], Hp, in_dim_pad=Hp)  # (Hp, 4Hp)
    wih1 = _pack_gate_weight(params["w_ih_l1"], Hp, in_dim_pad=Hp)
    whh1 = _pack_gate_weight(params["w_hh_l1"], Hp, in_dim_pad=Hp)
    w1 = jnp.concatenate([wih1, whh1], axis=0)                      # (2Hp, 4Hp)
    b0 = _pack_gate_bias(params["b_ih_l0"] + params["b_hh_l0"], Hp)
    b1 = _pack_gate_bias(params["b_ih_l1"] + params["b_hh_l1"], Hp)

    # Hoisted layer-0 input projection for ALL timesteps (bias folded in).
    xproj = pallas_linear(embeds.reshape(S * Bp, Ep).astype(mxu_dtype),
                          wih0.astype(mxu_dtype), b0, out_dtype=mxu_dtype)
    xproj = xproj.reshape(S, Bp, 4 * Hp)

    # Sequential LSTM (chunked over time, optionally batch-sharded).
    hseq, h_n, c_n = _run_lstm(xproj, h0, c0,
                               whh0.astype(mxu_dtype), w1.astype(mxu_dtype),
                               b1, hseq_dtype=mxu_dtype)
    Sp = hseq.shape[0]

    # Output projection fed with the padded, lane/sublane-aligned hseq rows
    # (no relayout of hseq); only the final logits are sliced to (S*B, V).
    lin_w = jnp.pad(params["lin_w"].T, ((0, Hp - H), (0, 0)))        # (Hp, V)
    logits_full = pallas_linear(hseq.reshape(Sp * Bp, Hp),
                                lin_w.astype(mxu_dtype),
                                params["lin_b"].reshape(1, V),
                                out_dtype=jnp.float32)
    logits = logits_full.reshape(Sp, Bp, V)[:S, :B, :].reshape(S * B, V)

    return logits, (h_n[:, :B, :H], c_n[:, :B, :H])


# ----------------------------------------------------------------------------
# Pure-JAX reference (correctness check only)
# ----------------------------------------------------------------------------
def reference_forward(params, input_ids, hidden_dim):
    S, B = input_ids.shape
    H = hidden_dim
    embeds = jnp.take(params["embedding"], input_ids, axis=0)

    def cell(x, h, c, wih, whh, bih, bhh):
        g = x @ wih.T + bih + h @ whh.T + bhh
        i, f, gg, o = jnp.split(g, 4, axis=-1)
        c_new = jax.nn.sigmoid(f) * c + jax.nn.sigmoid(i) * jnp.tanh(gg)
        h_new = jax.nn.sigmoid(o) * jnp.tanh(c_new)
        return h_new, c_new

    h = jnp.zeros((2, B, H), jnp.float32)
    c = jnp.zeros((2, B, H), jnp.float32)
    outs = []
    for t in range(S):
        h0n, c0n = cell(embeds[t], h[0], c[0], params["w_ih_l0"],
                        params["w_hh_l0"], params["b_ih_l0"], params["b_hh_l0"])
        h1n, c1n = cell(h0n, h[1], c[1], params["w_ih_l1"],
                        params["w_hh_l1"], params["b_ih_l1"], params["b_hh_l1"])
        h = jnp.stack([h0n, h1n])
        c = jnp.stack([c0n, c1n])
        outs.append(h1n)
    out = jnp.stack(outs).reshape(S * B, H)
    logits = out @ params["lin_w"].T + params["lin_b"]
    return logits, (h, c)


def _check(params, input_ids, hidden_dim, mxu_dtype, atol, rtol):
    S, B = input_ids.shape
    logits, (h_n, c_n) = poetry_forward(params, input_ids, hidden_dim,
                                        mxu_dtype=mxu_dtype)
    jax.block_until_ready((logits, h_n, c_n))
    ref_logits, (ref_h, ref_c) = reference_forward(params, input_ids, hidden_dim)
    assert logits.shape == (S * B, params["lin_w"].shape[0])
    assert h_n.shape == (2, B, hidden_dim)
    assert c_n.shape == (2, B, hidden_dim)
    assert jnp.allclose(logits, ref_logits, atol=atol, rtol=rtol)
    assert jnp.allclose(h_n, ref_h, atol=atol, rtol=rtol)
    assert jnp.allclose(c_n, ref_c, atol=atol, rtol=rtol)


if __name__ == "__main__":
    vocab_size, embedding_dim, hidden_dim = 64, 32, 32
    key = jax.random.PRNGKey(0)
    pkey, ik1, ik2, ik3 = jax.random.split(key, 4)
    params = init_params(pkey, vocab_size, embedding_dim, hidden_dim)

    # Base config (seq=8, batch=2): f32 MXU path is reference-accurate.
    ids_a = jax.random.randint(ik1, (8, 2), 0, vocab_size, dtype=jnp.int32)
    _check(params, ids_a, hidden_dim, jnp.float32, atol=2e-3, rtol=2e-3)
    # bf16 MXU-operand / bf16 hseq+xproj perf path; gate math stays f32.
    _check(params, ids_a, hidden_dim, jnp.bfloat16, atol=5e-2, rtol=5e-2)

    # Non-divisible seq (exercises time-padding + masked state carry).
    ids_b = jax.random.randint(ik2, (19, 3), 0, vocab_size, dtype=jnp.int32)
    _check(params, ids_b, hidden_dim, jnp.float32, atol=2e-3, rtol=2e-3)

    # Larger batch (exercises the batch-shard 'parallel' grid axis).
    ids_c = jax.random.randint(ik3, (8, 16), 0, vocab_size, dtype=jnp.int32)
    _check(params, ids_c, hidden_dim, jnp.float32, atol=2e-3, rtol=2e-3)

    print("KERNEL_OK")
</pallas_src>

<mosaic_0001>
module attributes {stable_mosaic.version = 11 : i64} {
  func.func @_linear_kernel(%arg0: i32, %arg1: i32, %arg2: memref<64x128xf32, #tpu.memory_space<vmem>>, %arg3: memref<128x512xf32, #tpu.memory_space<vmem>>, %arg4: memref<1x512xf32, #tpu.memory_space<vmem>>, %arg5: memref<64x512xf32, #tpu.memory_space<vmem>>) attributes {dimension_semantics = [#tpu.dimension_semantics<parallel>, #tpu.dimension_semantics<parallel>], iteration_bounds = array<i64: 1, 1>, scalar_prefetch = 0 : i64, scratch_operands = 0 : i64, tpu.core_type = #tpu.core_type<tc>, window_params = [{transform_indices = @transform_0, window_bounds = array<i64: 64, 128>}, {transform_indices = @transform_1, window_bounds = array<i64: 128, 512>}, {transform_indices = @transform_2, window_bounds = array<i64: 1, 512>}, {transform_indices = @transform_3, window_bounds = array<i64: 64, 512>}]} {
    %c0 = arith.constant 0 : index
    %c0_0 = arith.constant 0 : index
    %0 = vector.load %arg2[%c0, %c0_0] : memref<64x128xf32, #tpu.memory_space<vmem>>, vector<64x128xf32>
    %c0_1 = arith.constant 0 : index
    %c0_2 = arith.constant 0 : index
    %1 = vector.load %arg3[%c0_1, %c0_2] : memref<128x512xf32, #tpu.memory_space<vmem>>, vector<128x512xf32>
    %cst = arith.constant dense<0.000000e+00> : vector<64x512xf32>
    %2 = tpu.matmul %0, %1, %cst {dimension_numbers = #tpu.dot_dimension_numbers<[1], [0], [0], [1], [0, 0, 1, 1], [], []>} : vector<64x128xf32>, vector<128x512xf32>, vector<64x512xf32> -> vector<64x512xf32>
    %c0_3 = arith.constant 0 : index
    %c0_4 = arith.constant 0 : index
    %3 = vector.load %arg4[%c0_3, %c0_4] : memref<1x512xf32, #tpu.memory_space<vmem>>, vector<1x512xf32>
    %4 = vector.broadcast %3 : vector<1x512xf32> to vector<64x512xf32>
    %5 = arith.addf %2, %4 : vector<64x512xf32>
    %c0_5 = arith.constant 0 : index
    %c0_6 = arith.constant 0 : index
    %6 = vector.load %arg5[%c0_5, %c0_6] : memref<64x512xf32, #tpu.memory_space<vmem>>, vector<64x512xf32>
    tpu.vector_store %arg5[%c0_5, %c0_6], %5 {strides = array<i32>} : memref<64x512xf32, #tpu.memory_space<vmem>>, vector<64x512xf32>,
    return
  }
  func.func @transform_0(%arg0: i32, %arg1: i32) -> (i32, i32) {
    %c0_i32 = arith.constant 0 : i32
    %c0_i32_0 = arith.constant 0 : i32
    return %arg1, %c0_i32 : i32, i32
  }
  func.func @transform_1(%arg0: i32, %arg1: i32) -> (i32, i32) {
    %c0_i32 = arith.constant 0 : i32
    %c0_i32_0 = arith.constant 0 : i32
    return %c0_i32, %arg0 : i32, i32
  }
  func.func @transform_2(%arg0: i32, %arg1: i32) -> (i32, i32) {
    %c0_i32 = arith.constant 0 : i32
    %c0_i32_0 = arith.constant 0 : i32
    return %c0_i32, %arg0 : i32, i32
  }
  func.func @transform_3(%arg0: i32, %arg1: i32) -> (i32, i32) {
    %c0_i32 = arith.constant 0 : i32
    return %arg1, %arg0 : i32, i32
  }
}

module attributes {stable_mosaic.version = 11 : i64} {
  func.func @_lstm_kernel(%arg0: i32, %arg1: i32, %arg2: memref<8x8x512xf32, #tpu.memory_space<vmem>>, %arg3: memref<2x8x128xf32, #tpu.memory_space<vmem>>, %arg4: memref<2x8x128xf32, #tpu.memory_space<vmem>>, %arg5: memref<128x512xf32, #tpu.memory_space<vmem>>, %arg6: memref<256x512xf32, #tpu.memory_space<vmem>>, %arg7: memref<1x512xf32, #tpu.memory_space<vmem>>, %arg8: memref<8x8x128xf32, #tpu.memory_space<vmem>>, %arg9: memref<2x8x128xf32, #tpu.memory_space<vmem>>, %arg10: memref<2x8x128xf32, #tpu.memory_space<vmem>>, %arg11: memref<2x8x128xf32, #tpu.memory_space<vmem>>, %arg12: memref<2x8x128xf32, #tpu.memory_space<vmem>>) attributes {dimension_semantics = [#tpu.dimension_semantics<parallel>, #tpu.dimension_semantics<arbitrary>], iteration_bounds = array<i64: 1, 1>, scalar_prefetch = 0 : i64, scratch_operands = 2 : i64, tpu.core_type = #tpu.core_type<tc>, window_params = [{transform_indices = @transform_0, window_bounds = array<i64: 8, 8, 512>}, {transform_indices = @transform_1, window_bounds = array<i64: 2, 8, 128>}, {transform_indices = @transform_2, window_bounds = array<i64: 2, 8, 128>}, {pipeline_mode = #tpu.pipeline_mode<synchronous>, transform_indices = @transform_3, window_bounds = array<i64: 128, 512>}, {pipeline_mode = #tpu.pipeline_mode<synchronous>, transform_indices = @transform_4, window_bounds = array<i64: 256, 512>}, {pipeline_mode = #tpu.pipeline_mode<synchronous>, transform_indices = @transform_5, window_bounds = array<i64: 1, 512>}, {transform_indices = @transform_6, window_bounds = array<i64: 8, 8, 128>}, {transform_indices = @transform_7, window_bounds = array<i64: 2, 8, 128>}, {transform_indices = @transform_8, window_bounds = array<i64: 2, 8, 128>}]} {
    %c0_i32 = arith.constant 0 : i32
    %0 = arith.cmpi eq, %arg1, %c0_i32 : i32
    %1 = arith.extui %0 : i1 to i32
    %c0_i32_0 = arith.constant 0 : i32
    %2 = arith.cmpi ne, %1, %c0_i32_0 : i32
    scf.if %2 {
      %c0_127 = arith.constant 0 : index
      %c0_128 = arith.constant 0 : index
      %c0_129 = arith.constant 0 : index
      %527 = vector.load %arg3[%c0_127, %c0_128, %c0_129] : memref<2x8x128xf32, #tpu.memory_space<vmem>>, vector<2x8x128xf32>
      %c0_130 = arith.constant 0 : index
      %c0_131 = arith.constant 0 : index
      %c0_132 = arith.constant 0 : index
      %528 = vector.load %arg11[%c0_130, %c0_131, %c0_132] : memref<2x8x128xf32, #tpu.memory_space<vmem>>, vector<2x8x128xf32>
      tpu.vector_store %arg11[%c0_130, %c0_131, %c0_132], %527 {strides = array<i32>} : memref<2x8x128xf32, #tpu.memory_space<vmem>>, vector<2x8x128xf32>,
      %c0_133 = arith.constant 0 : index
      %c0_134 = arith.constant 0 : index
      %c0_135 = arith.constant 0 : index
      %529 = vector.load %arg4[%c0_133, %c0_134, %c0_135] : memref<2x8x128xf32, #tpu.memory_space<vmem>>, vector<2x8x128xf32>
      %c0_136 = arith.constant 0 : index
      %c0_137 = arith.constant 0 : index
      %c0_138 = arith.constant 0 : index
      %530 = vector.load %arg12[%c0_136, %c0_137, %c0_138] : memref<2x8x128xf32, #tpu.memory_space<vmem>>, vector<2x8x128xf32>
      tpu.vector_store %arg12[%c0_136, %c0_137, %c0_138], %529 {strides = array<i32>} : memref<2x8x128xf32, #tpu.memory_space<vmem>>, vector<2x8x128xf32>,
    } else {
    }
    %c0 = arith.constant 0 : index
    %c0_1 = arith.constant 0 : index
    %3 = vector.load %arg5[%c0, %c0_1] : memref<128x512xf32, #tpu.memory_space<vmem>>, vector<128x512xf32>
    %c0_2 = arith.constant 0 : index
    %c0_3 = arith.constant 0 : index
    %4 = vector.load %arg6[%c0_2, %c0_3] : memref<256x512xf32, #tpu.memory_space<vmem>>, vector<256x512xf32>
    %c0_4 = arith.constant 0 : index
    %c0_5 = arith.constant 0 : index
    %5 = vector.load %arg7[%c0_4, %c0_5] : memref<1x512xf32, #tpu.memory_space<vmem>>, vector<1x512xf32>
    %6 = vector.shape_cast %5 : vector<1x512xf32> to vector<1x512xf32>
    %7 = vector.broadcast %6 : vector<1x512xf32> to vector<8x512xf32>
    %c0_6 = arith.constant 0 : index
    %c0_7 = arith.constant 0 : index
    %c0_8 = arith.constant 0 : index
    %8 = vector.load %arg11[%c0_6, %c0_7, %c0_8] : memref<2x8x128xf32, #tpu.memory_space<vmem>>, vector<1x8x128xf32>
    %9 = vector.shape_cast %8 : vector<1x8x128xf32> to vector<8x128xf32>
    %c0_9 = arith.constant 0 : index
    %c0_10 = arith.constant 0 : index
    %c0_11 = arith.constant 0 : index
    %10 = vector.load %arg12[%c0_9, %c0_10, %c0_11] : memref<2x8x128xf32, #tpu.memory_space<vmem>>, vector<1x8x128xf32>
    %11 = vector.shape_cast %10 : vector<1x8x128xf32> to vector<8x128xf32>
    %c1 = arith.constant 1 : index
    %c0_12 = arith.constant 0 : index
    %c0_13 = arith.constant 0 : index
    %12 = vector.load %arg11[%c1, %c0_12, %c0_13] : memref<2x8x128xf32, #tpu.memory_space<vmem>>, vector<1x8x128xf32>
    %13 = vector.shape_cast %12 : vector<1x8x128xf32> to vector<8x128xf32>
    %c1_14 = arith.constant 1 : index
    %c0_15 = arith.constant 0 : index
    %c0_16 = arith.constant 0 : index
    %14 = vector.load %arg12[%c1_14, %c0_15, %c0_16] : memref<2x8x128xf32, #tpu.memory_space<vmem>>, vector<1x8x128xf32>
    %15 = vector.shape_cast %14 : vector<1x8x128xf32> to vector<8x128xf32>
    %c0_i32_17 = arith.constant 0 : i32
    %16 = arith.index_cast %c0_i32_17 : i32 to index
    %c0_18 = arith.constant 0 : index
    %c0_19 = arith.constant 0 : index
    %17 = vector.load %arg2[%16, %c0_18, %c0_19] : memref<8x8x512xf32, #tpu.memory_space<vmem>>, vector<1x8x512xf32>
    %18 = vector.shape_cast %17 : vector<1x8x512xf32> to vector<8x512xf32>
    %cst = arith.constant dense<0.000000e+00> : vector<8x512xf32>
    %19 = tpu.matmul %9, %3, %cst {dimension_numbers = #tpu.dot_dimension_numbers<[1], [0], [0], [1], [0, 0, 1, 1], [], []>} : vector<8x128xf32>, vector<128x512xf32>, vector<8x512xf32> -> vector<8x512xf32>
    %20 = arith.addf %18, %19 : vector<8x512xf32>
    %21 = vector.extract_strided_slice %20 {offsets = [0, 0], sizes = [8, 128], strides = [1, 1]} : vector<8x512xf32> to vector<8x128xf32>
    %22 = arith.negf %21 : vector<8x128xf32>
    %23 = math.exp %22 : vector<8x128xf32>
    %cst_20 = arith.constant 1.000000e+00 : f32
    %24 = vector.broadcast %cst_20 : f32 to vector<8x128xf32>
    %25 = arith.addf %24, %23 : vector<8x128xf32>
    %26 = arith.divf %24, %25 : vector<8x128xf32>
    %27 = vector.extract_strided_slice %20 {offsets = [0, 128], sizes = [8, 128], strides = [1, 1]} : vector<8x512xf32> to vector<8x128xf32>
    %28 = arith.negf %27 : vector<8x128xf32>
    %29 = math.exp %28 : vector<8x128xf32>
    %cst_21 = arith.constant 1.000000e+00 : f32
    %30 = vector.broadcast %cst_21 : f32 to vector<8x128xf32>
    %31 = arith.addf %30, %29 : vector<8x128xf32>
    %32 = arith.divf %30, %31 : vector<8x128xf32>
    %33 = vector.extract_strided_slice %20 {offsets = [0, 256], sizes = [8, 128], strides = [1, 1]} : vector<8x512xf32> to vector<8x128xf32>
    %34 = math.tanh %33 : vector<8x128xf32>
    %35 = vector.extract_strided_slice %20 {offsets = [0, 384], sizes = [8, 128], strides = [1, 1]} : vector<8x512xf32> to vector<8x128xf32>
    %36 = arith.negf %35 : vector<8x128xf32>
    %37 = math.exp %36 : vector<8x128xf32>
    %cst_22 = arith.constant 1.000000e+00 : f32
    %38 = vector.broadcast %cst_22 : f32 to vector<8x128xf32>
    %39 = arith.addf %38, %37 : vector<8x128xf32>
    %40 = arith.divf %38, %39 : vector<8x128xf32>
    %41 = arith.mulf %32, %11 : vector<8x128xf32>
    %42 = arith.mulf %26, %34 : vector<8x128xf32>
    %43 = arith.addf %41, %42 : vector<8x128xf32>
    %44 = math.tanh %43 : vector<8x128xf32>
    %45 = arith.mulf %40, %44 : vector<8x128xf32>
    %46 = tpu.concatenate %45, %13 in 1 : vector<8x128xf32>, vector<8x128xf32> -> vector<8x256xf32>
    %cst_23 = arith.constant dense<0.000000e+00> : vector<8x512xf32>
    %47 = tpu.matmul %46, %4, %cst_23 {dimension_numbers = #tpu.dot_dimension_numbers<[1], [0], [0], [1], [0, 0, 1, 1], [], []>} : vector<8x256xf32>, vector<256x512xf32>, vector<8x512xf32> -> vector<8x512xf32>
    %48 = arith.addf %47, %7 : vector<8x512xf32>
    %49 = vector.extract_strided_slice %48 {offsets = [0, 0], sizes = [8, 128], strides = [1, 1]} : vector<8x512xf32> to vector<8x128xf32>
    %50 = arith.negf %49 : vector<8x128xf32>
    %51 = math.exp %50 : vector<8x128xf32>
    %cst_24 = arith.constant 1.000000e+00 : f32
    %52 = vector.broadcast %cst_24 : f32 to vector<8x128xf32>
    %53 = arith.addf %52, %51 : vector<8x128xf32>
    %54 = arith.divf %52, %53 : vector<8x128xf32>
    %55 = vector.extract_strided_slice %48 {offsets = [0, 128], sizes = [8, 128], strides = [1, 1]} : vector<8x512xf32> to vector<8x128xf32>
    %56 = arith.negf %55 : vector<8x128xf32>
    %57 = math.exp %56 : vector<8x128xf32>
    %cst_25 = arith.constant 1.000000e+00 : f32
    %58 = vector.broadcast %cst_25 : f32 to vector<8x128xf32>
    %59 = arith.addf %58, %57 : vector<8x128xf32>
    %60 = arith.divf %58, %59 : vector<8x128xf32>
    %61 = vector.extract_strided_slice %48 {offsets = [0, 256], sizes = [8, 128], strides = [1, 1]} : vector<8x512xf32> to vector<8x128xf32>
    %62 = math.tanh %61 : vector<8x128xf32>
    %63 = vector.extract_strided_slice %48 {offsets = [0, 384], sizes = [8, 128], strides = [1, 1]} : vector<8x512xf32> to vector<8x128xf32>
    %64 = arith.negf %63 : vector<8x128xf32>
    %65 = math.exp %64 : vector<8x128xf32>
    %cst_26 = arith.constant 1.000000e+00 : f32
    %66 = vector.broadcast %cst_26 : f32 to vector<8x128xf32>
    %67 = arith.addf %66, %65 : vector<8x128xf32>
    %68 = arith.divf %66, %67 : vector<8x128xf32>
    %69 = arith.mulf %60, %15 : vector<8x128xf32>
    %70 = arith.mulf %54, %62 : vector<8x128xf32>
    %71 = arith.addf %69, %70 : vector<8x128xf32>
    %72 = math.tanh %71 : vector<8x128xf32>
    %73 = arith.mulf %68, %72 : vector<8x128xf32>
    %74 = arith.index_cast %c0_i32_17 : i32 to index
    %c0_27 = arith.constant 0 : index
    %c0_28 = arith.constant 0 : index
    %75 = vector.load %arg8[%74, %c0_27, %c0_28] : memref<8x8x128xf32, #tpu.memory_space<vmem>>, vector<1x8x128xf32>
    %76 = vector.shape_cast %75 : vector<1x8x128xf32> to vector<8x128xf32>
    %77 = vector.shape_cast %73 : vector<8x128xf32> to vector<1x8x128xf32>
    tpu.vector_store %arg8[%74, %c0_27, %c0_28], %77 {strides = array<i32>} : memref<8x8x128xf32, #tpu.memory_space<vmem>>, vector<1x8x128xf32>,
    %c1_i32 = arith.constant 1 : i32
    %78 = arith.index_cast %c1_i32 : i32 to index
    %c0_29 = arith.constant 0 : index
    %c0_30 = arith.constant 0 : index
    %79 = vector.load %arg2[%78, %c0_29, %c0_30] : memref<8x8x512xf32, #tpu.memory_space<vmem>>, vector<1x8x512xf32>
    %80 = vector.shape_cast %79 : vector<1x8x512xf32> to vector<8x512xf32>
    %cst_31 = arith.constant dense<0.000000e+00> : vector<8x512xf32>
    %81 = tpu.matmul %45, %3, %cst_31 {dimension_numbers = #tpu.dot_dimension_numbers<[1], [0], [0], [1], [0, 0, 1, 1], [], []>} : vector<8x128xf32>, vector<128x512xf32>, vector<8x512xf32> -> vector<8x512xf32>
    %82 = arith.addf %80, %81 : vector<8x512xf32>
    %83 = vector.extract_strided_slice %82 {offsets = [0, 0], sizes = [8, 128], strides = [1, 1]} : vector<8x512xf32> to vector<8x128xf32>
    %84 = arith.negf %83 : vector<8x128xf32>
    %85 = math.exp %84 : vector<8x128xf32>
    %cst_32 = arith.constant 1.000000e+00 : f32
    %86 = vector.broadcast %cst_32 : f32 to vector<8x128xf32>
    %87 = arith.addf %86, %85 : vector<8x128xf32>
    %88 = arith.divf %86, %87 : vector<8x128xf32>
    %89 = vector.extract_strided_slice %82 {offsets = [0, 128], sizes = [8, 128], strides = [1, 1]} : vector<8x512xf32> to vector<8x128xf32>
    %90 = arith.negf %89 : vector<8x128xf32>
    %91 = math.exp %90 : vector<8x128xf32>
    %cst_33 = arith.constant 1.000000e+00 : f32
    %92 = vector.broadcast %cst_33 : f32 to vector<8x128xf32>
    %93 = arith.addf %92, %91 : vector<8x128xf32>
    %94 = arith.divf %92, %93 : vector<8x128xf32>
    %95 = vector.extract_strided_slice %82 {offsets = [0, 256], sizes = [8, 128], strides = [1, 1]} : vector<8x512xf32> to vector<8x128xf32>
    %96 = math.tanh %95 : vector<8x128xf32>
    %97 = vector.extract_strided_slice %82 {offsets = [0, 384], sizes = [8, 128], strides = [1, 1]} : vector<8x512xf32> to vector<8x128xf32>
    %98 = arith.negf %97 : vector<8x128xf32>
    %99 = math.exp %98 : vector<8x128xf32>
    %cst_34 = arith.constant 1.000000e+00 : f32
    %100 = vector.broadcast %cst_34 : f32 to vector<8x128xf32>
    %101 = arith.addf %100, %99 : vector<8x128xf32>
    %102 = arith.divf %100, %101 : vector<8x128xf32>
    %103 = arith.mulf %94, %43 : vector<8x128xf32>
    %104 = arith.mulf %88, %96 : vector<8x128xf32>
    %105 = arith.addf %103, %104 : vector<8x128xf32>
    %106 = math.tanh %105 : vector<8x128xf32>
    %107 = arith.mulf %102, %106 : vector<8x128xf32>
    %108 = tpu.concatenate %107, %73 in 1 : vector<8x128xf32>, vector<8x128xf32> -> vector<8x256xf32>
    %cst_35 = arith.constant dense<0.000000e+00> : vector<8x512xf32>
    %109 = tpu.matmul %108, %4, %cst_35 {dimension_numbers = #tpu.dot_dimension_numbers<[1], [0], [0], [1], [0, 0, 1, 1], [], []>} : vector<8x256xf32>, vector<256x512xf32>, vector<8x512xf32> -> vector<8x512xf32>
    %110 = arith.addf %109, %7 : vector<8x512xf32>
    %111 = vector.extract_strided_slice %110 {offsets = [0, 0], sizes = [8, 128], strides = [1, 1]} : vector<8x512xf32> to vector<8x128xf32>
    %112 = arith.negf %111 : vector<8x128xf32>
    %113 = math.exp %112 : vector<8x128xf32>
    %cst_36 = arith.constant 1.000000e+00 : f32
    %114 = vector.broadcast %cst_36 : f32 to vector<8x128xf32>
    %115 = arith.addf %114, %113 : vector<8x128xf32>
    %116 = arith.divf %114, %115 : vector<8x128xf32>
    %117 = vector.extract_strided_slice %110 {offsets = [0, 128], sizes = [8, 128], strides = [1, 1]} : vector<8x512xf32> to vector<8x128xf32>
    %118 = arith.negf %117 : vector<8x128xf32>
    %119 = math.exp %118 : vector<8x128xf32>
    %cst_37 = arith.constant 1.000000e+00 : f32
    %120 = vector.broadcast %cst_37 : f32 to vector<8x128xf32>
    %121 = arith.addf %120, %119 : vector<8x128xf32>
    %122 = arith.divf %120, %121 : vector<8x128xf32>
    %123 = vector.extract_strided_slice %110 {offsets = [0, 256], sizes = [8, 128], strides = [1, 1]} : vector<8x512xf32> to vector<8x128xf32>
    %124 = math.tanh %123 : vector<8x128xf32>
    %125 = vector.extract_strided_slice %110 {offsets = [0, 384], sizes = [8, 128], strides = [1, 1]} : vector<8x512xf32> to vector<8x128xf32>
    %126 = arith.negf %125 : vector<8x128xf32>
    %127 = math.exp %126 : vector<8x128xf32>
    %cst_38 = arith.constant 1.000000e+00 : f32
    %128 = vector.broadcast %cst_38 : f32 to vector<8x128xf32>
    %129 = arith.addf %128, %127 : vector<8x128xf32>
    %130 = arith.divf %128, %129 : vector<8x128xf32>
    %131 = arith.mulf %122, %71 : vector<8x128xf32>
    %132 = arith.mulf %116, %124 : vector<8x128xf32>
    %133 = arith.addf %131, %132 : vector<8x128xf32>
    %134 = math.tanh %133 : vector<8x128xf32>
    %135 = arith.mulf %130, %134 : vector<8x128xf32>
    %136 = arith.index_cast %c1_i32 : i32 to index
    %c0_39 = arith.constant 0 : index
    %c0_40 = arith.constant 0 : index
    %137 = vector.load %arg8[%136, %c0_39, %c0_40] : memref<8x8x128xf32, #tpu.memory_space<vmem>>, vector<1x8x128xf32>
    %138 = vector.shape_cast %137 : vector<1x8x128xf32> to vector<8x128xf32>
    %139 = vector.shape_cast %135 : vector<8x128xf32> to vector<1x8x128xf32>
    tpu.vector_store %arg8[%136, %c0_39, %c0_40], %139 {strides = array<i32>} : memref<8x8x128xf32, #tpu.memory_space<vmem>>, vector<1x8x128xf32>,
    %c2_i32 = arith.constant 2 : i32
    %140 = arith.index_cast %c2_i32 : i32 to index
    %c0_41 = arith.constant 0 : index
    %c0_42 = arith.constant 0 : index
    %141 = vector.load %arg2[%140, %c0_41, %c0_42] : memref<8x8x512xf32, #tpu.memory_space<vmem>>, vector<1x8x512xf32>
    %142 = vector.shape_cast %141 : vector<1x8x512xf32> to vector<8x512xf32>
    %cst_43 = arith.constant dense<0.000000e+00> : vector<8x512xf32>
    %143 = tpu.matmul %107, %3, %cst_43 {dimension_numbers = #tpu.dot_dimension_numbers<[1], [0], [0], [1], [0, 0, 1, 1], [], []>} : vector<8x128xf32>, vector<128x512xf32>, vector<8x512xf32> -> vector<8x512xf32>
    %144 = arith.addf %142, %143 : vector<8x512xf32>
    %145 = vector.extract_strided_slice %144 {offsets = [0, 0], sizes = [8, 128], strides = [1, 1]} : vector<8x512xf32> to vector<8x128xf32>
    %146 = arith.negf %145 : vector<8x128xf32>
    %147 = math.exp %146 : vector<8x128xf32>
    %cst_44 = arith.constant 1.000000e+00 : f32
    %148 = vector.broadcast %cst_44 : f32 to vector<8x128xf32>
    %149 = arith.addf %148, %147 : vector<8x128xf32>
    %150 = arith.divf %148, %149 : vector<8x128xf32>
    %151 = vector.extract_strided_slice %144 {offsets = [0, 128], sizes = [8, 128], strides = [1, 1]} : vector<8x512xf32> to vector<8x128xf32>
    %152 = arith.negf %151 : vector<8x128xf32>
    %153 = math.exp %152 : vector<8x128xf32>
    %cst_45 = arith.constant 1.000000e+00 : f32
    %154 = vector.broadcast %cst_45 : f32 to vector<8x128xf32>
    %155 = arith.addf %154, %153 : vector<8x128xf32>
    %156 = arith.divf %154, %155 : vector<8x128xf32>
    %157 = vector.extract_strided_slice %144 {offsets = [0, 256], sizes = [8, 128], strides = [1, 1]} : vector<8x512xf32> to vector<8x128xf32>
    %158 = math.tanh %157 : vector<8x128xf32>
    %159 = vector.extract_strided_slice %144 {offsets = [0, 384], sizes = [8, 128], strides = [1, 1]} : vector<8x512xf32> to vector<8x128xf32>
    %160 = arith.negf %159 : vector<8x128xf32>
    %161 = math.exp %160 : vector<8x128xf32>
    %cst_46 = arith.constant 1.000000e+00 : f32
    %162 = vector.broadcast %cst_46 : f32 to vector<8x128xf32>
    %163 = arith.addf %162, %161 : vector<8x128xf32>
    %164 = arith.divf %162, %163 : vector<8x128xf32>
    %165 = arith.mulf %156, %105 : vector<8x128xf32>
    %166 = arith.mulf %150, %158 : vector<8x128xf32>
    %167 = arith.addf %165, %166 : vector<8x128xf32>
    %168 = math.tanh %167 : vector<8x128xf32>
    %169 = arith.mulf %164, %168 : vector<8x128xf32>
    %170 = tpu.concatenate %169, %135 in 1 : vector<8x128xf32>, vector<8x128xf32> -> vector<8x256xf32>
    %cst_47 = arith.constant dense<0.000000e+00> : vector<8x512xf32>
    %171 = tpu.matmul %170, %4, %cst_47 {dimension_numbers = #tpu.dot_dimension_numbers<[1], [0], [0], [1], [0, 0, 1, 1], [], []>} : vector<8x256xf32>, vector<256x512xf32>, vector<8x512xf32> -> vector<8x512xf32>
    %172 = arith.addf %171, %7 : vector<8x512xf32>
    %173 = vector.extract_strided_slice %172 {offsets = [0, 0], sizes = [8, 128], strides = [1, 1]} : vector<8x512xf32> to vector<8x128xf32>
    %174 = arith.negf %173 : vector<8x128xf32>
    %175 = math.exp %174 : vector<8x128xf32>
    %cst_48 = arith.constant 1.000000e+00 : f32
    %176 = vector.broadcast %cst_48 : f32 to vector<8x128xf32>
    %177 = arith.addf %176, %175 : vector<8x128xf32>
    %178 = arith.divf %176, %177 : vector<8x128xf32>
    %179 = vector.extract_strided_slice %172 {offsets = [0, 128], sizes = [8, 128], strides = [1, 1]} : vector<8x512xf32> to vector<8x128xf32>
    %180 = arith.negf %179 : vector<8x128xf32>
    %181 = math.exp %180 : vector<8x128xf32>
    %cst_49 = arith.constant 1.000000e+00 : f32
    %182 = vector.broadcast %cst_49 : f32 to vector<8x128xf32>
    %183 = arith.addf %182, %181 : vector<8x128xf32>
    %184 = arith.divf %182, %183 : vector<8x128xf32>
    %185 = vector.extract_strided_slice %172 {offsets = [0, 256], sizes = [8, 128], strides = [1, 1]} : vector<8x512xf32> to vector<8x128xf32>
    %186 = math.tanh %185 : vector<8x128xf32>
    %187 = vector.extract_strided_slice %172 {offsets = [0, 384], sizes = [8, 128], strides = [1, 1]} : vector<8x512xf32> to vector<8x128xf32>
    %188 = arith.negf %187 : vector<8x128xf32>
    %189 = math.exp %188 : vector<8x128xf32>
    %cst_50 = arith.constant 1.000000e+00 : f32
    %190 = vector.broadcast %cst_50 : f32 to vector<8x128xf32>
    %191 = arith.addf %190, %189 : vector<8x128xf32>
    %192 = arith.divf %190, %191 : vector<8x128xf32>
    %193 = arith.mulf %184, %133 : vector<8x128xf32>
    %194 = arith.mulf %178, %186 : vector<8x128xf32>
    %195 = arith.addf %193, %194 : vector<8x128xf32>
    %196 = math.tanh %195 : vector<8x128xf32>
    %197 = arith.mulf %192, %196 : vector<8x128xf32>
    %198 = arith.index_cast %c2_i32 : i32 to index
    %c0_51 = arith.constant 0 : index
    %c0_52 = arith.constant 0 : index
    %199 = vector.load %arg8[%198, %c0_51, %c0_52] : memref<8x8x128xf32, #tpu.memory_space<vmem>>, vector<1x8x128xf32>
    %200 = vector.shape_cast %199 : vector<1x8x128xf32> to vector<8x128xf32>
    %201 = vector.shape_cast %197 : vector<8x128xf32> to vector<1x8x128xf32>
    tpu.vector_store %arg8[%198, %c0_51, %c0_52], %201 {strides = array<i32>} : memref<8x8x128xf32, #tpu.memory_space<vmem>>, vector<1x8x128xf32>,
    %c3_i32 = arith.constant 3 : i32
    %202 = arith.index_cast %c3_i32 : i32 to index
    %c0_53 = arith.constant 0 : index
    %c0_54 = arith.constant 0 : index
    %203 = vector.load %arg2[%202, %c0_53, %c0_54] : memref<8x8x512xf32, #tpu.memory_space<vmem>>, vector<1x8x512xf32>
    %204 = vector.shape_cast %203 : vector<1x8x512xf32> to vector<8x512xf32>
    %cst_55 = arith.constant dense<0.000000e+00> : vector<8x512xf32>
    %205 = tpu.matmul %169, %3, %cst_55 {dimension_numbers = #tpu.dot_dimension_numbers<[1], [0], [0], [1], [0, 0, 1, 1], [], []>} : vector<8x128xf32>, vector<128x512xf32>, vector<8x512xf32> -> vector<8x512xf32>
    %206 = arith.addf %204, %205 : vector<8x512xf32>
    %207 = vector.extract_strided_slice %206 {offsets = [0, 0], sizes = [8, 128], strides = [1, 1]} : vector<8x512xf32> to vector<8x128xf32>
    %208 = arith.negf %207 : vector<8x128xf32>
    %209 = math.exp %208 : vector<8x128xf32>
    %cst_56 = arith.constant 1.000000e+00 : f32
    %210 = vector.broadcast %cst_56 : f32 to vector<8x128xf32>
    %211 = arith.addf %210, %209 : vector<8x128xf32>
    %212 = arith.divf %210, %211 : vector<8x128xf32>
    %213 = vector.extract_strided_slice %206 {offsets = [0, 128], sizes = [8, 128], strides = [1, 1]} : vector<8x512xf32> to vector<8x128xf32>
    %214 = arith.negf %213 : vector<8x128xf32>
    %215 = math.exp %214 : vector<8x128xf32>
    %cst_57 = arith.constant 1.000000e+00 : f32
    %216 = vector.broadcast %cst_57 : f32 to vector<8x128xf32>
    %217 = arith.addf %216, %215 : vector<8x128xf32>
    %218 = arith.divf %216, %217 : vector<8x128xf32>
    %219 = vector.extract_strided_slice %206 {offsets = [0, 256], sizes = [8, 128], strides = [1, 1]} : vector<8x512xf32> to vector<8x128xf32>
    %220 = math.tanh %219 : vector<8x128xf32>
    %221 = vector.extract_strided_slice %206 {offsets = [0, 384], sizes = [8, 128], strides = [1, 1]} : vector<8x512xf32> to vector<8x128xf32>
    %222 = arith.negf %221 : vector<8x128xf32>
    %223 = math.exp %222 : vector<8x128xf32>
    %cst_58 = arith.constant 1.000000e+00 : f32
    %224 = vector.broadcast %cst_58 : f32 to vector<8x128xf32>
    %225 = arith.addf %224, %223 : vector<8x128xf32>
    %226 = arith.divf %224, %225 : vector<8x128xf32>
    %227 = arith.mulf %218, %167 : vector<8x128xf32>
    %228 = arith.mulf %212, %220 : vector<8x128xf32>
    %229 = arith.addf %227, %228 : vector<8x128xf32>
    %230 = math.tanh %229 : vector<8x128xf32>
    %231 = arith.mulf %226, %230 : vector<8x128xf32>
    %232 = tpu.concatenate %231, %197 in 1 : vector<8x128xf32>, vector<8x128xf32> -> vector<8x256xf32>
    %cst_59 = arith.constant dense<0.000000e+00> : vector<8x512xf32>
    %233 = tpu.matmul %232, %4, %cst_59 {dimension_numbers = #tpu.dot_dimension_numbers<[1], [0], [0], [1], [0, 0, 1, 1], [], []>} : vector<8x256xf32>, vector<256x512xf32>, vector<8x512xf32> -> vector<8x512xf32>
    %234 = arith.addf %233, %7 : vector<8x512xf32>
    %235 = vector.extract_strided_slice %234 {offsets = [0, 0], sizes = [8, 128], strides = [1, 1]} : vector<8x512xf32> to vector<8x128xf32>
    %236 = arith.negf %235 : vector<8x128xf32>
    %237 = math.exp %236 : vector<8x128xf32>
    %cst_60 = arith.constant 1.000000e+00 : f32
    %238 = vector.broadcast %cst_60 : f32 to vector<8x128xf32>
    %239 = arith.addf %238, %237 : vector<8x128xf32>
    %240 = arith.divf %238, %239 : vector<8x128xf32>
    %241 = vector.extract_strided_slice %234 {offsets = [0, 128], sizes = [8, 128], strides = [1, 1]} : vector<8x512xf32> to vector<8x128xf32>
    %242 = arith.negf %241 : vector<8x128xf32>
    %243 = math.exp %242 : vector<8x128xf32>
    %cst_61 = arith.constant 1.000000e+00 : f32
    %244 = vector.broadcast %cst_61 : f32 to vector<8x128xf32>
    %245 = arith.addf %244, %243 : vector<8x128xf32>
    %246 = arith.divf %244, %245 : vector<8x128xf32>
    %247 = vector.extract_strided_slice %234 {offsets = [0, 256], sizes = [8, 128], strides = [1, 1]} : vector<8x512xf32> to vector<8x128xf32>
    %248 = math.tanh %247 : vector<8x128xf32>
    %249 = vector.extract_strided_slice %234 {offsets = [0, 384], sizes = [8, 128], strides = [1, 1]} : vector<8x512xf32> to vector<8x128xf32>
    %250 = arith.negf %249 : vector<8x128xf32>
    %251 = math.exp %250 : vector<8x128xf32>
    %cst_62 = arith.constant 1.000000e+00 : f32
    %252 = vector.broadcast %cst_62 : f32 to vector<8x128xf32>
    %253 = arith.addf %252, %251 : vector<8x128xf32>
    %254 = arith.divf %252, %253 : vector<8x128xf32>
    %255 = arith.mulf %246, %195 : vector<8x128xf32>
    %256 = arith.mulf %240, %248 : vector<8x128xf32>
    %257 = arith.addf %255, %256 : vector<8x128xf32>
    %258 = math.tanh %257 : vector<8x128xf32>
    %259 = arith.mulf %254, %258 : vector<8x128xf32>
    %260 = arith.index_cast %c3_i32 : i32 to index
    %c0_63 = arith.constant 0 : index
    %c0_64 = arith.constant 0 : index
    %261 = vector.load %arg8[%260, %c0_63, %c0_64] : memref<8x8x128xf32, #tpu.memory_space<vmem>>, vector<1x8x128xf32>
    %262 = vector.shape_cast %261 : vector<1x8x128xf32> to vector<8x128xf32>
    %263 = vector.shape_cast %259 : vector<8x128xf32> to vector<1x8x128xf32>
    tpu.vector_store %arg8[%260, %c0_63, %c0_64], %263 {strides = array<i32>} : memref<8x8x128xf32, #tpu.memory_space<vmem>>, vector<1x8x128xf32>,
    %c4_i32 = arith.constant 4 : i32
    %264 = arith.index_cast %c4_i32 : i32 to index
    %c0_65 = arith.constant 0 : index
    %c0_66 = arith.constant 0 : index
    %265 = vector.load %arg2[%264, %c0_65, %c0_66] : memref<8x8x512xf32, #tpu.memory_space<vmem>>, vector<1x8x512xf32>
    %266 = vector.shape_cast %265 : vector<1x8x512xf32> to vector<8x512xf32>
    %cst_67 = arith.constant dense<0.000000e+00> : vector<8x512xf32>
    %267 = tpu.matmul %231, %3, %cst_67 {dimension_numbers = #tpu.dot_dimension_numbers<[1], [0], [0], [1], [0, 0, 1, 1], [], []>} : vector<8x128xf32>, vector<128x512xf32>, vector<8x512xf32> -> vector<8x512xf32>
    %268 = arith.addf %266, %267 : vector<8x512xf32>
    %269 = vector.extract_strided_slice %268 {offsets = [0, 0], sizes = [8, 128], strides = [1, 1]} : vector<8x512xf32> to vector<8x128xf32>
    %270 = arith.negf %269 : vector<8x128xf32>
    %271 = math.exp %270 : vector<8x128xf32>
    %cst_68 = arith.constant 1.000000e+00 : f32
    %272 = vector.broadcast %cst_68 : f32 to vector<8x128xf32>
    %273 = arith.addf %272, %271 : vector<8x128xf32>
    %274 = arith.divf %272, %273 : vector<8x128xf32>
    %275 = vector.extract_strided_slice %268 {offsets = [0, 128], sizes = [8, 128], strides = [1, 1]} : vector<8x512xf32> to vector<8x128xf32>
    %276 = arith.negf %275 : vector<8x128xf32>
    %277 = math.exp %276 : vector<8x128xf32>
    %cst_69 = arith.constant 1.000000e+00 : f32
    %278 = vector.broadcast %cst_69 : f32 to vector<8x128xf32>
    %279 = arith.addf %278, %277 : vector<8x128xf32>
    %280 = arith.divf %278, %279 : vector<8x128xf32>
    %281 = vector.extract_strided_slice %268 {offsets = [0, 256], sizes = [8, 128], strides = [1, 1]} : vector<8x512xf32> to vector<8x128xf32>
    %282 = math.tanh %281 : vector<8x128xf32>
    %283 = vector.extract_strided_slice %268 {offsets = [0, 384], sizes = [8, 128], strides = [1, 1]} : vector<8x512xf32> to vector<8x128xf32>
    %284 = arith.negf %283 : vector<8x128xf32>
    %285 = math.exp %284 : vector<8x128xf32>
    %cst_70 = arith.constant 1.000000e+00 : f32
    %286 = vector.broadcast %cst_70 : f32 to vector<8x128xf32>
    %287 = arith.addf %286, %285 : vector<8x128xf32>
    %288 = arith.divf %286, %287 : vector<8x128xf32>
    %289 = arith.mulf %280, %229 : vector<8x128xf32>
    %290 = arith.mulf %274, %282 : vector<8x128xf32>
    %291 = arith.addf %289, %290 : vector<8x128xf32>
    %292 = math.tanh %291 : vector<8x128xf32>
    %293 = arith.mulf %288, %292 : vector<8x128xf32>
    %294 = tpu.concatenate %293, %259 in 1 : vector<8x128xf32>, vector<8x128xf32> -> vector<8x256xf32>
    %cst_71 = arith.constant dense<0.000000e+00> : vector<8x512xf32>
    %295 = tpu.matmul %294, %4, %cst_71 {dimension_numbers = #tpu.dot_dimension_numbers<[1], [0], [0], [1], [0, 0, 1, 1], [], []>} : vector<8x256xf32>, vector<256x512xf32>, vector<8x512xf32> -> vector<8x512xf32>
    %296 = arith.addf %295, %7 : vector<8x512xf32>
    %297 = vector.extract_strided_slice %296 {offsets = [0, 0], sizes = [8, 128], strides = [1, 1]} : vector<8x512xf32> to vector<8x128xf32>
    %298 = arith.negf %297 : vector<8x128xf32>
    %299 = math.exp %298 : vector<8x128xf32>
    %cst_72 = arith.constant 1.000000e+00 : f32
    %300 = vector.broadcast %cst_72 : f32 to vector<8x128xf32>
    %301 = arith.addf %300, %299 : vector<8x128xf32>
    %302 = arith.divf %300, %301 : vector<8x128xf32>
    %303 = vector.extract_strided_slice %296 {offsets = [0, 128], sizes = [8, 128], strides = [1, 1]} : vector<8x512xf32> to vector<8x128xf32>
    %304 = arith.negf %303 : vector<8x128xf32>
    %305 = math.exp %304 : vector<8x128xf32>
    %cst_73 = arith.constant 1.000000e+00 : f32
    %306 = vector.broadcast %cst_73 : f32 to vector<8x128xf32>
    %307 = arith.addf %306, %305 : vector<8x128xf32>
    %308 = arith.divf %306, %307 : vector<8x128xf32>
    %309 = vector.extract_strided_slice %296 {offsets = [0, 256], sizes = [8, 128], strides = [1, 1]} : vector<8x512xf32> to vector<8x128xf32>
    %310 = math.tanh %309 : vector<8x128xf32>
    %311 = vector.extract_strided_slice %296 {offsets = [0, 384], sizes = [8, 128], strides = [1, 1]} : vector<8x512xf32> to vector<8x128xf32>
    %312 = arith.negf %311 : vector<8x128xf32>
    %313 = math.exp %312 : vector<8x128xf32>
    %cst_74 = arith.constant 1.000000e+00 : f32
    %314 = vector.broadcast %cst_74 : f32 to vector<8x128xf32>
    %315 = arith.addf %314, %313 : vector<8x128xf32>
    %316 = arith.divf %314, %315 : vector<8x128xf32>
    %317 = arith.mulf %308, %257 : vector<8x128xf32>
    %318 = arith.mulf %302, %310 : vector<8x128xf32>
    %319 = arith.addf %317, %318 : vector<8x128xf32>
    %320 = math.tanh %319 : vector<8x128xf32>
    %321 = arith.mulf %316, %320 : vector<8x128xf32>
    %322 = arith.index_cast %c4_i32 : i32 to index
    %c0_75 = arith.constant 0 : index
    %c0_76 = arith.constant 0 : index
    %323 = vector.load %arg8[%322, %c0_75, %c0_76] : memref<8x8x128xf32, #tpu.memory_space<vmem>>, vector<1x8x128xf32>
    %324 = vector.shape_cast %323 : vector<1x8x128xf32> to vector<8x128xf32>
    %325 = vector.shape_cast %321 : vector<8x128xf32> to vector<1x8x128xf32>
    tpu.vector_store %arg8[%322, %c0_75, %c0_76], %325 {strides = array<i32>} : memref<8x8x128xf32, #tpu.memory_space<vmem>>, vector<1x8x128xf32>,
    %c5_i32 = arith.constant 5 : i32
    %326 = arith.index_cast %c5_i32 : i32 to index
    %c0_77 = arith.constant 0 : index
    %c0_78 = arith.constant 0 : index
    %327 = vector.load %arg2[%326, %c0_77, %c0_78] : memref<8x8x512xf32, #tpu.memory_space<vmem>>, vector<1x8x512xf32>
    %328 = vector.shape_cast %327 : vector<1x8x512xf32> to vector<8x512xf32>
    %cst_79 = arith.constant dense<0.000000e+00> : vector<8x512xf32>
    %329 = tpu.matmul %293, %3, %cst_79 {dimension_numbers = #tpu.dot_dimension_numbers<[1], [0], [0], [1], [0, 0, 1, 1], [], []>} : vector<8x128xf32>, vector<128x512xf32>, vector<8x512xf32> -> vector<8x512xf32>
    %330 = arith.addf %328, %329 : vector<8x512xf32>
    %331 = vector.extract_strided_slice %330 {offsets = [0, 0], sizes = [8, 128], strides = [1, 1]} : vector<8x512xf32> to vector<8x128xf32>
    %332 = arith.negf %331 : vector<8x128xf32>
    %333 = math.exp %332 : vector<8x128xf32>
    %cst_80 = arith.constant 1.000000e+00 : f32
    %334 = vector.broadcast %cst_80 : f32 to vector<8x128xf32>
    %335 = arith.addf %334, %333 : vector<8x128xf32>
    %336 = arith.divf %334, %335 : vector<8x128xf32>
    %337 = vector.extract_strided_slice %330 {offsets = [0, 128], sizes = [8, 128], strides = [1, 1]} : vector<8x512xf32> to vector<8x128xf32>
    %338 = arith.negf %337 : vector<8x128xf32>
    %339 = math.exp %338 : vector<8x128xf32>
    %cst_81 = arith.constant 1.000000e+00 : f32
    %340 = vector.broadcast %cst_81 : f32 to vector<8x128xf32>
    %341 = arith.addf %340, %339 : vector<8x128xf32>
    %342 = arith.divf %340, %341 : vector<8x128xf32>
    %343 = vector.extract_strided_slice %330 {offsets = [0, 256], sizes = [8, 128], strides = [1, 1]} : vector<8x512xf32> to vector<8x128xf32>
    %344 = math.tanh %343 : vector<8x128xf32>
    %345 = vector.extract_strided_slice %330 {offsets = [0, 384], sizes = [8, 128], strides = [1, 1]} : vector<8x512xf32> to vector<8x128xf32>
    %346 = arith.negf %345 : vector<8x128xf32>
    %347 = math.exp %346 : vector<8x128xf32>
    %cst_82 = arith.constant 1.000000e+00 : f32
    %348 = vector.broadcast %cst_82 : f32 to vector<8x128xf32>
    %349 = arith.addf %348, %347 : vector<8x128xf32>
    %350 = arith.divf %348, %349 : vector<8x128xf32>
    %351 = arith.mulf %342, %291 : vector<8x128xf32>
    %352 = arith.mulf %336, %344 : vector<8x128xf32>
    %353 = arith.addf %351, %352 : vector<8x128xf32>
    %354 = math.tanh %353 : vector<8x128xf32>
    %355 = arith.mulf %350, %354 : vector<8x128xf32>
    %356 = tpu.concatenate %355, %321 in 1 : vector<8x128xf32>, vector<8x128xf32> -> vector<8x256xf32>
    %cst_83 = arith.constant dense<0.000000e+00> : vector<8x512xf32>
    %357 = tpu.matmul %356, %4, %cst_83 {dimension_numbers = #tpu.dot_dimension_numbers<[1], [0], [0], [1], [0, 0, 1, 1], [], []>} : vector<8x256xf32>, vector<256x512xf32>, vector<8x512xf32> -> vector<8x512xf32>
    %358 = arith.addf %357, %7 : vector<8x512xf32>
    %359 = vector.extract_strided_slice %358 {offsets = [0, 0], sizes = [8, 128], strides = [1, 1]} : vector<8x512xf32> to vector<8x128xf32>
    %360 = arith.negf %359 : vector<8x128xf32>
    %361 = math.exp %360 : vector<8x128xf32>
    %cst_84 = arith.constant 1.000000e+00 : f32
    %362 = vector.broadcast %cst_84 : f32 to vector<8x128xf32>
    %363 = arith.addf %362, %361 : vector<8x128xf32>
    %364 = arith.divf %362, %363 : vector<8x128xf32>
    %365 = vector.extract_strided_slice %358 {offsets = [0, 128], sizes = [8, 128], strides = [1, 1]} : vector<8x512xf32> to vector<8x128xf32>
    %366 = arith.negf %365 : vector<8x128xf32>
    %367 = math.exp %366 : vector<8x128xf32>
    %cst_85 = arith.constant 1.000000e+00 : f32
    %368 = vector.broadcast %cst_85 : f32 to vector<8x128xf32>
    %369 = arith.addf %368, %367 : vector<8x128xf32>
    %370 = arith.divf %368, %369 : vector<8x128xf32>
    %371 = vector.extract_strided_slice %358 {offsets = [0, 256], sizes = [8, 128], strides = [1, 1]} : vector<8x512xf32> to vector<8x128xf32>
    %372 = math.tanh %371 : vector<8x128xf32>
    %373 = vector.extract_strided_slice %358 {offsets = [0, 384], sizes = [8, 128], strides = [1, 1]} : vector<8x512xf32> to vector<8x128xf32>
    %374 = arith.negf %373 : vector<8x128xf32>
    %375 = math.exp %374 : vector<8x128xf32>
    %cst_86 = arith.constant 1.000000e+00 : f32
    %376 = vector.broadcast %cst_86 : f32 to vector<8x128xf32>
    %377 = arith.addf %376, %375 : vector<8x128xf32>
    %378 = arith.divf %376, %377 : vector<8x128xf32>
    %379 = arith.mulf %370, %319 : vector<8x128xf32>
    %380 = arith.mulf %364, %372 : vector<8x128xf32>
    %381 = arith.addf %379, %380 : vector<8x128xf32>
    %382 = math.tanh %381 : vector<8x128xf32>
    %383 = arith.mulf %378, %382 : vector<8x128xf32>
    %384 = arith.index_cast %c5_i32 : i32 to index
    %c0_87 = arith.constant 0 : index
    %c0_88 = arith.constant 0 : index
    %385 = vector.load %arg8[%384, %c0_87, %c0_88] : memref<8x8x128xf32, #tpu.memory_space<vmem>>, vector<1x8x128xf32>
    %386 = vector.shape_cast %385 : vector<1x8x128xf32> to vector<8x128xf32>
    %387 = vector.shape_cast %383 : vector<8x128xf32> to vector<1x8x128xf32>
    tpu.vector_store %arg8[%384, %c0_87, %c0_88], %387 {strides = array<i32>} : memref<8x8x128xf32, #tpu.memory_space<vmem>>, vector<1x8x128xf32>,
    %c6_i32 = arith.constant 6 : i32
    %388 = arith.index_cast %c6_i32 : i32 to index
    %c0_89 = arith.constant 0 : index
    %c0_90 = arith.constant 0 : index
    %389 = vector.load %arg2[%388, %c0_89, %c0_90] : memref<8x8x512xf32, #tpu.memory_space<vmem>>, vector<1x8x512xf32>
    %390 = vector.shape_cast %389 : vector<1x8x512xf32> to vector<8x512xf32>
    %cst_91 = arith.constant dense<0.000000e+00> : vector<8x512xf32>
    %391 = tpu.matmul %355, %3, %cst_91 {dimension_numbers = #tpu.dot_dimension_numbers<[1], [0], [0], [1], [0, 0, 1, 1], [], []>} : vector<8x128xf32>, vector<128x512xf32>, vector<8x512xf32> -> vector<8x512xf32>
    %392 = arith.addf %390, %391 : vector<8x512xf32>
    %393 = vector.extract_strided_slice %392 {offsets = [0, 0], sizes = [8, 128], strides = [1, 1]} : vector<8x512xf32> to vector<8x128xf32>
    %394 = arith.negf %393 : vector<8x128xf32>
    %395 = math.exp %394 : vector<8x128xf32>
    %cst_92 = arith.constant 1.000000e+00 : f32
    %396 = vector.broadcast %cst_92 : f32 to vector<8x128xf32>
    %397 = arith.addf %396, %395 : vector<8x128xf32>
    %398 = arith.divf %396, %397 : vector<8x128xf32>
    %399 = vector.extract_strided_slice %392 {offsets = [0, 128], sizes = [8, 128], strides = [1, 1]} : vector<8x512xf32> to vector<8x128xf32>
    %400 = arith.negf %399 : vector<8x128xf32>
    %401 = math.exp %400 : vector<8x128xf32>
    %cst_93 = arith.constant 1.000000e+00 : f32
    %402 = vector.broadcast %cst_93 : f32 to vector<8x128xf32>
    %403 = arith.addf %402, %401 : vector<8x128xf32>
    %404 = arith.divf %402, %403 : vector<8x128xf32>
    %405 = vector.extract_strided_slice %392 {offsets = [0, 256], sizes = [8, 128], strides = [1, 1]} : vector<8x512xf32> to vector<8x128xf32>
    %406 = math.tanh %405 : vector<8x128xf32>
    %407 = vector.extract_strided_slice %392 {offsets = [0, 384], sizes = [8, 128], strides = [1, 1]} : vector<8x512xf32> to vector<8x128xf32>
    %408 = arith.negf %407 : vector<8x128xf32>
    %409 = math.exp %408 : vector<8x128xf32>
    %cst_94 = arith.constant 1.000000e+00 : f32
    %410 = vector.broadcast %cst_94 : f32 to vector<8x128xf32>
    %411 = arith.addf %410, %409 : vector<8x128xf32>
    %412 = arith.divf %410, %411 : vector<8x128xf32>
    %413 = arith.mulf %404, %353 : vector<8x128xf32>
    %414 = arith.mulf %398, %406 : vector<8x128xf32>
    %415 = arith.addf %413, %414 : vector<8x128xf32>
    %416 = math.tanh %415 : vector<8x128xf32>
    %417 = arith.mulf %412, %416 : vector<8x128xf32>
    %418 = tpu.concatenate %417, %383 in 1 : vector<8x128xf32>, vector<8x128xf32> -> vector<8x256xf32>
    %cst_95 = arith.constant dense<0.000000e+00> : vector<8x512xf32>
    %419 = tpu.matmul %418, %4, %cst_95 {dimension_numbers = #tpu.dot_dimension_numbers<[1], [0], [0], [1], [0, 0, 1, 1], [], []>} : vector<8x256xf32>, vector<256x512xf32>, vector<8x512xf32> -> vector<8x512xf32>
    %420 = arith.addf %419, %7 : vector<8x512xf32>
    %421 = vector.extract_strided_slice %420 {offsets = [0, 0], sizes = [8, 128], strides = [1, 1]} : vector<8x512xf32> to vector<8x128xf32>
    %422 = arith.negf %421 : vector<8x128xf32>
    %423 = math.exp %422 : vector<8x128xf32>
    %cst_96 = arith.constant 1.000000e+00 : f32
    %424 = vector.broadcast %cst_96 : f32 to vector<8x128xf32>
    %425 = arith.addf %424, %423 : vector<8x128xf32>
    %426 = arith.divf %424, %425 : vector<8x128xf32>
    %427 = vector.extract_strided_slice %420 {offsets = [0, 128], sizes = [8, 128], strides = [1, 1]} : vector<8x512xf32> to vector<8x128xf32>
    %428 = arith.negf %427 : vector<8x128xf32>
    %429 = math.exp %428 : vector<8x128xf32>
    %cst_97 = arith.constant 1.000000e+00 : f32
    %430 = vector.broadcast %cst_97 : f32 to vector<8x128xf32>
    %431 = arith.addf %430, %429 : vector<8x128xf32>
    %432 = arith.divf %430, %431 : vector<8x128xf32>
    %433 = vector.extract_strided_slice %420 {offsets = [0, 256], sizes = [8, 128], strides = [1, 1]} : vector<8x512xf32> to vector<8x128xf32>
    %434 = math.tanh %433 : vector<8x128xf32>
    %435 = vector.extract_strided_slice %420 {offsets = [0, 384], sizes = [8, 128], strides = [1, 1]} : vector<8x512xf32> to vector<8x128xf32>
    %436 = arith.negf %435 : vector<8x128xf32>
    %437 = math.exp %436 : vector<8x128xf32>
    %cst_98 = arith.constant 1.000000e+00 : f32
    %438 = vector.broadcast %cst_98 : f32 to vector<8x128xf32>
    %439 = arith.addf %438, %437 : vector<8x128xf32>
    %440 = arith.divf %438, %439 : vector<8x128xf32>
    %441 = arith.mulf %432, %381 : vector<8x128xf32>
    %442 = arith.mulf %426, %434 : vector<8x128xf32>
    %443 = arith.addf %441, %442 : vector<8x128xf32>
    %444 = math.tanh %443 : vector<8x128xf32>
    %445 = arith.mulf %440, %444 : vector<8x128xf32>
    %446 = arith.index_cast %c6_i32 : i32 to index
    %c0_99 = arith.constant 0 : index
    %c0_100 = arith.constant 0 : index
    %447 = vector.load %arg8[%446, %c0_99, %c0_100] : memref<8x8x128xf32, #tpu.memory_space<vmem>>, vector<1x8x128xf32>
    %448 = vector.shape_cast %447 : vector<1x8x128xf32> to vector<8x128xf32>
    %449 = vector.shape_cast %445 : vector<8x128xf32> to vector<1x8x128xf32>
    tpu.vector_store %arg8[%446, %c0_99, %c0_100], %449 {strides = array<i32>} : memref<8x8x128xf32, #tpu.memory_space<vmem>>, vector<1x8x128xf32>,
    %c7_i32 = arith.constant 7 : i32
    %450 = arith.index_cast %c7_i32 : i32 to index
    %c0_101 = arith.constant 0 : index
    %c0_102 = arith.constant 0 : index
    %451 = vector.load %arg2[%450, %c0_101, %c0_102] : memref<8x8x512xf32, #tpu.memory_space<vmem>>, vector<1x8x512xf32>
    %452 = vector.shape_cast %451 : vector<1x8x512xf32> to vector<8x512xf32>
    %cst_103 = arith.constant dense<0.000000e+00> : vector<8x512xf32>
    %453 = tpu.matmul %417, %3, %cst_103 {dimension_numbers = #tpu.dot_dimension_numbers<[1], [0], [0], [1], [0, 0, 1, 1], [], []>} : vector<8x128xf32>, vector<128x512xf32>, vector<8x512xf32> -> vector<8x512xf32>
    %454 = arith.addf %452, %453 : vector<8x512xf32>
    %455 = vector.extract_strided_slice %454 {offsets = [0, 0], sizes = [8, 128], strides = [1, 1]} : vector<8x512xf32> to vector<8x128xf32>
    %456 = arith.negf %455 : vector<8x128xf32>
    %457 = math.exp %456 : vector<8x128xf32>
    %cst_104 = arith.constant 1.000000e+00 : f32
    %458 = vector.broadcast %cst_104 : f32 to vector<8x128xf32>
    %459 = arith.addf %458, %457 : vector<8x128xf32>
    %460 = arith.divf %458, %459 : vector<8x128xf32>
    %461 = vector.extract_strided_slice %454 {offsets = [0, 128], sizes = [8, 128], strides = [1, 1]} : vector<8x512xf32> to vector<8x128xf32>
    %462 = arith.negf %461 : vector<8x128xf32>
    %463 = math.exp %462 : vector<8x128xf32>
    %cst_105 = arith.constant 1.000000e+00 : f32
    %464 = vector.broadcast %cst_105 : f32 to vector<8x128xf32>
    %465 = arith.addf %464, %463 : vector<8x128xf32>
    %466 = arith.divf %464, %465 : vector<8x128xf32>
    %467 = vector.extract_strided_slice %454 {offsets = [0, 256], sizes = [8, 128], strides = [1, 1]} : vector<8x512xf32> to vector<8x128xf32>
    %468 = math.tanh %467 : vector<8x128xf32>
    %469 = vector.extract_strided_slice %454 {offsets = [0, 384], sizes = [8, 128], strides = [1, 1]} : vector<8x512xf32> to vector<8x128xf32>
    %470 = arith.negf %469 : vector<8x128xf32>
    %471 = math.exp %470 : vector<8x128xf32>
    %cst_106 = arith.constant 1.000000e+00 : f32
    %472 = vector.broadcast %cst_106 : f32 to vector<8x128xf32>
    %473 = arith.addf %472, %471 : vector<8x128xf32>
    %474 = arith.divf %472, %473 : vector<8x128xf32>
    %475 = arith.mulf %466, %415 : vector<8x128xf32>
    %476 = arith.mulf %460, %468 : vector<8x128xf32>
    %477 = arith.addf %475, %476 : vector<8x128xf32>
    %478 = math.tanh %477 : vector<8x128xf32>
    %479 = arith.mulf %474, %478 : vector<8x128xf32>
    %480 = tpu.concatenate %479, %445 in 1 : vector<8x128xf32>, vector<8x128xf32> -> vector<8x256xf32>
    %cst_107 = arith.constant dense<0.000000e+00> : vector<8x512xf32>
    %481 = tpu.matmul %480, %4, %cst_107 {dimension_numbers = #tpu.dot_dimension_numbers<[1], [0], [0], [1], [0, 0, 1, 1], [], []>} : vector<8x256xf32>, vector<256x512xf32>, vector<8x512xf32> -> vector<8x512xf32>
    %482 = arith.addf %481, %7 : vector<8x512xf32>
    %483 = vector.extract_strided_slice %482 {offsets = [0, 0], sizes = [8, 128], strides = [1, 1]} : vector<8x512xf32> to vector<8x128xf32>
    %484 = arith.negf %483 : vector<8x128xf32>
    %485 = math.exp %484 : vector<8x128xf32>
    %cst_108 = arith.constant 1.000000e+00 : f32
    %486 = vector.broadcast %cst_108 : f32 to vector<8x128xf32>
    %487 = arith.addf %486, %485 : vector<8x128xf32>
    %488 = arith.divf %486, %487 : vector<8x128xf32>
    %489 = vector.extract_strided_slice %482 {offsets = [0, 128], sizes = [8, 128], strides = [1, 1]} : vector<8x512xf32> to vector<8x128xf32>
    %490 = arith.negf %489 : vector<8x128xf32>
    %491 = math.exp %490 : vector<8x128xf32>
    %cst_109 = arith.constant 1.000000e+00 : f32
    %492 = vector.broadcast %cst_109 : f32 to vector<8x128xf32>
    %493 = arith.addf %492, %491 : vector<8x128xf32>
    %494 = arith.divf %492, %493 : vector<8x128xf32>
    %495 = vector.extract_strided_slice %482 {offsets = [0, 256], sizes = [8, 128], strides = [1, 1]} : vector<8x512xf32> to vector<8x128xf32>
    %496 = math.tanh %495 : vector<8x128xf32>
    %497 = vector.extract_strided_slice %482 {offsets = [0, 384], sizes = [8, 128], strides = [1, 1]} : vector<8x512xf32> to vector<8x128xf32>
    %498 = arith.negf %497 : vector<8x128xf32>
    %499 = math.exp %498 : vector<8x128xf32>
    %cst_110 = arith.constant 1.000000e+00 : f32
    %500 = vector.broadcast %cst_110 : f32 to vector<8x128xf32>
    %501 = arith.addf %500, %499 : vector<8x128xf32>
    %502 = arith.divf %500, %501 : vector<8x128xf32>
    %503 = arith.mulf %494, %443 : vector<8x128xf32>
    %504 = arith.mulf %488, %496 : vector<8x128xf32>
    %505 = arith.addf %503, %504 : vector<8x128xf32>
    %506 = math.tanh %505 : vector<8x128xf32>
    %507 = arith.mulf %502, %506 : vector<8x128xf32>
    %508 = arith.index_cast %c7_i32 : i32 to index
    %c0_111 = arith.constant 0 : index
    %c0_112 = arith.constant 0 : index
    %509 = vector.load %arg8[%508, %c0_111, %c0_112] : memref<8x8x128xf32, #tpu.memory_space<vmem>>, vector<1x8x128xf32>
    %510 = vector.shape_cast %509 : vector<1x8x128xf32> to vector<8x128xf32>
    %511 = vector.shape_cast %507 : vector<8x128xf32> to vector<1x8x128xf32>
    tpu.vector_store %arg8[%508, %c0_111, %c0_112], %511 {strides = array<i32>} : memref<8x8x128xf32, #tpu.memory_space<vmem>>, vector<1x8x128xf32>,
    %c8_i32 = arith.constant 8 : i32
    %c0_113 = arith.constant 0 : index
    %c0_114 = arith.constant 0 : index
    %c0_115 = arith.constant 0 : index
    %512 = vector.load %arg11[%c0_113, %c0_114, %c0_115] : memref<2x8x128xf32, #tpu.memory_space<vmem>>, vector<1x8x128xf32>
    %513 = vector.shape_cast %512 : vector<1x8x128xf32> to vector<8x128xf32>
    %514 = vector.shape_cast %479 : vector<8x128xf32> to vector<1x8x128xf32>
    tpu.vector_store %arg11[%c0_113, %c0_114, %c0_115], %514 {strides = array<i32>} : memref<2x8x128xf32, #tpu.memory_space<vmem>>, vector<1x8x128xf32>,
    %c0_116 = arith.constant 0 : index
    %c0_117 = arith.constant 0 : index
    %c0_118 = arith.constant 0 : index
    %515 = vector.load %arg12[%c0_116, %c0_117, %c0_118] : memref<2x8x128xf32, #tpu.memory_space<vmem>>, vector<1x8x128xf32>
    %516 = vector.shape_cast %515 : vector<1x8x128xf32> to vector<8x128xf32>
    %517 = vector.shape_cast %477 : vector<8x128xf32> to vector<1x8x128xf32>
    tpu.vector_store %arg12[%c0_116, %c0_117, %c0_118], %517 {strides = array<i32>} : memref<2x8x128xf32, #tpu.memory_space<vmem>>, vector<1x8x128xf32>,
    %c1_119 = arith.constant 1 : index
    %c0_120 = arith.constant 0 : index
    %c0_121 = arith.constant 0 : index
    %518 = vector.load %arg11[%c1_119, %c0_120, %c0_121] : memref<2x8x128xf32, #tpu.memory_space<vmem>>, vector<1x8x128xf32>
    %519 = vector.shape_cast %518 : vector<1x8x128xf32> to vector<8x128xf32>
    %520 = vector.shape_cast %507 : vector<8x128xf32> to vector<1x8x128xf32>
    tpu.vector_store %arg11[%c1_119, %c0_120, %c0_121], %520 {strides = array<i32>} : memref<2x8x128xf32, #tpu.memory_space<vmem>>, vector<1x8x128xf32>,
    %c1_122 = arith.constant 1 : index
    %c0_123 = arith.constant 0 : index
    %c0_124 = arith.constant 0 : index
    %521 = vector.load %arg12[%c1_122, %c0_123, %c0_124] : memref<2x8x128xf32, #tpu.memory_space<vmem>>, vector<1x8x128xf32>
    %522 = vector.shape_cast %521 : vector<1x8x128xf32> to vector<8x128xf32>
    %523 = vector.shape_cast %505 : vector<8x128xf32> to vector<1x8x128xf32>
    tpu.vector_store %arg12[%c1_122, %c0_123, %c0_124], %523 {strides = array<i32>} : memref<2x8x128xf32, #tpu.memory_space<vmem>>, vector<1x8x128xf32>,
    %c0_i32_125 = arith.constant 0 : i32
    %524 = arith.cmpi eq, %arg1, %c0_i32_125 : i32
    %525 = arith.extui %524 : i1 to i32
    %c0_i32_126 = arith.constant 0 : i32
    %526 = arith.cmpi ne, %525, %c0_i32_126 : i32
    scf.if %526 {
      %c0_127 = arith.constant 0 : index
      %c0_128 = arith.constant 0 : index
      %c0_129 = arith.constant 0 : index
      %527 = vector.load %arg11[%c0_127, %c0_128, %c0_129] : memref<2x8x128xf32, #tpu.memory_space<vmem>>, vector<2x8x128xf32>
      %c0_130 = arith.constant 0 : index
      %c0_131 = arith.constant 0 : index
      %c0_132 = arith.constant 0 : index
      %528 = vector.load %arg9[%c0_130, %c0_131, %c0_132] : memref<2x8x128xf32, #tpu.memory_space<vmem>>, vector<2x8x128xf32>
      tpu.vector_store %arg9[%c0_130, %c0_131, %c0_132], %527 {strides = array<i32>} : memref<2x8x128xf32, #tpu.memory_space<vmem>>, vector<2x8x128xf32>,
      %c0_133 = arith.constant 0 : index
      %c0_134 = arith.constant 0 : index
      %c0_135 = arith.constant 0 : index
      %529 = vector.load %arg12[%c0_133, %c0_134, %c0_135] : memref<2x8x128xf32, #tpu.memory_space<vmem>>, vector<2x8x128xf32>
      %c0_136 = arith.constant 0 : index
      %c0_137 = arith.constant 0 : index
      %c0_138 = arith.constant 0 : index
      %530 = vector.load %arg10[%c0_136, %c0_137, %c0_138] : memref<2x8x128xf32, #tpu.memory_space<vmem>>, vector<2x8x128xf32>
      tpu.vector_store %arg10[%c0_136, %c0_137, %c0_138], %529 {strides = array<i32>} : memref<2x8x128xf32, #tpu.memory_space<vmem>>, vector<2x8x128xf32>,
    } else {
    }
    return
  }
  func.func @transform_0(%arg0: i32, %arg1: i32) -> (i32, i32, i32) {
    %c0_i32 = arith.constant 0 : i32
    %c0_i32_0 = arith.constant 0 : i32
    return %arg1, %arg0, %c0_i32 : i32, i32, i32
  }
  func.func @transform_1(%arg0: i32, %arg1: i32) -> (i32, i32, i32) {
    %c0_i32 = arith.constant 0 : i32
    %c0_i32_0 = arith.constant 0 : i32
    %c0_i32_1 = arith.constant 0 : i32
    return %c0_i32, %arg0, %c0_i32_0 : i32, i32, i32
  }
  func.func @transform_2(%arg0: i32, %arg1: i32) -> (i32, i32, i32) {
    %c0_i32 = arith.constant 0 : i32
    %c0_i32_0 = arith.constant 0 : i32
    %c0_i32_1 = arith.constant 0 : i32
    return %c0_i32, %arg0, %c0_i32_0 : i32, i32, i32
  }
  func.func @transform_3(%arg0: i32, %arg1: i32) -> (i32, i32) {
    %c0_i32 = arith.constant 0 : i32
    %c0_i32_0 = arith.constant 0 : i32
    %c0_i32_1 = arith.constant 0 : i32
    return %c0_i32, %c0_i32_0 : i32, i32
  }
  func.func @transform_4(%arg0: i32, %arg1: i32) -> (i32, i32) {
    %c0_i32 = arith.constant 0 : i32
    %c0_i32_0 = arith.constant 0 : i32
    %c0_i32_1 = arith.constant 0 : i32
    return %c0_i32, %c0_i32_0 : i32, i32
  }
  func.func @transform_5(%arg0: i32, %arg1: i32) -> (i32, i32) {
    %c0_i32 = arith.constant 0 : i32
    %c0_i32_0 = arith.constant 0 : i32
    %c0_i32_1 = arith.constant 0 : i32
    return %c0_i32, %c0_i32_0 : i32, i32
  }
  func.func @transform_6(%arg0: i32, %arg1: i32) -> (i32, i32, i32) {
    %c0_i32 = arith.constant 0 : i32
    %c0_i32_0 = arith.constant 0 : i32
    return %arg1, %arg0, %c0_i32 : i32, i32, i32
  }
  func.func @transform_7(%arg0: i32, %arg1: i32) -> (i32, i32, i32) {
    %c0_i32 = arith.constant 0 : i32
    %c0_i32_0 = arith.constant 0 : i32
    %c0_i32_1 = arith.constant 0 : i32
    return %c0_i32, %arg0, %c0_i32_0 : i32, i32, i32
  }
  func.func @transform_8(%arg0: i32, %arg1: i32) -> (i32, i32, i32) {
    %c0_i32 = arith.constant 0 : i32
    %c0_i32_0 = arith.constant 0 : i32
    %c0_i32_1 = arith.constant 0 : i32
    return %c0_i32, %arg0, %c0_i32_0 : i32, i32, i32
  }
}

module attributes {stable_mosaic.version = 11 : i64} {
  func.func @_linear_kernel(%arg0: i32, %arg1: i32, %arg2: memref<64x128xf32, #tpu.memory_space<vmem>>, %arg3: memref<128x128xf32, #tpu.memory_space<vmem>>, %arg4: memref<1x128xf32, #tpu.memory_space<vmem>>, %arg5: memref<64x128xf32, #tpu.memory_space<vmem>>) attributes {dimension_semantics = [#tpu.dimension_semantics<parallel>, #tpu.dimension_semantics<parallel>], iteration_bounds = array<i64: 1, 1>, scalar_prefetch = 0 : i64, scratch_operands = 0 : i64, tpu.core_type = #tpu.core_type<tc>, window_params = [{transform_indices = @transform_0, window_bounds = array<i64: 64, 128>}, {transform_indices = @transform_1, window_bounds = array<i64: 128, 128>}, {transform_indices = @transform_2, window_bounds = array<i64: 1, 128>}, {transform_indices = @transform_3, window_bounds = array<i64: 64, 128>}]} {
    %c0 = arith.constant 0 : index
    %c0_0 = arith.constant 0 : index
    %0 = vector.load %arg2[%c0, %c0_0] : memref<64x128xf32, #tpu.memory_space<vmem>>, vector<64x128xf32>
    %c0_1 = arith.constant 0 : index
    %c0_2 = arith.constant 0 : index
    %1 = vector.load %arg3[%c0_1, %c0_2] : memref<128x128xf32, #tpu.memory_space<vmem>>, vector<128x128xf32>
    %cst = arith.constant dense<0.000000e+00> : vector<64x128xf32>
    %2 = tpu.matmul %0, %1, %cst {dimension_numbers = #tpu.dot_dimension_numbers<[1], [0], [0], [1], [0, 0, 1, 1], [], []>} : vector<64x128xf32>, vector<128x128xf32>, vector<64x128xf32> -> vector<64x128xf32>
    %c0_3 = arith.constant 0 : index
    %c0_4 = arith.constant 0 : index
    %3 = vector.load %arg4[%c0_3, %c0_4] : memref<1x128xf32, #tpu.memory_space<vmem>>, vector<1x128xf32>
    %4 = vector.broadcast %3 : vector<1x128xf32> to vector<64x128xf32>
    %5 = arith.addf %2, %4 : vector<64x128xf32>
    %c0_5 = arith.constant 0 : index
    %c0_6 = arith.constant 0 : index
    %6 = vector.load %arg5[%c0_5, %c0_6] : memref<64x128xf32, #tpu.memory_space<vmem>>, vector<64x128xf32>
    tpu.vector_store %arg5[%c0_5, %c0_6], %5 {strides = array<i32>} : memref<64x128xf32, #tpu.memory_space<vmem>>, vector<64x128xf32>,
    return
  }
  func.func @transform_0(%arg0: i32, %arg1: i32) -> (i32, i32) {
    %c0_i32 = arith.constant 0 : i32
    %c0_i32_0 = arith.constant 0 : i32
    return %arg1, %c0_i32 : i32, i32
  }
  func.func @transform_1(%arg0: i32, %arg1: i32) -> (i32, i32) {
    %c0_i32 = arith.constant 0 : i32
    %c0_i32_0 = arith.constant 0 : i32
    return %c0_i32, %arg0 : i32, i32
  }
  func.func @transform_2(%arg0: i32, %arg1: i32) -> (i32, i32) {
    %c0_i32 = arith.constant 0 : i32
    %c0_i32_0 = arith.constant 0 : i32
    return %c0_i32, %arg0 : i32, i32
  }
  func.func @transform_3(%arg0: i32, %arg1: i32) -> (i32, i32) {
    %c0_i32 = arith.constant 0 : i32
    return %arg1, %arg0 : i32, i32
  }
}

</mosaic_0001>

<bundles_post_ra>
// kernel: poetry_forward.5
= control target key start
LH: loop header
LB: loop body
LE: loop exit
PB: predicated region body
PF: predicated region fallthrough
CT: control target
= control target key end

     0   :  { %s398_s1 = inlined_call_operand.vmem [shape: f32[128,128], index: 1, kind: input, shape index: {}]   ;;  %s399_s0 = inlined_call_operand.vmem [shape: f32[64,128], index: 0, kind: input, shape index: {}]   ;;  %s400_s2 = inlined_call_operand.vmem [shape: f32[1,128], index: 2, kind: input, shape index: {}]   ;;  %s401_s3 = inlined_call_operand.vmem [shape: f32[64,128], index: 3, kind: output, shape index: {}]  }
   0x1   :  { %v22_v0 = vld [vmem:[%s398_s1] sm:$0xff]  ;;  %v23_v1 = vld [vmem:[%s398_s1 + $0x8] sm:$0xff]  ;;  %v24_v2 = vld [vmem:[%s398_s1 + $0x10] sm:$0xff] }
   0x2   :  { %v231_v3 = vpack.c.bf16 %v23_v1, %v22_v0  ;;  %v25_v4 = vld [vmem:[%s398_s1 + $0x18] sm:$0xff]  ;;  %v26_v6 = vld [vmem:[%s398_s1 + $0x20] sm:$0xff]  ;;  %v27_v7 = vld [vmem:[%s398_s1 + $0x28] sm:$0xff] }
   0x3   :  { %v235_v5 = vpack.c.bf16 %v25_v4, %v24_v2  ;;  %v239_v8 = vpack.c.bf16 %v27_v7, %v26_v6  ;;  %v14_v9 = vld [vmem:[%s399_s0] sm:$0xff]  ;;  %v28_v11 = vld [vmem:[%s398_s1 + $0x30] sm:$0xff]  ;;  %v29_v12 = vld [vmem:[%s398_s1 + $0x38] sm:$0xff] }
   0x4   :  { %232 = vmatprep.subr.bf16.mxu0 %v231_v3  ;;  %263 = vmatprep.subr.bf16.mxu1 %v231_v3  ;;  %v18_v10 = vld [vmem:[%s399_s0 + $0x20] sm:$0xff]  ;;  %v243_v13 = vpack.c.bf16 %v29_v12, %v28_v11  ;;  %v31_v15 = vld [vmem:[%s398_s1 + $0x48] sm:$0xff]  ;;  %v32_v17 = vld [vmem:[%s398_s1 + $0x50] sm:$0xff] }
   0x5   :  { %234 = vmatpush3.bf16.msra.mxu0 %v231_v3  ;;  %271 = vmatpush3.bf16.msra.mxu1 %v231_v3  ;;  %v30_v14 = vld [vmem:[%s398_s1 + $0x40] sm:$0xff]  ;;  %v33_v18 = vld [vmem:[%s398_s1 + $0x58] sm:$0xff]  ;;  %v35_v21 = vld [vmem:[%s398_s1 + $0x68] sm:$0xff] }
   0x6   :  { %236 = vmatprep.subr.bf16.mxu0 %v235_v5  ;;  %264 = vmatprep.subr.bf16.mxu1 %v235_v5  ;;  %v247_v16 = vpack.c.bf16 %v31_v15, %v30_v14  ;;  %v251_v19 = vpack.c.bf16 %v33_v18, %v32_v17  ;;  %v34_v20 = vld [vmem:[%s398_s1 + $0x60] sm:$0xff]  ;;  %v36_v23 = vld [vmem:[%s398_s1 + $0x70] sm:$0xff]  ;;  %v37_v24 = vld [vmem:[%s398_s1 + $0x78] sm:$0xff] }
   0x7   :  { %219 = vmatprep.mubr.f32.mxu0 %v14_v9  ;;  %225 = vmatprep.mubr.f32.mxu1 %v18_v10  ;;  %v255_v22 = vpack.c.bf16 %v35_v21, %v34_v20  ;;  %v259_v25 = vpack.c.bf16 %v37_v24, %v36_v23  ;;  %v15_v26 = vld [vmem:[%s399_s0 + $0x8] sm:$0xff]  ;;  %v16_v28 = vld [vmem:[%s399_s0 + $0x10] sm:$0xff]  ;;  %v17_v30 = vld [vmem:[%s399_s0 + $0x18] sm:$0xff] }
   0x8   :  { %v19_v27 = vld [vmem:[%s399_s0 + $0x28] sm:$0xff]  ;;  %v20_v29 = vld [vmem:[%s399_s0 + $0x30] sm:$0xff]  ;;  %v21_v31 = vld [vmem:[%s399_s0 + $0x38] sm:$0xff] }
   0x9   :  { %238 = vmatpush3.bf16.msra.mxu0 %v235_v5  ;;  %272 = vmatpush3.bf16.msra.mxu1 %v235_v5  ;;  %v162_v32 = vld [vmem:[%s400_s2] ss:$0 sm:$0xff] }
   0xa   :  { %240 = vmatprep.subr.bf16.mxu0 %v239_v8  ;;  %265 = vmatprep.subr.bf16.mxu1 %v239_v8 }
   0xd   :  { %242 = vmatpush3.bf16.msra.mxu0 %v239_v8  ;;  %273 = vmatpush3.bf16.msra.mxu1 %v239_v8 }
   0xe   :  { %244 = vmatprep.subr.bf16.mxu0 %v243_v13  ;;  %266 = vmatprep.subr.bf16.mxu1 %v243_v13 }
  0x11   :  { %246 = vmatpush3.bf16.msra.mxu0 %v243_v13  ;;  %274 = vmatpush3.bf16.msra.mxu1 %v243_v13 }
  0x12   :  { %248 = vmatprep.subr.bf16.mxu0 %v247_v16  ;;  %267 = vmatprep.subr.bf16.mxu1 %v247_v16 }
  0x15   :  { %250 = vmatpush3.bf16.msra.mxu0 %v247_v16  ;;  %275 = vmatpush3.bf16.msra.mxu1 %v247_v16 }
  0x16   :  { %252 = vmatprep.subr.bf16.mxu0 %v251_v19  ;;  %268 = vmatprep.subr.bf16.mxu1 %v251_v19 }
  0x19   :  { %254 = vmatpush3.bf16.msra.mxu0 %v251_v19  ;;  %276 = vmatpush3.bf16.msra.mxu1 %v251_v19 }
  0x1a   :  { %256 = vmatprep.subr.bf16.mxu0 %v255_v22  ;;  %269 = vmatprep.subr.bf16.mxu1 %v255_v22 }
  0x1d   :  { %258 = vmatpush3.bf16.msra.mxu0 %v255_v22  ;;  %277 = vmatpush3.bf16.msra.mxu1 %v255_v22 }
  0x1e   :  { %260 = vmatprep.subr.bf16.mxu0 %v259_v25  ;;  %270 = vmatprep.subr.bf16.mxu1 %v259_v25 }
  0x21   :  { %262 = vmatpush3.bf16.msra.mxu0 %v259_v25  ;;  %278 = vmatpush3.bf16.msra.mxu1 %v259_v25 }
  0x24   :  { %220 = vmatmul.mubr.f32.vlgmr.msra.gmra.mrb[0].mxu0 %v15_v26  ;;  %226 = vmatmul.mubr.f32.vlgmr.msra.gmra.mrb[0].mxu1 %v19_v27 }
  0x25   :  { %222 = vmatprep.mubr.f32.mxu0 %v16_v28  ;;  %228 = vmatprep.mubr.f32.mxu1 %v20_v29 }
  0x28   :  { %223 = vmatmul.mubr.f32.gmra.mrb[2].mxu0 %v17_v30  ;;  %229 = vmatmul.mubr.f32.gmra.mrb[2].mxu1 %v21_v31 }
  0xf7   :  { %v221_v33 = vpop.f32.mrb[0].mxu0  ;;  %v227_v34 = vpop.f32.mrb[0].mxu1 }
  0xf8   :  { %v117_v35 = vadd.f32 %v221_v33, %v162_v32  ;;  %v137_v36 = vadd.f32 %v227_v34, %v162_v32  ;;  %v111_v37 = vpop.f32.mrb[1].mxu0  ;;  %v131_v38 = vpop.f32.mrb[1].mxu1 }
  0xf9   :  { %v112_v39 = vadd.f32 %v162_v32, %v111_v37  ;;  %v132_v40 = vadd.f32 %v162_v32, %v131_v38 }
  0xfa   :  { %151 = vst [vmem:[%s401_s3 + $0x8] sm:$0xff] %v117_v35  ;;  %155 = vst [vmem:[%s401_s3 + $0x28] sm:$0xff] %v137_v36 }
  0xfb   :  { %150 = vst [vmem:[%s401_s3] sm:$0xff] %v112_v39  ;;  %154 = vst [vmem:[%s401_s3 + $0x20] sm:$0xff] %v132_v40  ;;  %v224_v41 = vpop.f32.mrb[2].mxu0  ;;  %v230_v42 = vpop.f32.mrb[2].mxu1 }
  0xfc   :  { %v127_v43 = vadd.f32 %v224_v41, %v162_v32  ;;  %v147_v44 = vadd.f32 %v230_v42, %v162_v32  ;;  %v121_v45 = vpop.f32.mrb[3].mxu0  ;;  %v141_v46 = vpop.f32.mrb[3].mxu1 }
  0xfd   :  { %v122_v47 = vadd.f32 %v162_v32, %v121_v45  ;;  %v142_v48 = vadd.f32 %v162_v32, %v141_v46 }
  0xfe   :  { %153 = vst [vmem:[%s401_s3 + $0x18] sm:$0xff] %v127_v43  ;;  %157 = vst [vmem:[%s401_s3 + $0x38] sm:$0xff] %v147_v44 }
  0xff   :  { %152 = vst [vmem:[%s401_s3 + $0x10] sm:$0xff] %v122_v47  ;;  %156 = vst [vmem:[%s401_s3 + $0x30] sm:$0xff] %v142_v48 }

// kernel: poetry_forward.3
= control target key start
LH: loop header
LB: loop body
LE: loop exit
PB: predicated region body
PF: predicated region fallthrough
CT: control target
= control target key end

     0   :  { %v435_v3 = vmov 0.0   ;;  %s827_s1 = inlined_call_operand.vmem [shape: f32[128,512], index: 1, kind: input, shape index: {}]   ;;  %s828_s0 = inlined_call_operand.vmem [shape: f32[64,128], index: 0, kind: input, shape index: {}]   ;;  %s829_s2 = inlined_call_operand.vmem [shape: f32[1,512], index: 2, kind: input, shape index: {}]   ;;  %s830_s3 = inlined_call_operand.vmem [shape: f32[64,512], index: 3, kind: output, shape index: {}]  }
   0x1   :  { %v23_v0 = vld [vmem:[%s827_s1 + $0x8] sm:$0xff]  ;;  %v25_v2 = vld [vmem:[%s827_s1 + $0x18] sm:$0xff]  ;;  %172 = vmatprep.mubr.f32.mxu0 %v435_v3  ;;  %285 = vmatprep.mubr.f32.mxu1 %v435_v3  ;;  %v22_v6 = vld [vmem:[%s827_s1] sm:$0xff] }
   0x2   :  { %v27_v1 = vld [vmem:[%s827_s1 + $0x28] sm:$0xff]  ;;  %v29_v5 = vld [vmem:[%s827_s1 + $0x38] sm:$0xff]  ;;  %v26_v7 = vld [vmem:[%s827_s1 + $0x20] sm:$0xff] }
   0x3   :  { %v370_v4 = vpack.c.bf16 %v27_v1, %v23_v0  ;;  %v402_v8 = vpack.c.bf16 %v29_v5, %v25_v2  ;;  %v372_v9 = vpack.c.bf16 %v26_v7, %v22_v6  ;;  %v24_v10 = vld [vmem:[%s827_s1 + $0x10] sm:$0xff]  ;;  %v31_v12 = vld [vmem:[%s827_s1 + $0x48] sm:$0xff]  ;;  %v33_v15 = vld [vmem:[%s827_s1 + $0x58] sm:$0xff] }
   0x4   :  { %v28_v11 = vld [vmem:[%s827_s1 + $0x30] sm:$0xff]  ;;  %v35_v14 = vld [vmem:[%s827_s1 + $0x68] sm:$0xff]  ;;  %v37_v16 = vld [vmem:[%s827_s1 + $0x78] sm:$0xff] }
   0x5   :  { %371 = vmatprep.subr.bf16.mxu0 %v370_v4  ;;  %v404_v13 = vpack.c.bf16 %v28_v11, %v24_v10  ;;  %403 = vmatprep.subr.bf16.mxu1 %v402_v8  ;;  %v374_v17 = vpack.c.bf16 %v35_v14, %v31_v12  ;;  %v406_v18 = vpack.c.bf16 %v37_v16, %v33_v15  ;;  %v30_v19 = vld [vmem:[%s827_s1 + $0x40] sm:$0xff]  ;;  %v32_v21 = vld [vmem:[%s827_s1 + $0x50] sm:$0xff]  ;;  %v39_v24 = vld [vmem:[%s827_s1 + $0x88] sm:$0xff] }
   0x6   :  { %373 = vmatpush1.bf16.msra.mxu0 %v372_v9  ;;  %v34_v20 = vld [vmem:[%s827_s1 + $0x60] sm:$0xff]  ;;  %v36_v23 = vld [vmem:[%s827_s1 + $0x70] sm:$0xff]  ;;  %v43_v25 = vld [vmem:[%s827_s1 + $0xa8] sm:$0xff] }
   0x7   :  { %405 = vmatpush1.bf16.msra.mxu1 %v404_v13  ;;  %v376_v22 = vpack.c.bf16 %v34_v20, %v30_v19  ;;  %375 = vmatprep.subr.bf16.mxu0 %v374_v17  ;;  %v408_v26 = vpack.c.bf16 %v36_v23, %v32_v21  ;;  %v378_v27 = vpack.c.bf16 %v43_v25, %v39_v24  ;;  %v41_v28 = vld [vmem:[%s827_s1 + $0x98] sm:$0xff]  ;;  %v38_v30 = vld [vmem:[%s827_s1 + $0x80] sm:$0xff]  ;;  %v40_v33 = vld [vmem:[%s827_s1 + $0x90] sm:$0xff] }
   0x8   :  { %407 = vmatprep.subr.bf16.mxu1 %v406_v18  ;;  %v45_v29 = vld [vmem:[%s827_s1 + $0xb8] sm:$0xff]  ;;  %v42_v32 = vld [vmem:[%s827_s1 + $0xa0] sm:$0xff]  ;;  %v44_v34 = vld [vmem:[%s827_s1 + $0xb0] sm:$0xff] }
   0x9   :  { %v410_v31 = vpack.c.bf16 %v45_v29, %v41_v28  ;;  %v380_v35 = vpack.c.bf16 %v42_v32, %v38_v30  ;;  %v47_v36 = vld [vmem:[%s827_s1 + $0xc8] sm:$0xff]  ;;  %v49_v38 = vld [vmem:[%s827_s1 + $0xd8] sm:$0xff]  ;;  %v412_v39 = vpack.c.bf16 %v44_v34, %v40_v33  ;;  %v46_v42 = vld [vmem:[%s827_s1 + $0xc0] sm:$0xff] }
   0xa   :  { %377 = vmatpush1.bf16.msra.mxu0 %v376_v22  ;;  %v51_v37 = vld [vmem:[%s827_s1 + $0xe8] sm:$0xff]  ;;  %v53_v41 = vld [vmem:[%s827_s1 + $0xf8] sm:$0xff]  ;;  %v50_v43 = vld [vmem:[%s827_s1 + $0xe0] sm:$0xff] }
   0xb   :  { %409 = vmatpush1.bf16.msra.mxu1 %v408_v26  ;;  %379 = vmatprep.subr.bf16.mxu0 %v378_v27  ;;  %v382_v40 = vpack.c.bf16 %v51_v37, %v47_v36  ;;  %v414_v44 = vpack.c.bf16 %v53_v41, %v49_v38  ;;  %v48_v45 = vld [vmem:[%s827_s1 + $0xd0] sm:$0xff]  ;;  %v55_v47 = vld [vmem:[%s827_s1 + $0x108] sm:$0xff]  ;;  %v57_v49 = vld [vmem:[%s827_s1 + $0x118] sm:$0xff]  ;;  %v384_v51 = vpack.c.bf16 %v50_v43, %v46_v42  ;;  %v88_v42 = vlaneseq }
   0xc   :  { %411 = vmatprep.subr.bf16.mxu1 %v410_v31  ;;  %v52_v46 = vld [vmem:[%s827_s1 + $0xf0] sm:$0xff]  ;;  %v59_v48 = vld [vmem:[%s827_s1 + $0x128] sm:$0xff]  ;;  %v61_v50 = vld [vmem:[%s827_s1 + $0x138] sm:$0xff] }
   0xd   :  { %v416_v52 = vpack.c.bf16 %v52_v46, %v48_v45  ;;  %v386_v53 = vpack.c.bf16 %v59_v48, %v55_v47  ;;  %v54_v54 = vld [vmem:[%s827_s1 + $0x100] sm:$0xff]  ;;  %v56_v56 = vld [vmem:[%s827_s1 + $0x110] sm:$0xff]  ;;  %v418_v57 = vpack.c.bf16 %v61_v50, %v57_v49  ;;  %v63_v59 = vld [vmem:[%s827_s1 + $0x148] sm:$0xff]  ;;  %v89_v43 = vshrl.u32 %v88_v42, 7 }
   0xe   :  { %381 = vmatpush1.bf16.msra.mxu0 %v380_v35  ;;  %v58_v55 = vld [vmem:[%s827_s1 + $0x120] sm:$0xff]  ;;  %v60_v58 = vld [vmem:[%s827_s1 + $0x130] sm:$0xff]  ;;  %v67_v60 = vld [vmem:[%s827_s1 + $0x168] sm:$0xff] }
   0xf   :  { %413 = vmatpush1.bf16.msra.mxu1 %v412_v39  ;;  %383 = vmatprep.subr.bf16.mxu0 %v382_v40  ;;  %v65_v61 = vld [vmem:[%s827_s1 + $0x158] sm:$0xff]  ;;  %v388_v63 = vpack.c.bf16 %v58_v55, %v54_v54  ;;  %v420_v0 = vpack.c.bf16 %v60_v58, %v56_v56  ;;  %v390_v1 = vpack.c.bf16 %v67_v60, %v63_v59  ;;  %v62_v2 = vld [vmem:[%s827_s1 + $0x140] sm:$0xff]  ;;  %v64_v5 = vld [vmem:[%s827_s1 + $0x150] sm:$0xff]  ;;  %v98_v46 = vsub.s32 2, %v89_v43 }
  0x10   :  { %415 = vmatprep.subr.bf16.mxu1 %v414_v44  ;;  %v69_v62 = vld [vmem:[%s827_s1 + $0x178] sm:$0xff]  ;;  %v66_v4 = vld [vmem:[%s827_s1 + $0x160] sm:$0xff]  ;;  %v68_v7 = vld [vmem:[%s827_s1 + $0x170] sm:$0xff]  ;;  %v90_v44 = vsub.s32 0, %v89_v43  ;;  %v94_v47 = vsub.s32 1, %v89_v43  ;;  %v102_v48 = vsub.s32 3, %v89_v43 }
  0x11   :  { %v422_v6 = vpack.c.bf16 %v69_v62, %v65_v61  ;;  %v71_v8 = vld [vmem:[%s827_s1 + $0x188] sm:$0xff]  ;;  %v73_v10 = vld [vmem:[%s827_s1 + $0x198] sm:$0xff]  ;;  %v392_v12 = vpack.c.bf16 %v66_v4, %v62_v2  ;;  %v424_v13 = vpack.c.bf16 %v68_v7, %v64_v5  ;;  %v70_v15 = vld [vmem:[%s827_s1 + $0x180] sm:$0xff] }
  0x12   :  { %385 = vmatpush1.bf16.msra.mxu0 %v384_v51  ;;  %v75_v9 = vld [vmem:[%s827_s1 + $0x1a8] sm:$0xff]  ;;  %v77_v11 = vld [vmem:[%s827_s1 + $0x1b8] sm:$0xff]  ;;  %v74_v16 = vld [vmem:[%s827_s1 + $0x1a0] sm:$0xff] }
  0x13   :  { %417 = vmatpush1.bf16.msra.mxu1 %v416_v52  ;;  %387 = vmatprep.subr.bf16.mxu0 %v386_v53  ;;  %v394_v14 = vpack.c.bf16 %v75_v9, %v71_v8  ;;  %v72_v17 = vld [vmem:[%s827_s1 + $0x190] sm:$0xff]  ;;  %v426_v18 = vpack.c.bf16 %v77_v11, %v73_v10  ;;  %v79_v20 = vld [vmem:[%s827_s1 + $0x1c8] sm:$0xff]  ;;  %v81_v22 = vld [vmem:[%s827_s1 + $0x1d8] sm:$0xff]  ;;  %v396_v24 = vpack.c.bf16 %v74_v16, %v70_v15 }
  0x14   :  { %419 = vmatprep.subr.bf16.mxu1 %v418_v57  ;;  %v76_v19 = vld [vmem:[%s827_s1 + $0x1b0] sm:$0xff]  ;;  %v83_v21 = vld [vmem:[%s827_s1 + $0x1e8] sm:$0xff]  ;;  %v85_v23 = vld [vmem:[%s827_s1 + $0x1f8] sm:$0xff] }
  0x15   :  { %v428_v25 = vpack.c.bf16 %v76_v19, %v72_v17  ;;  %v398_v26 = vpack.c.bf16 %v83_v21, %v79_v20  ;;  %v78_v27 = vld [vmem:[%s827_s1 + $0x1c0] sm:$0xff]  ;;  %v430_v29 = vpack.c.bf16 %v85_v23, %v81_v22  ;;  %v80_v30 = vld [vmem:[%s827_s1 + $0x1d0] sm:$0xff]  ;;  %v15_v35 = vld [vmem:[%s828_s0 + $0x8] sm:$0xff] }
  0x16   :  { %389 = vmatpush1.bf16.msra.mxu0 %v388_v63  ;;  %v82_v28 = vld [vmem:[%s827_s1 + $0x1e0] sm:$0xff]  ;;  %v84_v31 = vld [vmem:[%s827_s1 + $0x1f0] sm:$0xff]  ;;  %v17_v37 = vld [vmem:[%s828_s0 + $0x18] sm:$0xff] }
  0x17   :  { %421 = vmatpush1.bf16.msra.mxu1 %v420_v0  ;;  %391 = vmatprep.subr.bf16.mxu0 %v390_v1  ;;  %v400_v32 = vpack.c.bf16 %v82_v28, %v78_v27  ;;  %v432_v33 = vpack.c.bf16 %v84_v31, %v80_v30  ;;  %v14_v34 = vld [vmem:[%s828_s0] sm:$0xff]  ;;  %v16_v36 = vld [vmem:[%s828_s0 + $0x10] sm:$0xff]  ;;  %v19_v39 = vld [vmem:[%s828_s0 + $0x28] sm:$0xff] }
  0x18   :  { %423 = vmatprep.subr.bf16.mxu1 %v422_v6  ;;  %v18_v38 = vld [vmem:[%s828_s0 + $0x20] sm:$0xff]  ;;  %v20_v40 = vld [vmem:[%s828_s0 + $0x30] sm:$0xff]  ;;  %v21_v41 = vld [vmem:[%s828_s0 + $0x38] sm:$0xff] }
  0x19   :  { %v86_v45 = vld [vmem:[%s829_s2] sm:$0xf] }
  0x1a   :  { %393 = vmatpush1.bf16.msra.mxu0 %v392_v12  ;;  %v691_v49 = vrot.slane %v86_v45, %v90_v44  ;;  %v693_v50 = vrot.slane %v86_v45, %v98_v46  ;;  %v695_v51 = vrot.slane %v86_v45, %v94_v47  ;;  %v697_v52 = vrot.slane %v86_v45, %v102_v48 }
  0x1b   :  { %425 = vmatpush1.bf16.msra.mxu1 %v424_v13  ;;  %395 = vmatprep.subr.bf16.mxu0 %v394_v14 }
  0x1c   :  { %427 = vmatprep.subr.bf16.mxu1 %v426_v18 }
  0x1e   :  { %397 = vmatpush1.bf16.msra.mxu0 %v396_v24 }
  0x1f   :  { %429 = vmatpush1.bf16.msra.mxu1 %v428_v25  ;;  %399 = vmatprep.subr.bf16.mxu0 %v398_v26 }
  0x20   :  { %431 = vmatprep.subr.bf16.mxu1 %v430_v29 }
  0x22   :  { %401 = vmatpush1.bf16.msra.mxu0 %v400_v32 }
  0x23   :  { %433 = vmatpush1.bf16.msra.mxu1 %v432_v33 }
  0x25   :  { %173 = vmatmul.mubr.f32.vlgmr.msra.gmra.mrb[0].mxu0 %v14_v34 }
  0x26   :  { %286 = vmatmul.mubr.f32.vlgmr.msra.gmra.mrb[0].mxu1 %v14_v34  ;;  %178 = vmatprep.mubr.f32.mxu0 %v435_v3 }
  0x27   :  { %291 = vmatprep.mubr.f32.mxu1 %v435_v3 }
  0x29   :  { %179 = vmatmul.mubr.f32.gmra.mrb[2].mxu0 %v15_v35 }
  0x2a   :  { %292 = vmatmul.mubr.f32.gmra.mrb[2].mxu1 %v15_v35  ;;  %184 = vmatprep.mubr.f32.mxu0 %v435_v3 }
  0x2b   :  { %297 = vmatprep.mubr.f32.mxu1 %v435_v3 }
  0x2d   :  { %185 = vmatmul.mubr.f32.gmra.mrb[4].mxu0 %v16_v36 }
  0x2e   :  { %298 = vmatmul.mubr.f32.gmra.mrb[4].mxu1 %v16_v36  ;;  %190 = vmatprep.mubr.f32.mxu0 %v435_v3 }
  0x2f   :  { %303 = vmatprep.mubr.f32.mxu1 %v435_v3 }
  0x31   :  { %191 = vmatmul.mubr.f32.gmra.mrb[6].mxu0 %v17_v37 }
  0x32   :  { %304 = vmatmul.mubr.f32.gmra.mrb[6].mxu1 %v17_v37  ;;  %196 = vmatprep.mubr.f32.mxu0 %v435_v3 }
  0x33   :  { %309 = vmatprep.mubr.f32.mxu1 %v435_v3 }
  0x35   :  { %197 = vmatmul.mubr.f32.gmra.mrb[8].mxu0 %v18_v38 }
  0x36   :  { %310 = vmatmul.mubr.f32.gmra.mrb[8].mxu1 %v18_v38  ;;  %202 = vmatprep.mubr.f32.mxu0 %v435_v3 }
  0x37   :  { %315 = vmatprep.mubr.f32.mxu1 %v435_v3 }
  0x39   :  { %203 = vmatmul.mubr.f32.gmra.mrb[10].mxu0 %v19_v39 }
  0x3a   :  { %316 = vmatmul.mubr.f32.gmra.mrb[10].mxu1 %v19_v39  ;;  %208 = vmatprep.mubr.f32.mxu0 %v435_v3 }
  0x3b   :  { %321 = vmatprep.mubr.f32.mxu1 %v435_v3 }
  0x3d   :  { %209 = vmatmul.mubr.f32.gmra.mrb[12].mxu0 %v20_v40 }
  0x3e   :  { %322 = vmatmul.mubr.f32.gmra.mrb[12].mxu1 %v20_v40  ;;  %214 = vmatprep.mubr.f32.mxu0 %v435_v3 }
  0x3f   :  { %327 = vmatprep.mubr.f32.mxu1 %v435_v3 }
  0x41   :  { %215 = vmatmul.mubr.f32.gmra.mrb[14].mxu0 %v21_v41 }
  0x42   :  { %328 = vmatmul.mubr.f32.gmra.mrb[14].mxu1 %v21_v41 }
  0xf8   :  { %v174_v3 = vpop.f32.mrb[0].mxu0 }
  0xf9   :  { %v175_v53 = vadd.f32 %v174_v3, %v691_v49  ;;  %v287_v54 = vpop.f32.mrb[0].mxu1  ;;  %v176_v55 = vpop.f32.mrb[1].mxu0 }
  0xfa   :  { %v288_v56 = vadd.f32 %v287_v54, %v693_v50  ;;  %v177_v57 = vadd.f32 %v176_v55, %v695_v51  ;;  %v289_v58 = vpop.f32.mrb[1].mxu1 }
  0xfb   :  { %334 = vst [vmem:[%s830_s3] sm:$0xff] %v175_v53  ;;  %v290_v59 = vadd.f32 %v289_v58, %v697_v52 }
  0xfc   :  { %336 = vst [vmem:[%s830_s3 + $0x10] sm:$0xff] %v288_v56  ;;  %335 = vst [vmem:[%s830_s3 + $0x8] sm:$0xff] %v177_v57  ;;  %v180_v60 = vpop.f32.mrb[2].mxu0 }
  0xfd   :  { %337 = vst [vmem:[%s830_s3 + $0x18] sm:$0xff] %v290_v59  ;;  %v181_v61 = vadd.f32 %v180_v60, %v691_v49  ;;  %v293_v62 = vpop.f32.mrb[2].mxu1  ;;  %v182_v63 = vpop.f32.mrb[3].mxu0 }
  0xfe   :  { %v294_v0 = vadd.f32 %v293_v62, %v693_v50  ;;  %v183_v1 = vadd.f32 %v182_v63, %v695_v51  ;;  %v295_v2 = vpop.f32.mrb[3].mxu1 }
  0xff   :  { %338 = vst [vmem:[%s830_s3 + $0x20] sm:$0xff] %v181_v61  ;;  %v296_v4 = vadd.f32 %v295_v2, %v697_v52 }
 0x100   :  { %340 = vst [vmem:[%s830_s3 + $0x30] sm:$0xff] %v294_v0  ;;  %339 = vst [vmem:[%s830_s3 + $0x28] sm:$0xff] %v183_v1  ;;  %v186_v5 = vpop.f32.mrb[4].mxu0 }
 0x101   :  { %341 = vst [vmem:[%s830_s3 + $0x38] sm:$0xff] %v296_v4  ;;  %v187_v6 = vadd.f32 %v186_v5, %v691_v49  ;;  %v299_v7 = vpop.f32.mrb[4].mxu1  ;;  %v188_v8 = vpop.f32.mrb[5].mxu0 }
 0x102   :  { %v300_v9 = vadd.f32 %v299_v7, %v693_v50  ;;  %v189_v10 = vadd.f32 %v188_v8, %v695_v51  ;;  %v301_v11 = vpop.f32.mrb[5].mxu1 }
 0x103   :  { %342 = vst [vmem:[%s830_s3 + $0x40] sm:$0xff] %v187_v6  ;;  %v302_v12 = vadd.f32 %v301_v11, %v697_v52 }
 0x104   :  { %344 = vst [vmem:[%s830_s3 + $0x50] sm:$0xff] %v300_v9  ;;  %343 = vst [vmem:[%s830_s3 + $0x48] sm:$0xff] %v189_v10  ;;  %v192_v13 = vpop.f32.mrb[6].mxu0 }
 0x105   :  { %345 = vst [vmem:[%s830_s3 + $0x58] sm:$0xff] %v302_v12  ;;  %v193_v14 = vadd.f32 %v192_v13, %v691_v49  ;;  %v305_v15 = vpop.f32.mrb[6].mxu1  ;;  %v194_v16 = vpop.f32.mrb[7].mxu0 }
 0x106   :  { %v306_v17 = vadd.f32 %v305_v15, %v693_v50  ;;  %v195_v18 = vadd.f32 %v194_v16, %v695_v51  ;;  %v307_v19 = vpop.f32.mrb[7].mxu1 }
 0x107   :  { %346 = vst [vmem:[%s830_s3 + $0x60] sm:$0xff] %v193_v14  ;;  %v308_v20 = vadd.f32 %v307_v19, %v697_v52 }
 0x108   :  { %348 = vst [vmem:[%s830_s3 + $0x70] sm:$0xff] %v306_v17  ;;  %347 = vst [vmem:[%s830_s3 + $0x68] sm:$0xff] %v195_v18  ;;  %v198_v21 = vpop.f32.mrb[8].mxu0 }
 0x109   :  { %349 = vst [vmem:[%s830_s3 + $0x78] sm:$0xff] %v308_v20  ;;  %v199_v22 = vadd.f32 %v198_v21, %v691_v49  ;;  %v311_v23 = vpop.f32.mrb[8].mxu1  ;;  %v200_v24 = vpop.f32.mrb[9].mxu0 }
 0x10a   :  { %v312_v25 = vadd.f32 %v311_v23, %v693_v50  ;;  %v201_v26 = vadd.f32 %v200_v24, %v695_v51  ;;  %v313_v27 = vpop.f32.mrb[9].mxu1 }
 0x10b   :  { %350 = vst [vmem:[%s830_s3 + $0x80] sm:$0xff] %v199_v22  ;;  %v314_v28 = vadd.f32 %v313_v27, %v697_v52 }
 0x10c   :  { %352 = vst [vmem:[%s830_s3 + $0x90] sm:$0xff] %v312_v25  ;;  %351 = vst [vmem:[%s830_s3 + $0x88] sm:$0xff] %v201_v26  ;;  %v204_v29 = vpop.f32.mrb[10].mxu0 }
 0x10d   :  { %353 = vst [vmem:[%s830_s3 + $0x98] sm:$0xff] %v314_v28  ;;  %v205_v30 = vadd.f32 %v204_v29, %v691_v49  ;;  %v317_v31 = vpop.f32.mrb[10].mxu1  ;;  %v206_v32 = vpop.f32.mrb[11].mxu0 }
 0x10e   :  { %v318_v33 = vadd.f32 %v317_v31, %v693_v50  ;;  %v207_v34 = vadd.f32 %v206_v32, %v695_v51  ;;  %v319_v35 = vpop.f32.mrb[11].mxu1 }
 0x10f   :  { %354 = vst [vmem:[%s830_s3 + $0xa0] sm:$0xff] %v205_v30  ;;  %v320_v36 = vadd.f32 %v319_v35, %v697_v52 }
 0x110   :  { %356 = vst [vmem:[%s830_s3 + $0xb0] sm:$0xff] %v318_v33  ;;  %355 = vst [vmem:[%s830_s3 + $0xa8] sm:$0xff] %v207_v34  ;;  %v210_v37 = vpop.f32.mrb[12].mxu0 }
 0x111   :  { %357 = vst [vmem:[%s830_s3 + $0xb8] sm:$0xff] %v320_v36  ;;  %v211_v38 = vadd.f32 %v210_v37, %v691_v49  ;;  %v323_v39 = vpop.f32.mrb[12].mxu1  ;;  %v212_v40 = vpop.f32.mrb[13].mxu0 }
 0x112   :  { %v324_v41 = vadd.f32 %v323_v39, %v693_v50  ;;  %v213_v42 = vadd.f32 %v212_v40, %v695_v51  ;;  %v325_v43 = vpop.f32.mrb[13].mxu1 }
 0x113   :  { %358 = vst [vmem:[%s830_s3 + $0xc0] sm:$0xff] %v211_v38  ;;  %v326_v44 = vadd.f32 %v325_v43, %v697_v52 }
 0x114   :  { %360 = vst [vmem:[%s830_s3 + $0xd0] sm:$0xff] %v324_v41  ;;  %359 = vst [vmem:[%s830_s3 + $0xc8] sm:$0xff] %v213_v42  ;;  %v216_v45 = vpop.f32.mrb[14].mxu0 }
 0x115   :  { %361 = vst [vmem:[%s830_s3 + $0xd8] sm:$0xff] %v326_v44  ;;  %v217_v46 = vadd.f32 %v216_v45, %v691_v49  ;;  %v329_v47 = vpop.f32.mrb[14].mxu1  ;;  %v218_v48 = vpop.f32.mrb[15].mxu0 }
 0x116   :  { %v330_v3 = vadd.f32 %v329_v47, %v693_v50  ;;  %v219_v53 = vadd.f32 %v218_v48, %v695_v51  ;;  %v331_v54 = vpop.f32.mrb[15].mxu1 }
 0x117   :  { %362 = vst [vmem:[%s830_s3 + $0xe0] sm:$0xff] %v217_v46  ;;  %v332_v55 = vadd.f32 %v331_v54, %v697_v52 }
 0x118   :  { %364 = vst [vmem:[%s830_s3 + $0xf0] sm:$0xff] %v330_v3  ;;  %363 = vst [vmem:[%s830_s3 + $0xe8] sm:$0xff] %v219_v53 }
 0x119   :  { %365 = vst [vmem:[%s830_s3 + $0xf8] sm:$0xff] %v332_v55 }

// kernel: poetry_forward.4
= control target key start
LH: loop header
LB: loop body
LE: loop exit
PB: predicated region body
PF: predicated region fallthrough
CT: control target
= control target key end

     0   :  { %v6753_v3 = vmov 0.0   ;;  %s6744_s3 = inlined_call_operand.vmem [shape: f32[128,512], index: 3, kind: input, shape index: {}]   ;;  %s6745_s4 = inlined_call_operand.vmem [shape: f32[256,512], index: 4, kind: input, shape index: {}]   ;;  %s6746_s1 = inlined_call_operand.vmem [shape: f32[2,8,128], index: 1, kind: input, shape index: {}, may-alias: {1,2}]   ;;  %s6747_s0 = inlined_call_operand.vmem [shape: f32[8,8,512], index: 0, kind: input, shape index: {}]   ;;  %s6748_s2 = inlined_call_operand.vmem [shape: f32[2,8,128], index: 2, kind: input, shape index: {}, may-alias: {1,2}]   ;;  %s6749_s5 = inlined_call_operand.vmem [shape: f32[1,512], index: 5, kind: input, shape index: {}]   ;;  %s6750_s6 = inlined_call_operand.vmem [shape: f32[8,8,128], index: 6, kind: output, shape index: {0}]   ;;  %s6751_s8 = inlined_call_operand.vmem [shape: f32[2,8,128], index: 8, kind: output, shape index: {2}]   ;;  %s6752_s7 = inlined_call_operand.vmem [shape: f32[2,8,128], index: 7, kind: output, shape index: {1}]  }
   0x1   :  { %v39_v0 = vld [vmem:[%s6744_s3 + $0x8] sm:$0xff]  ;;  %v38_v2 = vld [vmem:[%s6744_s3] sm:$0xff]  ;;  %326 = vmatprep.mubr.f32.mxu0 %v6753_v3  ;;  %397 = vmatprep.mubr.f32.mxu1 %v6753_v3  ;;  %v41_v19 = vld [vmem:[%s6744_s3 + $0x18] sm:$0xff] }
   0x2   :  { %v43_v1 = vld [vmem:[%s6744_s3 + $0x28] sm:$0xff]  ;;  %v42_v5 = vld [vmem:[%s6744_s3 + $0x20] sm:$0xff]  ;;  %v45_v20 = vld [vmem:[%s6744_s3 + $0x38] sm:$0xff] }
   0x3   :  { %v4960_v4 = vpack.c.bf16 %v43_v1, %v39_v0  ;;  %v47_v6 = vld [vmem:[%s6744_s3 + $0x48] sm:$0xff]  ;;  %v4971_v8 = vpack.c.bf16 %v42_v5, %v38_v2  ;;  %v46_v10 = vld [vmem:[%s6744_s3 + $0x40] sm:$0xff]  ;;  %v5012_v22 = vpack.c.bf16 %v45_v20, %v41_v19  ;;  %v40_v23 = vld [vmem:[%s6744_s3 + $0x10] sm:$0xff] }
   0x4   :  { %v51_v7 = vld [vmem:[%s6744_s3 + $0x68] sm:$0xff]  ;;  %v50_v11 = vld [vmem:[%s6744_s3 + $0x60] sm:$0xff]  ;;  %v44_v24 = vld [vmem:[%s6744_s3 + $0x30] sm:$0xff] }
   0x5   :  { %6865 = vst [vmem:[#allocation4_spill] sm:$0xff] %v4960_v4  ;;  %v4973_v9 = vpack.c.bf16 %v51_v7, %v47_v6  ;;  %v55_v12 = vld [vmem:[%s6744_s3 + $0x88] sm:$0xff]  ;;  %3111 = vmatprep.subr.bf16.mxu0 %v4960_v4  ;;  %v4989_v14 = vpack.c.bf16 %v50_v11, %v46_v10  ;;  %v54_v15 = vld [vmem:[%s6744_s3 + $0x80] sm:$0xff]  ;;  %6866 = vst [vmem:[#allocation5_spill] sm:$0xff] %v5012_v22  ;;  %v5020_v25 = vpack.c.bf16 %v44_v24, %v40_v23 }
   0x6   :  { %v59_v13 = vld [vmem:[%s6744_s3 + $0xa8] sm:$0xff]  ;;  %3113 = vmatpush1.bf16.msra.mxu0 %v4971_v8  ;;  %v58_v16 = vld [vmem:[%s6744_s3 + $0xa0] sm:$0xff]  ;;  %3143 = vmatprep.subr.bf16.mxu1 %v5012_v22  ;;  %v49_v27 = vld [vmem:[%s6744_s3 + $0x58] sm:$0xff] }
   0x7   :  { %3115 = vmatprep.subr.bf16.mxu0 %v4973_v9  ;;  %v4998_v17 = vpack.c.bf16 %v59_v13, %v55_v12  ;;  %v63_v18 = vld [vmem:[%s6744_s3 + $0xc8] sm:$0xff]  ;;  %v5023_v26 = vpack.c.bf16 %v58_v16, %v54_v15  ;;  %v53_v28 = vld [vmem:[%s6744_s3 + $0x78] sm:$0xff]  ;;  %v48_v29 = vld [vmem:[%s6744_s3 + $0x50] sm:$0xff]  ;;  %3145 = vmatpush1.bf16.msra.mxu1 %v5020_v25 }
   0x8   :  { %v67_v21 = vld [vmem:[%s6744_s3 + $0xe8] sm:$0xff]  ;;  %v62_v31 = vld [vmem:[%s6744_s3 + $0xc0] sm:$0xff]  ;;  %v5045_v33 = vpack.c.bf16 %v53_v28, %v49_v27  ;;  %v52_v34 = vld [vmem:[%s6744_s3 + $0x70] sm:$0xff] }
   0x9   :  { %v5036_v30 = vpack.c.bf16 %v67_v21, %v63_v18  ;;  %v66_v32 = vld [vmem:[%s6744_s3 + $0xe0] sm:$0xff]  ;;  %v71_v35 = vld [vmem:[%s6744_s3 + $0x108] sm:$0xff]  ;;  %v5056_v37 = vpack.c.bf16 %v52_v34, %v48_v29  ;;  %v57_v38 = vld [vmem:[%s6744_s3 + $0x98] sm:$0xff] }
   0xa   :  { %3117 = vmatpush1.bf16.msra.mxu0 %v4989_v14  ;;  %v75_v36 = vld [vmem:[%s6744_s3 + $0x128] sm:$0xff]  ;;  %3147 = vmatprep.subr.bf16.mxu1 %v5045_v33  ;;  %v61_v39 = vld [vmem:[%s6744_s3 + $0xb8] sm:$0xff]  ;;  %v56_v40 = vld [vmem:[%s6744_s3 + $0x90] sm:$0xff]  ;;  %v5072_v42 = vpack.c.bf16 %v66_v32, %v62_v31 }
   0xb   :  { %3119 = vmatprep.subr.bf16.mxu0 %v4998_v17  ;;  %v60_v41 = vld [vmem:[%s6744_s3 + $0xb0] sm:$0xff]  ;;  %v70_v43 = vld [vmem:[%s6744_s3 + $0x100] sm:$0xff]  ;;  %v5080_v45 = vpack.c.bf16 %v61_v39, %v57_v38  ;;  %v5083_v46 = vpack.c.bf16 %v75_v36, %v71_v35  ;;  %3149 = vmatpush1.bf16.msra.mxu1 %v5056_v37  ;;  %v79_v47 = vld [vmem:[%s6744_s3 + $0x148] sm:$0xff] }
   0xc   :  { %v74_v44 = vld [vmem:[%s6744_s3 + $0x120] sm:$0xff]  ;;  %v5089_v48 = vpack.c.bf16 %v60_v41, %v56_v40  ;;  %v65_v49 = vld [vmem:[%s6744_s3 + $0xd8] sm:$0xff]  ;;  %v83_v51 = vld [vmem:[%s6744_s3 + $0x168] sm:$0xff] }
   0xd   :  { %v69_v50 = vld [vmem:[%s6744_s3 + $0xf8] sm:$0xff]  ;;  %3151 = vmatprep.subr.bf16.mxu1 %v5080_v45  ;;  %v64_v53 = vld [vmem:[%s6744_s3 + $0xd0] sm:$0xff]  ;;  %v5110_v55 = vpack.c.bf16 %v74_v44, %v70_v43  ;;  %v5119_v58 = vpack.c.bf16 %v83_v51, %v79_v47  ;;  %v78_v59 = vld [vmem:[%s6744_s3 + $0x140] sm:$0xff] }
   0xe   :  { %3121 = vmatpush1.bf16.msra.mxu0 %v5023_v26  ;;  %v5101_v52 = vpack.c.bf16 %v69_v50, %v65_v49  ;;  %v68_v54 = vld [vmem:[%s6744_s3 + $0xf0] sm:$0xff]  ;;  %v73_v56 = vld [vmem:[%s6744_s3 + $0x118] sm:$0xff]  ;;  %v82_v60 = vld [vmem:[%s6744_s3 + $0x160] sm:$0xff] }
   0xf   :  { %3123 = vmatprep.subr.bf16.mxu0 %v5036_v30  ;;  %v77_v57 = vld [vmem:[%s6744_s3 + $0x138] sm:$0xff]  ;;  %3153 = vmatpush1.bf16.msra.mxu1 %v5089_v48  ;;  %v87_v61 = vld [vmem:[%s6744_s3 + $0x188] sm:$0xff]  ;;  %v5131_v62 = vpack.c.bf16 %v68_v54, %v64_v53  ;;  %v72_v1 = vld [vmem:[%s6744_s3 + $0x110] sm:$0xff]  ;;  %v5152_v7 = vpack.c.bf16 %v82_v60, %v78_v59 }
  0x10   :  { %v91_v63 = vld [vmem:[%s6744_s3 + $0x1a8] sm:$0xff]  ;;  %3155 = vmatprep.subr.bf16.mxu1 %v5101_v52  ;;  %v5137_v0 = vpack.c.bf16 %v77_v57, %v73_v56  ;;  %v76_v2 = vld [vmem:[%s6744_s3 + $0x130] sm:$0xff]  ;;  %v81_v5 = vld [vmem:[%s6744_s3 + $0x158] sm:$0xff] }
  0x11   :  { %v85_v6 = vld [vmem:[%s6744_s3 + $0x178] sm:$0xff]  ;;  %v5155_v10 = vpack.c.bf16 %v91_v63, %v87_v61  ;;  %v86_v11 = vld [vmem:[%s6744_s3 + $0x180] sm:$0xff]  ;;  %v95_v13 = vld [vmem:[%s6744_s3 + $0x1c8] sm:$0xff]  ;;  %v5167_v15 = vpack.c.bf16 %v76_v2, %v72_v1 }
  0x12   :  { %3125 = vmatpush1.bf16.msra.mxu0 %v5072_v42  ;;  %v90_v12 = vld [vmem:[%s6744_s3 + $0x1a0] sm:$0xff]  ;;  %v99_v16 = vld [vmem:[%s6744_s3 + $0x1e8] sm:$0xff]  ;;  %v5173_v18 = vpack.c.bf16 %v85_v6, %v81_v5  ;;  %v80_v19 = vld [vmem:[%s6744_s3 + $0x150] sm:$0xff] }
  0x13   :  { %3127 = vmatprep.subr.bf16.mxu0 %v5083_v46  ;;  %3157 = vmatpush1.bf16.msra.mxu1 %v5131_v62  ;;  %v84_v20 = vld [vmem:[%s6744_s3 + $0x170] sm:$0xff]  ;;  %v89_v21 = vld [vmem:[%s6744_s3 + $0x198] sm:$0xff]  ;;  %v5188_v24 = vpack.c.bf16 %v90_v12, %v86_v11  ;;  %v5191_v27 = vpack.c.bf16 %v99_v16, %v95_v13  ;;  %v94_v28 = vld [vmem:[%s6744_s3 + $0x1c0] sm:$0xff] }
  0x14   :  { %3159 = vmatprep.subr.bf16.mxu1 %v5137_v0  ;;  %v93_v23 = vld [vmem:[%s6744_s3 + $0x1b8] sm:$0xff]  ;;  %v98_v29 = vld [vmem:[%s6744_s3 + $0x1e0] sm:$0xff]  ;;  %v5200_v31 = vpack.c.bf16 %v84_v20, %v80_v19  ;;  %v88_v32 = vld [vmem:[%s6744_s3 + $0x190] sm:$0xff] }
  0x15   :  { %v5206_v34 = vpack.c.bf16 %v93_v23, %v89_v21  ;;  %v92_v35 = vld [vmem:[%s6744_s3 + $0x1b0] sm:$0xff]  ;;  %v103_v36 = vld [vmem:[%s6745_s4 + $0x8] sm:$0xff]  ;;  %v97_v39 = vld [vmem:[%s6744_s3 + $0x1d8] sm:$0xff]  ;;  %v5224_v41 = vpack.c.bf16 %v98_v29, %v94_v28 }
  0x16   :  { %3129 = vmatpush1.bf16.msra.mxu0 %v5110_v55  ;;  %v107_v38 = vld [vmem:[%s6745_s4 + $0x28] sm:$0xff]  ;;  %v101_v40 = vld [vmem:[%s6744_s3 + $0x1f8] sm:$0xff]  ;;  %v5228_v43 = vpack.c.bf16 %v92_v35, %v88_v32  ;;  %v96_v44 = vld [vmem:[%s6744_s3 + $0x1d0] sm:$0xff] }
  0x17   :  { %3131 = vmatprep.subr.bf16.mxu0 %v5119_v58  ;;  %3161 = vmatpush1.bf16.msra.mxu1 %v5167_v15  ;;  %v5233_v47 = vpack.c.bf16 %v107_v38, %v103_v36  ;;  %v102_v49 = vld [vmem:[%s6745_s4] sm:$0xff]  ;;  %v5242_v51 = vpack.c.bf16 %v101_v40, %v97_v39  ;;  %v100_v53 = vld [vmem:[%s6744_s3 + $0x1f0] sm:$0xff]  ;;  %v111_v54 = vld [vmem:[%s6745_s4 + $0x48] sm:$0xff] }
  0x18   :  { %3163 = vmatprep.subr.bf16.mxu1 %v5173_v18  ;;  %v106_v50 = vld [vmem:[%s6745_s4 + $0x20] sm:$0xff]  ;;  %v115_v56 = vld [vmem:[%s6745_s4 + $0x68] sm:$0xff]  ;;  %v105_v57 = vld [vmem:[%s6745_s4 + $0x18] sm:$0xff]  ;;  %v5266_v63 = vpack.c.bf16 %v100_v53, %v96_v44 }
  0x19   :  { %v109_v59 = vld [vmem:[%s6745_s4 + $0x38] sm:$0xff]  ;;  %v30_v60 = vld [vmem:[%s6746_s1] sm:$0xff]  ;;  %v5263_v61 = vpack.c.bf16 %v106_v50, %v102_v49  ;;  %v104_v1 = vld [vmem:[%s6745_s4 + $0x10] sm:$0xff]  ;;  %v5272_v2 = vpack.c.bf16 %v115_v56, %v111_v54 }
  0x1a   :  { %3133 = vmatpush1.bf16.msra.mxu0 %v5152_v7  ;;  %v110_v5 = vld [vmem:[%s6745_s4 + $0x40] sm:$0xff]  ;;  %v5281_v11 = vpack.c.bf16 %v109_v59, %v105_v57  ;;  %v108_v12 = vld [vmem:[%s6745_s4 + $0x30] sm:$0xff]  ;;  %v119_v13 = vld [vmem:[%s6745_s4 + $0x88] sm:$0xff] }
  0x1b   :  { %3135 = vmatprep.subr.bf16.mxu0 %v5155_v10  ;;  %3165 = vmatpush1.bf16.msra.mxu1 %v5200_v31  ;;  %v114_v6 = vld [vmem:[%s6745_s4 + $0x60] sm:$0xff]  ;;  %v123_v16 = vld [vmem:[%s6745_s4 + $0xa8] sm:$0xff]  ;;  %v113_v19 = vld [vmem:[%s6745_s4 + $0x58] sm:$0xff]  ;;  %v5302_v23 = vpack.c.bf16 %v108_v12, %v104_v1 }
  0x1c   :  { %3167 = vmatprep.subr.bf16.mxu1 %v5206_v34  ;;  %v117_v20 = vld [vmem:[%s6745_s4 + $0x78] sm:$0xff]  ;;  %v5299_v21 = vpack.c.bf16 %v114_v6, %v110_v5  ;;  %v112_v28 = vld [vmem:[%s6745_s4 + $0x50] sm:$0xff]  ;;  %v5308_v29 = vpack.c.bf16 %v123_v16, %v119_v13  ;;  %v118_v32 = vld [vmem:[%s6745_s4 + $0x80] sm:$0xff] }
  0x1d   :  { %v122_v35 = vld [vmem:[%s6745_s4 + $0xa0] sm:$0xff]  ;;  %v5317_v36 = vpack.c.bf16 %v117_v20, %v113_v19  ;;  %v116_v38 = vld [vmem:[%s6745_s4 + $0x70] sm:$0xff]  ;;  %v127_v39 = vld [vmem:[%s6745_s4 + $0xc8] sm:$0xff] }
  0x1e   :  { %3137 = vmatpush1.bf16.msra.mxu0 %v5188_v24  ;;  %v131_v40 = vld [vmem:[%s6745_s4 + $0xe8] sm:$0xff]  ;;  %v121_v44 = vld [vmem:[%s6745_s4 + $0x98] sm:$0xff]  ;;  %v5335_v50 = vpack.c.bf16 %v122_v35, %v118_v32  ;;  %v5338_v53 = vpack.c.bf16 %v116_v38, %v112_v28  ;;  %v120_v54 = vld [vmem:[%s6745_s4 + $0x90] sm:$0xff] }
  0x1f   :  { %3139 = vmatprep.subr.bf16.mxu0 %v5191_v27  ;;  %3169 = vmatpush1.bf16.msra.mxu1 %v5228_v43  ;;  %v125_v49 = vld [vmem:[%s6745_s4 + $0xb8] sm:$0xff]  ;;  %v5344_v56 = vpack.c.bf16 %v131_v40, %v127_v39  ;;  %v126_v57 = vld [vmem:[%s6745_s4 + $0xc0] sm:$0xff]  ;;  %v124_v1 = vld [vmem:[%s6745_s4 + $0xb0] sm:$0xff] }
  0x20   :  { %3171 = vmatprep.subr.bf16.mxu1 %v5242_v51  ;;  %v130_v59 = vld [vmem:[%s6745_s4 + $0xe0] sm:$0xff]  ;;  %v135_v5 = vld [vmem:[%s6745_s4 + $0x108] sm:$0xff]  ;;  %v129_v12 = vld [vmem:[%s6745_s4 + $0xd8] sm:$0xff]  ;;  %v5374_v19 = vpack.c.bf16 %v124_v1, %v120_v54 }
  0x21   :  { %6867 = vst [vmem:[#allocation6_spill] sm:$0xff] %v5344_v56  ;;  %v139_v6 = vld [vmem:[%s6745_s4 + $0x128] sm:$0xff]  ;;  %v133_v13 = vld [vmem:[%s6745_s4 + $0xf8] sm:$0xff]  ;;  %v5371_v16 = vpack.c.bf16 %v130_v59, %v126_v57  ;;  %v134_v28 = vld [vmem:[%s6745_s4 + $0x100] sm:$0xff] }
  0x22   :  { %3141 = vmatpush1.bf16.msra.mxu0 %v5224_v41  ;;  %v5377_v20 = vpack.c.bf16 %v139_v6, %v135_v5  ;;  %v138_v32 = vld [vmem:[%s6745_s4 + $0x120] sm:$0xff]  ;;  %v5386_v35 = vpack.c.bf16 %v133_v13, %v129_v12  ;;  %v128_v38 = vld [vmem:[%s6745_s4 + $0xd0] sm:$0xff]  ;;  %v137_v40 = vld [vmem:[%s6745_s4 + $0x118] sm:$0xff] }
  0x23   :  { %3175 = vmatprep.subr.bf16.mxu0 %v5233_v47  ;;  %3173 = vmatpush1.bf16.msra.mxu1 %v5266_v63  ;;  %6868 = vst [vmem:[#allocation7_spill] sm:$0xff] %v5371_v16  ;;  %v132_v39 = vld [vmem:[%s6745_s4 + $0xf0] sm:$0xff]  ;;  %v143_v6 = vld [vmem:[%s6745_s4 + $0x148] sm:$0xff]  ;;  %v145_v13 = vld [vmem:[%s6745_s4 + $0x158] sm:$0xff] }
  0x24   :  { %3239 = vmatprep.subr.bf16.mxu1 %v5281_v11  ;;  %6869 = vst [vmem:[#allocation8_spill] sm:$0xff] %v5377_v20  ;;  %6870 = vst [vmem:[#allocation9_spill] sm:$0xff] %v5386_v35  ;;  %v5404_v54 = vpack.c.bf16 %v132_v39, %v128_v38  ;;  %v136_v59 = vld [vmem:[%s6745_s4 + $0x110] sm:$0xff]  ;;  %v147_v12 = vld [vmem:[%s6745_s4 + $0x168] sm:$0xff] }
  0x25   :  { %327 = vmatmul.mubr.f32.vlgmr.msra.gmra.mrb[0].mxu0 %v30_v60  ;;  %v140_v1 = vld [vmem:[%s6745_s4 + $0x130] sm:$0xff]  ;;  %v142_v38 = vld [vmem:[%s6745_s4 + $0x140] sm:$0xff] }
  0x26   :  { %3177 = vmatpush1.bf16.msra.mxu0 %v5263_v61  ;;  %398 = vmatmul.mubr.f32.vlgmr.msra.gmra.mrb[0].mxu1 %v30_v60  ;;  %v5353_v60 = vpack.c.bf16 %v125_v49, %v121_v44  ;;  %v141_v44 = vld [vmem:[%s6745_s4 + $0x138] sm:$0xff]  ;;  %v5401_v49 = vpack.c.bf16 %v138_v32, %v134_v28  ;;  %6872 = vst [vmem:[#allocation11_spill] sm:$0xff] %v5404_v54  ;;  %v146_v39 = vld [vmem:[%s6745_s4 + $0x160] sm:$0xff] }
  0x27   :  { %3179 = vmatprep.subr.bf16.mxu0 %v5272_v2  ;;  %3241 = vmatpush1.bf16.msra.mxu1 %v5302_v23  ;;  %v5408_v57 = vpack.c.bf16 %v141_v44, %v137_v40  ;;  %v5418_v5 = vpack.c.bf16 %v140_v1, %v136_v59  ;;  %v5431_v28 = vpack.c.bf16 %v147_v12, %v143_v6  ;;  %v149_v32 = vld [vmem:[%s6745_s4 + $0x178] sm:$0xff]  ;;  %v144_v59 = vld [vmem:[%s6745_s4 + $0x150] sm:$0xff]  ;;  %v151_v12 = vld [vmem:[%s6745_s4 + $0x188] sm:$0xff] }
  0x28   :  { %3243 = vmatprep.subr.bf16.mxu1 %v5317_v36  ;;  %6871 = vst [vmem:[#allocation10_spill] sm:$0xff] %v5401_v49  ;;  %v5442_v40 = vpack.c.bf16 %v149_v32, %v145_v13  ;;  %v5444_v44 = vpack.c.bf16 %v146_v39, %v142_v38  ;;  %v148_v1 = vld [vmem:[%s6745_s4 + $0x170] sm:$0xff]  ;;  %v155_v13 = vld [vmem:[%s6745_s4 + $0x1a8] sm:$0xff]  ;;  %v153_v32 = vld [vmem:[%s6745_s4 + $0x198] sm:$0xff] }
  0x29   :  { %6873 = vst [vmem:[#allocation12_spill] sm:$0xff] %v5408_v57  ;;  %6874 = vst [vmem:[#allocation13_spill] sm:$0xff] %v5418_v5  ;;  %v5453_v6 = vpack.c.bf16 %v148_v1, %v144_v59  ;;  %v5467_v38 = vpack.c.bf16 %v155_v13, %v151_v12  ;;  %v157_v39 = vld [vmem:[%s6745_s4 + $0x1b8] sm:$0xff]  ;;  %v150_v59 = vld [vmem:[%s6745_s4 + $0x180] sm:$0xff] }
  0x2a   :  { %3181 = vmatpush1.bf16.msra.mxu0 %v5299_v21  ;;  %6875 = vst [vmem:[#allocation14_spill] sm:$0xff] %v5431_v28  ;;  %6876 = vst [vmem:[#allocation15_spill] sm:$0xff] %v5442_v40  ;;  %v154_v1 = vld [vmem:[%s6745_s4 + $0x1a0] sm:$0xff]  ;;  %v5478_v3 = vpack.c.bf16 %v157_v39, %v153_v32  ;;  %v152_v12 = vld [vmem:[%s6745_s4 + $0x190] sm:$0xff] }
  0x2b   :  { %3183 = vmatprep.subr.bf16.mxu0 %v5308_v29  ;;  %3245 = vmatpush1.bf16.msra.mxu1 %v5338_v53  ;;  %6877 = vst [vmem:[#allocation16_spill] sm:$0xff] %v5444_v44  ;;  %6878 = vst [vmem:[#allocation17_spill] sm:$0xff] %v5453_v6  ;;  %v156_v13 = vld [vmem:[%s6745_s4 + $0x1b0] sm:$0xff]  ;;  %v159_v32 = vld [vmem:[%s6745_s4 + $0x1c8] sm:$0xff] }
  0x2c   :  { %3247 = vmatprep.subr.bf16.mxu1 %v5353_v60  ;;  %6879 = vst [vmem:[#allocation18_spill] sm:$0xff] %v5467_v38  ;;  %6880 = vst [vmem:[#allocation19_spill] sm:$0xff] %v5478_v3  ;;  %v163_v39 = vld [vmem:[%s6745_s4 + $0x1e8] sm:$0xff] }
  0x2e   :  { %3185 = vmatpush1.bf16.msra.mxu0 %v5335_v50 }
  0x2f   :  { %3187 = vmatprep.subr.bf16.mxu0 %v5344_v56  ;;  %3249 = vmatpush1.bf16.msra.mxu1 %v5374_v19 }
  0x30   :  { %3251 = vmatprep.subr.bf16.mxu1 %v5386_v35 }
  0x32   :  { %3189 = vmatpush1.bf16.msra.mxu0 %v5371_v16 }
  0x33   :  { %3191 = vmatprep.subr.bf16.mxu0 %v5377_v20  ;;  %3253 = vmatpush1.bf16.msra.mxu1 %v5404_v54 }
  0x34   :  { %3255 = vmatprep.subr.bf16.mxu1 %v5408_v57 }
  0x36   :  { %3193 = vmatpush1.bf16.msra.mxu0 %v5401_v49 }
  0x37   :  { %3257 = vmatpush1.bf16.msra.mxu1 %v5418_v5  ;;  %3195 = vmatprep.subr.bf16.mxu0 %v5431_v28 }
  0x38   :  { %3259 = vmatprep.subr.bf16.mxu1 %v5442_v40 }
  0x3a   :  { %3197 = vmatpush1.bf16.msra.mxu0 %v5444_v44  ;;  %v5480_v44 = vpack.c.bf16 %v154_v1, %v150_v59  ;;  %v161_v59 = vld [vmem:[%s6745_s4 + $0x1d8] sm:$0xff]  ;;  %v5503_v1 = vpack.c.bf16 %v163_v39, %v159_v32  ;;  %v160_v32 = vld [vmem:[%s6745_s4 + $0x1d0] sm:$0xff] }
  0x3b   :  { %3261 = vmatpush1.bf16.msra.mxu1 %v5453_v6  ;;  %3199 = vmatprep.subr.bf16.mxu0 %v5467_v38  ;;  %v5489_v6 = vpack.c.bf16 %v156_v13, %v152_v12  ;;  %v165_v12 = vld [vmem:[%s6745_s4 + $0x1f8] sm:$0xff]  ;;  %v158_v13 = vld [vmem:[%s6745_s4 + $0x1c0] sm:$0xff]  ;;  %v164_v39 = vld [vmem:[%s6745_s4 + $0x1f0] sm:$0xff] }
  0x3c   :  { %6881 = vst [vmem:[#allocation20_spill] sm:$0xff] %v5480_v44  ;;  %3263 = vmatprep.subr.bf16.mxu1 %v5478_v3  ;;  %6883 = vst [vmem:[#allocation22_spill] sm:$0xff] %v5503_v1  ;;  %v5514_v3 = vpack.c.bf16 %v165_v12, %v161_v59  ;;  %v171_v59 = vld [vmem:[%s6745_s4 + $0x228] sm:$0xff]  ;;  %v169_v12 = vld [vmem:[%s6745_s4 + $0x218] sm:$0xff] }
  0x3d   :  { %6882 = vst [vmem:[#allocation21_spill] sm:$0xff] %v5489_v6 }
  0x3e   :  { %3201 = vmatpush1.bf16.msra.mxu0 %v5480_v44  ;;  %v162_v44 = vld [vmem:[%s6745_s4 + $0x1e0] sm:$0xff]  ;;  %6884 = vst [vmem:[#allocation23_spill] sm:$0xff] %v5514_v3 }
  0x3f   :  { %3265 = vmatpush1.bf16.msra.mxu1 %v5489_v6  ;;  %v5516_v38 = vpack.c.bf16 %v162_v44, %v158_v13  ;;  %3203 = vmatprep.subr.bf16.mxu0 %v5503_v1  ;;  %v5525_v6 = vpack.c.bf16 %v164_v39, %v160_v32  ;;  %v167_v44 = vld [vmem:[%s6745_s4 + $0x208] sm:$0xff]  ;;  %v173_v32 = vld [vmem:[%s6745_s4 + $0x238] sm:$0xff]  ;;  %v166_v39 = vld [vmem:[%s6745_s4 + $0x200] sm:$0xff] }
  0x40   :  { %3267 = vmatprep.subr.bf16.mxu1 %v5514_v3  ;;  %v5539_v13 = vpack.c.bf16 %v171_v59, %v167_v44  ;;  %v5550_v3 = vpack.c.bf16 %v173_v32, %v169_v12  ;;  %v168_v44 = vld [vmem:[%s6745_s4 + $0x210] sm:$0xff]  ;;  %v179_v12 = vld [vmem:[%s6745_s4 + $0x268] sm:$0xff]  ;;  %v177_v32 = vld [vmem:[%s6745_s4 + $0x258] sm:$0xff] }
  0x41   :  { %6885 = vst [vmem:[#allocation24_spill] sm:$0xff] %v5516_v38  ;;  %6886 = vst [vmem:[#allocation25_spill] sm:$0xff] %v5525_v6  ;;  %v172_v59 = vld [vmem:[%s6745_s4 + $0x230] sm:$0xff] }
  0x42   :  { %3205 = vmatpush1.bf16.msra.mxu0 %v5516_v38  ;;  %6887 = vst [vmem:[#allocation26_spill] sm:$0xff] %v5539_v13  ;;  %v170_v38 = vld [vmem:[%s6745_s4 + $0x220] sm:$0xff]  ;;  %6888 = vst [vmem:[#allocation27_spill] sm:$0xff] %v5550_v3 }
  0x43   :  { %3269 = vmatpush1.bf16.msra.mxu1 %v5525_v6  ;;  %v5552_v1 = vpack.c.bf16 %v170_v38, %v166_v39  ;;  %3207 = vmatprep.subr.bf16.mxu0 %v5539_v13  ;;  %v5561_v6 = vpack.c.bf16 %v172_v59, %v168_v44  ;;  %v175_v38 = vld [vmem:[%s6745_s4 + $0x248] sm:$0xff]  ;;  %v181_v39 = vld [vmem:[%s6745_s4 + $0x278] sm:$0xff] }
  0x44   :  { %3271 = vmatprep.subr.bf16.mxu1 %v5550_v3  ;;  %v5578_v44 = vpack.c.bf16 %v179_v12, %v175_v38  ;;  %v5580_v59 = vpack.c.bf16 %v181_v39, %v177_v32  ;;  %v176_v3 = vld [vmem:[%s6745_s4 + $0x250] sm:$0xff]  ;;  %v183_v32 = vld [vmem:[%s6745_s4 + $0x288] sm:$0xff] }
  0x45   :  { %6889 = vst [vmem:[#allocation28_spill] sm:$0xff] %v5552_v1  ;;  %6890 = vst [vmem:[#allocation29_spill] sm:$0xff] %v5561_v6  ;;  %v180_v38 = vld [vmem:[%s6745_s4 + $0x270] sm:$0xff]  ;;  %v187_v39 = vld [vmem:[%s6745_s4 + $0x2a8] sm:$0xff] }
  0x46   :  { %3209 = vmatpush1.bf16.msra.mxu0 %v5552_v1  ;;  %6891 = vst [vmem:[#allocation30_spill] sm:$0xff] %v5578_v44  ;;  %6892 = vst [vmem:[#allocation31_spill] sm:$0xff] %v5580_v59  ;;  %v178_v1 = vld [vmem:[%s6745_s4 + $0x260] sm:$0xff]  ;;  %v5598_v12 = vpack.c.bf16 %v180_v38, %v176_v3  ;;  %v189_v3 = vld [vmem:[%s6745_s4 + $0x2b8] sm:$0xff] }
  0x47   :  { %3273 = vmatpush1.bf16.msra.mxu1 %v5561_v6  ;;  %v174_v6 = vld [vmem:[%s6745_s4 + $0x240] sm:$0xff]  ;;  %3211 = vmatprep.subr.bf16.mxu0 %v5578_v44 }
  0x48   :  { %v5591_v13 = vpack.c.bf16 %v178_v1, %v174_v6  ;;  %3275 = vmatprep.subr.bf16.mxu1 %v5580_v59  ;;  %6894 = vst [vmem:[#allocation33_spill] sm:$0xff] %v5598_v12  ;;  %v5607_v6 = vpack.c.bf16 %v187_v39, %v183_v32  ;;  %v185_v1 = vld [vmem:[%s6745_s4 + $0x298] sm:$0xff]  ;;  %v182_v38 = vld [vmem:[%s6745_s4 + $0x280] sm:$0xff]  ;;  %v184_v39 = vld [vmem:[%s6745_s4 + $0x290] sm:$0xff] }
  0x49   :  { %v5619_v59 = vpack.c.bf16 %v189_v3, %v185_v1  ;;  %v186_v32 = vld [vmem:[%s6745_s4 + $0x2a0] sm:$0xff]  ;;  %v191_v1 = vld [vmem:[%s6745_s4 + $0x2c8] sm:$0xff] }
  0x4a   :  { %6893 = vst [vmem:[#allocation32_spill] sm:$0xff] %v5591_v13  ;;  %3213 = vmatpush1.bf16.msra.mxu0 %v5591_v13  ;;  %6895 = vst [vmem:[#allocation34_spill] sm:$0xff] %v5607_v6  ;;  %v188_v13 = vld [vmem:[%s6745_s4 + $0x2b0] sm:$0xff]  ;;  %v5631_v44 = vpack.c.bf16 %v186_v32, %v182_v38  ;;  %v195_v3 = vld [vmem:[%s6745_s4 + $0x2e8] sm:$0xff] }
  0x4b   :  { %3277 = vmatpush1.bf16.msra.mxu1 %v5598_v12  ;;  %6896 = vst [vmem:[#allocation35_spill] sm:$0xff] %v5619_v59  ;;  %3215 = vmatprep.subr.bf16.mxu0 %v5607_v6  ;;  %v5633_v40 = vpack.c.bf16 %v188_v13, %v184_v39  ;;  %v193_v12 = vld [vmem:[%s6745_s4 + $0x2d8] sm:$0xff]  ;;  %v5646_v38 = vpack.c.bf16 %v195_v3, %v191_v1  ;;  %v190_v32 = vld [vmem:[%s6745_s4 + $0x2c0] sm:$0xff]  ;;  %v192_v1 = vld [vmem:[%s6745_s4 + $0x2d0] sm:$0xff] }
  0x4c   :  { %6897 = vst [vmem:[#allocation36_spill] sm:$0xff] %v5631_v44  ;;  %3279 = vmatprep.subr.bf16.mxu1 %v5619_v59  ;;  %v197_v13 = vld [vmem:[%s6745_s4 + $0x2f8] sm:$0xff]  ;;  %v194_v39 = vld [vmem:[%s6745_s4 + $0x2e0] sm:$0xff]  ;;  %v196_v3 = vld [vmem:[%s6745_s4 + $0x2f0] sm:$0xff] }
  0x4d   :  { %6898 = vst [vmem:[#allocation37_spill] sm:$0xff] %v5633_v40  ;;  %6899 = vst [vmem:[#allocation38_spill] sm:$0xff] %v5646_v38  ;;  %v5658_v59 = vpack.c.bf16 %v197_v13, %v193_v12  ;;  %v5660_v6 = vpack.c.bf16 %v194_v39, %v190_v32  ;;  %v199_v12 = vld [vmem:[%s6745_s4 + $0x308] sm:$0xff]  ;;  %v201_v32 = vld [vmem:[%s6745_s4 + $0x318] sm:$0xff] }
  0x4e   :  { %3217 = vmatpush1.bf16.msra.mxu0 %v5631_v44  ;;  %v5669_v44 = vpack.c.bf16 %v196_v3, %v192_v1  ;;  %v203_v13 = vld [vmem:[%s6745_s4 + $0x328] sm:$0xff]  ;;  %v205_v1 = vld [vmem:[%s6745_s4 + $0x338] sm:$0xff]  ;;  %v198_v3 = vld [vmem:[%s6745_s4 + $0x300] sm:$0xff] }
  0x4f   :  { %3281 = vmatpush1.bf16.msra.mxu1 %v5633_v40  ;;  %6900 = vst [vmem:[#allocation39_spill] sm:$0xff] %v5658_v59  ;;  %6901 = vst [vmem:[#allocation40_spill] sm:$0xff] %v5660_v6  ;;  %3219 = vmatprep.subr.bf16.mxu0 %v5646_v38  ;;  %v5682_v39 = vpack.c.bf16 %v203_v13, %v199_v12  ;;  %v5694_v38 = vpack.c.bf16 %v205_v1, %v201_v32  ;;  %v200_v12 = vld [vmem:[%s6745_s4 + $0x310] sm:$0xff]  ;;  %v207_v32 = vld [vmem:[%s6745_s4 + $0x348] sm:$0xff] }
  0x50   :  { %6902 = vst [vmem:[#allocation41_spill] sm:$0xff] %v5669_v44  ;;  %3283 = vmatprep.subr.bf16.mxu1 %v5658_v59  ;;  %v202_v59 = vld [vmem:[%s6745_s4 + $0x320] sm:$0xff]  ;;  %v204_v13 = vld [vmem:[%s6745_s4 + $0x330] sm:$0xff]  ;;  %v209_v1 = vld [vmem:[%s6745_s4 + $0x358] sm:$0xff] }
  0x51   :  { %6903 = vst [vmem:[#allocation42_spill] sm:$0xff] %v5682_v39  ;;  %6904 = vst [vmem:[#allocation43_spill] sm:$0xff] %v5694_v38  ;;  %v5696_v40 = vpack.c.bf16 %v202_v59, %v198_v3  ;;  %v211_v59 = vld [vmem:[%s6745_s4 + $0x368] sm:$0xff] }
  0x52   :  { %3221 = vmatpush1.bf16.msra.mxu0 %v5660_v6  ;;  %v5705_v6 = vpack.c.bf16 %v204_v13, %v200_v12  ;;  %v5718_v3 = vpack.c.bf16 %v211_v59, %v207_v32  ;;  %v213_v12 = vld [vmem:[%s6745_s4 + $0x378] sm:$0xff]  ;;  %v206_v13 = vld [vmem:[%s6745_s4 + $0x340] sm:$0xff]  ;;  %v208_v32 = vld [vmem:[%s6745_s4 + $0x350] sm:$0xff] }
  0x53   :  { %3285 = vmatpush1.bf16.msra.mxu1 %v5669_v44  ;;  %6905 = vst [vmem:[#allocation44_spill] sm:$0xff] %v5696_v40  ;;  %3223 = vmatprep.subr.bf16.mxu0 %v5682_v39  ;;  %v5730_v39 = vpack.c.bf16 %v213_v12, %v209_v1  ;;  %v212_v59 = vld [vmem:[%s6745_s4 + $0x370] sm:$0xff]  ;;  %v217_v1 = vld [vmem:[%s6745_s4 + $0x398] sm:$0xff] }
  0x54   :  { %6906 = vst [vmem:[#allocation45_spill] sm:$0xff] %v5705_v6  ;;  %3287 = vmatprep.subr.bf16.mxu1 %v5694_v38  ;;  %6907 = vst [vmem:[#allocation46_spill] sm:$0xff] %v5718_v3  ;;  %v210_v38 = vld [vmem:[%s6745_s4 + $0x360] sm:$0xff] }
  0x55   :  { %6908 = vst [vmem:[#allocation47_spill] sm:$0xff] %v5730_v39  ;;  %v5732_v44 = vpack.c.bf16 %v210_v38, %v206_v13  ;;  %v219_v38 = vld [vmem:[%s6745_s4 + $0x3a8] sm:$0xff]  ;;  %v221_v13 = vld [vmem:[%s6745_s4 + $0x3b8] sm:$0xff] }
  0x56   :  { %3225 = vmatpush1.bf16.msra.mxu0 %v5696_v40  ;;  %v5741_v40 = vpack.c.bf16 %v212_v59, %v208_v32  ;;  %v214_v32 = vld [vmem:[%s6745_s4 + $0x380] sm:$0xff] }
  0x57   :  { %3289 = vmatpush1.bf16.msra.mxu1 %v5705_v6  ;;  %6909 = vst [vmem:[#allocation48_spill] sm:$0xff] %v5732_v44  ;;  %3227 = vmatprep.subr.bf16.mxu0 %v5718_v3  ;;  %v215_v6 = vld [vmem:[%s6745_s4 + $0x388] sm:$0xff]  ;;  %v218_v59 = vld [vmem:[%s6745_s4 + $0x3a0] sm:$0xff]  ;;  %v5765_v3 = vpack.c.bf16 %v221_v13, %v217_v1 }
  0x58   :  { %6910 = vst [vmem:[#allocation49_spill] sm:$0xff] %v5741_v40  ;;  %3291 = vmatprep.subr.bf16.mxu1 %v5730_v39  ;;  %v5753_v12 = vpack.c.bf16 %v219_v38, %v215_v6  ;;  %v5767_v28 = vpack.c.bf16 %v218_v59, %v214_v32  ;;  %v216_v6 = vld [vmem:[%s6745_s4 + $0x390] sm:$0xff]  ;;  %v223_v39 = vld [vmem:[%s6745_s4 + $0x3c8] sm:$0xff]  ;;  %v225_v32 = vld [vmem:[%s6745_s4 + $0x3d8] sm:$0xff] }
  0x59   :  { %6912 = vst [vmem:[#allocation51_spill] sm:$0xff] %v5765_v3  ;;  %v220_v38 = vld [vmem:[%s6745_s4 + $0x3b0] sm:$0xff]  ;;  %v227_v13 = vld [vmem:[%s6745_s4 + $0x3e8] sm:$0xff]  ;;  %v229_v59 = vld [vmem:[%s6745_s4 + $0x3f8] sm:$0xff] }
  0x5a   :  { %6911 = vst [vmem:[#allocation50_spill] sm:$0xff] %v5753_v12  ;;  %3229 = vmatpush1.bf16.msra.mxu0 %v5732_v44  ;;  %6913 = vst [vmem:[#allocation52_spill] sm:$0xff] %v5767_v28  ;;  %v5780_v1 = vpack.c.bf16 %v220_v38, %v216_v6  ;;  %v5792_v44 = vpack.c.bf16 %v227_v13, %v223_v39  ;;  %v222_v6 = vld [vmem:[%s6745_s4 + $0x3c0] sm:$0xff]  ;;  %v31_v39 = vld [vmem:[%s6746_s1 + $0x8] sm:$0xff] }
  0x5b   :  { %3293 = vmatpush1.bf16.msra.mxu1 %v5741_v40  ;;  %3231 = vmatprep.subr.bf16.mxu0 %v5753_v12  ;;  %v5794_v40 = vpack.c.bf16 %v229_v59, %v225_v32  ;;  %v226_v38 = vld [vmem:[%s6745_s4 + $0x3e0] sm:$0xff]  ;;  %v224_v12 = vld [vmem:[%s6745_s4 + $0x3d0] sm:$0xff] }
  0x5c   :  { %6914 = vst [vmem:[#allocation53_spill] sm:$0xff] %v5780_v1  ;;  %3295 = vmatprep.subr.bf16.mxu1 %v5765_v3  ;;  %6915 = vst [vmem:[#allocation54_spill] sm:$0xff] %v5792_v44  ;;  %v228_v3 = vld [vmem:[%s6745_s4 + $0x3f0] sm:$0xff]  ;;  %v5812_v13 = vpack.c.bf16 %v226_v38, %v222_v6  ;;  %496 = vmatprep.mubr.f32.mxu0 %v31_v39  ;;  %v258_v59 = vld [vmem:[%s6747_s0] sm:$0xff] }
  0x5d   :  { %6916 = vst [vmem:[#allocation55_spill] sm:$0xff] %v5794_v40  ;;  %v5816_v32 = vpack.c.bf16 %v228_v3, %v224_v12  ;;  %567 = vmatprep.mubr.f32.mxu1 %v31_v39  ;;  %v259_v3 = vld [vmem:[%s6747_s0 + $0x8] sm:$0xff] }
  0x5e   :  { %3233 = vmatpush1.bf16.msra.mxu0 %v5767_v28  ;;  %6917 = vst [vmem:[#allocation56_spill] sm:$0xff] %v5812_v13 }
  0x5f   :  { %3297 = vmatpush1.bf16.msra.mxu1 %v5780_v1  ;;  %3235 = vmatprep.subr.bf16.mxu0 %v5792_v44  ;;  %6918 = vst [vmem:[#allocation57_spill] sm:$0xff] %v5816_v32  ;;  %v260_v1 = vld [vmem:[%s6747_s0 + $0x10] sm:$0xff] }
  0x60   :  { %3299 = vmatprep.subr.bf16.mxu1 %v5794_v40 }
  0x62   :  { %3237 = vmatpush1.bf16.msra.mxu0 %v5812_v13 }
  0x63   :  { %3301 = vmatpush1.bf16.msra.mxu1 %v5816_v32  ;;  %3303 = vmatprep.subr.bf16.mxu0 %v4960_v4  ;;  %v261_v4 = vld [vmem:[%s6747_s0 + $0x18] sm:$0xff] }
  0x64   :  { %3335 = vmatprep.subr.bf16.mxu1 %v5012_v22 }
  0xf8   :  { %v328_v12 = vpop.f32.mrb[0].mxu0 }
  0xf9   :  { %v404_v6 = vadd.f32 %v328_v12, %v258_v59  ;;  %v330_v38 = vpop.f32.mrb[1].mxu0  ;;  %v399_v22 = vpop.f32.mrb[0].mxu1 }
  0xfa   :  { %v405_v39 = vadd.f32 %v330_v38, %v259_v3  ;;  %v401_v32 = vpop.f32.mrb[1].mxu1  ;;  %v406_v5 = vadd.f32 %v399_v22, %v260_v1 }
  0xfb   :  { %v3027_v40 = vmul.f32 -1.442695, %v404_v6  ;;  %v407_v44 = vadd.f32 %v401_v32, %v261_v4  ;;  %v34_v4 = vld [vmem:[%s6748_s2] sm:$0xff] }
  0xfc   :  { %v3028_v13 = vmul.f32 -1.442695, %v405_v39 }
  0xfd   :  { %4647 = vpow2.f32 %v3027_v40  ;;  %v3029_v28 = vmul.f32 -1.442695, %v407_v44 }
  0xfe   :  { %4649 = vpow2.f32 %v3028_v13 }
  0xff   :  { %4651 = vpow2.f32 %v3029_v28 }
 0x100   :  { %4653 = vtanh.f32 %v406_v5 }
 0x107   :  { %v4648_v59 = vpop.eup %4647 }
 0x108   :  { %v4650_v3 = vpop.eup %4649  ;;  %v411_v12 = vadd.f32 1.0, %v4648_v59  ;;  %v6919_v59 = vmov 0.0  }
 0x109   :  { %v417_v6 = vadd.f32 1.0, %v4650_v3  ;;  %v4652_v38 = vpop.eup %4651  ;;  %v6921_v3 = vld [vmem:[#allocation13_spill] sm:$0xff] }
 0x10a   :  { %4655 = vrcp.f32 %v411_v12  ;;  %v4654_v40 = vpop.eup %4653  ;;  %v424_v32 = vadd.f32 1.0, %v4652_v38  ;;  %v6922_v12 = vld [vmem:[#allocation14_spill] sm:$0xff]  ;;  %v6924_v38 = vld [vmem:[#allocation16_spill] sm:$0xff] }
 0x10b   :  { %4657 = vrcp.f32 %v417_v6  ;;  %v6923_v6 = vld [vmem:[#allocation15_spill] sm:$0xff] }
 0x10c   :  { %4659 = vrcp.f32 %v424_v32  ;;  %v6928_v32 = vld [vmem:[#allocation20_spill] sm:$0xff] }
 0x114   :  { %v4656_v13 = vpop.eup %4655 }
 0x115   :  { %v4658_v39 = vpop.eup %4657  ;;  %v428_v49 = vmul.f32 %v4656_v13, %v4654_v40  ;;  %v6925_v40 = vld [vmem:[#allocation17_spill] sm:$0xff]  ;;  %v6927_v13 = vld [vmem:[#allocation19_spill] sm:$0xff] }
 0x116   :  { %v427_v44 = vmul.f32 %v4658_v39, %v34_v4  ;;  %v4660_v5 = vpop.eup %4659  ;;  %v6926_v4 = vld [vmem:[#allocation18_spill] sm:$0xff]  ;;  %v6929_v39 = vld [vmem:[#allocation21_spill] sm:$0xff] }
 0x118   :  { %v5838_v22 = vadd.f32 %v428_v49, %v427_v44  ;;  %v6920_v49 = vld [vmem:[#allocation10_spill] sm:$0xff] }
 0x119   :  { %v6930_v44 = vld [vmem:[#allocation22_spill] sm:$0xff] }
 0x11a   :  { %4661 = vtanh.f32 %v5838_v22 }
 0x124   :  { %v4662_v28 = vpop.eup %4661 }
 0x125   :  { %v431_v1 = vmul.f32 %v4662_v28, %v4660_v5  ;;  %v6931_v5 = vld [vmem:[#allocation23_spill] sm:$0xff]  ;;  %v6932_v28 = vld [vmem:[#allocation24_spill] sm:$0xff] }
 0x127   :  { %497 = vmatmul.mubr.f32.vlgmr.msra.gmra.mrb[2].mxu0 %v431_v1  ;;  %568 = vmatmul.mubr.f32.vlgmr.msra.gmra.mrb[2].mxu1 %v431_v1 }
 0x128   :  { %3305 = vmatpush1.bf16.msra.mxu0 %v4971_v8  ;;  %3337 = vmatpush1.bf16.msra.mxu1 %v5020_v25 }
 0x129   :  { %3307 = vmatprep.subr.bf16.mxu0 %v4973_v9  ;;  %3339 = vmatprep.subr.bf16.mxu1 %v5045_v33 }
 0x12a   :  { %668 = vmatprep.mubr.f32.mxu0 %v6919_v59  ;;  %739 = vmatprep.mubr.f32.mxu1 %v6919_v59 }
 0x12c   :  { %3309 = vmatpush1.bf16.msra.mxu0 %v4989_v14  ;;  %3341 = vmatpush1.bf16.msra.mxu1 %v5056_v37 }
 0x12d   :  { %3311 = vmatprep.subr.bf16.mxu0 %v4998_v17  ;;  %3343 = vmatprep.subr.bf16.mxu1 %v5080_v45 }
 0x130   :  { %3313 = vmatpush1.bf16.msra.mxu0 %v5023_v26  ;;  %3345 = vmatpush1.bf16.msra.mxu1 %v5089_v48 }
 0x131   :  { %3315 = vmatprep.subr.bf16.mxu0 %v5036_v30  ;;  %3347 = vmatprep.subr.bf16.mxu1 %v5101_v52 }
 0x134   :  { %3317 = vmatpush1.bf16.msra.mxu0 %v5072_v42  ;;  %3349 = vmatpush1.bf16.msra.mxu1 %v5131_v62 }
 0x135   :  { %3319 = vmatprep.subr.bf16.mxu0 %v5083_v46  ;;  %3351 = vmatprep.subr.bf16.mxu1 %v5137_v0 }
 0x138   :  { %3321 = vmatpush1.bf16.msra.mxu0 %v5110_v55  ;;  %3353 = vmatpush1.bf16.msra.mxu1 %v5167_v15 }
 0x139   :  { %3323 = vmatprep.subr.bf16.mxu0 %v5119_v58  ;;  %3355 = vmatprep.subr.bf16.mxu1 %v5173_v18 }
 0x13c   :  { %3325 = vmatpush1.bf16.msra.mxu0 %v5152_v7  ;;  %3357 = vmatpush1.bf16.msra.mxu1 %v5200_v31 }
 0x13d   :  { %3327 = vmatprep.subr.bf16.mxu0 %v5155_v10  ;;  %3359 = vmatprep.subr.bf16.mxu1 %v5206_v34 }
 0x140   :  { %3329 = vmatpush1.bf16.msra.mxu0 %v5188_v24  ;;  %3361 = vmatpush1.bf16.msra.mxu1 %v5228_v43 }
 0x141   :  { %3331 = vmatprep.subr.bf16.mxu0 %v5191_v27  ;;  %3363 = vmatprep.subr.bf16.mxu1 %v5242_v51 }
 0x144   :  { %3333 = vmatpush1.bf16.msra.mxu0 %v5224_v41  ;;  %3365 = vmatpush1.bf16.msra.mxu1 %v5266_v63 }
 0x145   :  { %3367 = vmatprep.subr.bf16.mxu0 %v5233_v47  ;;  %3431 = vmatprep.subr.bf16.mxu1 %v5281_v11 }
 0x147   :  { %669 = vmatmul.mubr.f32.vlgmr.msra.gmra.mrb[4].mxu0 %v431_v1  ;;  %740 = vmatmul.mubr.f32.vlgmr.msra.gmra.mrb[4].mxu1 %v431_v1  ;;  %v6933_v1 = vld [vmem:[#allocation25_spill] sm:$0xff] }
 0x148   :  { %3369 = vmatpush1.bf16.msra.mxu0 %v5263_v61  ;;  %3433 = vmatpush1.bf16.msra.mxu1 %v5302_v23 }
 0x149   :  { %3371 = vmatprep.subr.bf16.mxu0 %v5272_v2  ;;  %3435 = vmatprep.subr.bf16.mxu1 %v5317_v36 }
 0x14c   :  { %3373 = vmatpush1.bf16.msra.mxu0 %v5299_v21  ;;  %3437 = vmatpush1.bf16.msra.mxu1 %v5338_v53 }
 0x14d   :  { %3375 = vmatprep.subr.bf16.mxu0 %v5308_v29  ;;  %3439 = vmatprep.subr.bf16.mxu1 %v5353_v60 }
 0x150   :  { %3377 = vmatpush1.bf16.msra.mxu0 %v5335_v50  ;;  %3441 = vmatpush1.bf16.msra.mxu1 %v5374_v19 }
 0x151   :  { %3379 = vmatprep.subr.bf16.mxu0 %v5344_v56  ;;  %3443 = vmatprep.subr.bf16.mxu1 %v5386_v35 }
 0x154   :  { %3381 = vmatpush1.bf16.msra.mxu0 %v5371_v16  ;;  %3445 = vmatpush1.bf16.msra.mxu1 %v5404_v54 }
 0x155   :  { %3383 = vmatprep.subr.bf16.mxu0 %v5377_v20  ;;  %3447 = vmatprep.subr.bf16.mxu1 %v5408_v57 }
 0x158   :  { %3385 = vmatpush1.bf16.msra.mxu0 %v6920_v49  ;;  %3449 = vmatpush1.bf16.msra.mxu1 %v6921_v3 }
 0x159   :  { %3387 = vmatprep.subr.bf16.mxu0 %v6922_v12  ;;  %3451 = vmatprep.subr.bf16.mxu1 %v6923_v6  ;;  %v6934_v6 = vld [vmem:[#allocation26_spill] sm:$0xff] }
 0x15c   :  { %3389 = vmatpush1.bf16.msra.mxu0 %v6924_v38  ;;  %3453 = vmatpush1.bf16.msra.mxu1 %v6925_v40  ;;  %v6935_v38 = vld [vmem:[#allocation27_spill] sm:$0xff]  ;;  %v6936_v40 = vld [vmem:[#allocation28_spill] sm:$0xff] }
 0x15d   :  { %3391 = vmatprep.subr.bf16.mxu0 %v6926_v4  ;;  %3455 = vmatprep.subr.bf16.mxu1 %v6927_v13  ;;  %v6937_v4 = vld [vmem:[#allocation29_spill] sm:$0xff]  ;;  %v6938_v13 = vld [vmem:[#allocation30_spill] sm:$0xff] }
 0x160   :  { %3393 = vmatpush1.bf16.msra.mxu0 %v6928_v32  ;;  %3457 = vmatpush1.bf16.msra.mxu1 %v6929_v39  ;;  %v6939_v32 = vld [vmem:[#allocation31_spill] sm:$0xff]  ;;  %v6940_v39 = vld [vmem:[#allocation32_spill] sm:$0xff] }
 0x161   :  { %3395 = vmatprep.subr.bf16.mxu0 %v6930_v44  ;;  %3459 = vmatprep.subr.bf16.mxu1 %v6931_v5  ;;  %v6941_v44 = vld [vmem:[#allocation33_spill] sm:$0xff]  ;;  %v6942_v5 = vld [vmem:[#allocation34_spill] sm:$0xff] }
 0x164   :  { %3397 = vmatpush1.bf16.msra.mxu0 %v6932_v28  ;;  %3461 = vmatpush1.bf16.msra.mxu1 %v6933_v1  ;;  %v6943_v28 = vld [vmem:[#allocation35_spill] sm:$0xff]  ;;  %v6944_v1 = vld [vmem:[#allocation36_spill] sm:$0xff] }
 0x165   :  { %3399 = vmatprep.subr.bf16.mxu0 %v6934_v6  ;;  %3463 = vmatprep.subr.bf16.mxu1 %v6935_v38  ;;  %v6945_v6 = vld [vmem:[#allocation37_spill] sm:$0xff]  ;;  %v6946_v38 = vld [vmem:[#allocation38_spill] sm:$0xff] }
 0x168   :  { %3401 = vmatpush1.bf16.msra.mxu0 %v6936_v40  ;;  %3465 = vmatpush1.bf16.msra.mxu1 %v6937_v4  ;;  %v6947_v40 = vld [vmem:[#allocation39_spill] sm:$0xff]  ;;  %v6948_v4 = vld [vmem:[#allocation40_spill] sm:$0xff] }
 0x169   :  { %3403 = vmatprep.subr.bf16.mxu0 %v6938_v13  ;;  %3467 = vmatprep.subr.bf16.mxu1 %v6939_v32  ;;  %v6949_v13 = vld [vmem:[#allocation41_spill] sm:$0xff]  ;;  %v6950_v32 = vld [vmem:[#allocation42_spill] sm:$0xff] }
 0x16c   :  { %3405 = vmatpush1.bf16.msra.mxu0 %v6940_v39  ;;  %3469 = vmatpush1.bf16.msra.mxu1 %v6941_v44  ;;  %v6951_v39 = vld [vmem:[#allocation43_spill] sm:$0xff]  ;;  %v6952_v44 = vld [vmem:[#allocation44_spill] sm:$0xff] }
 0x16d   :  { %3407 = vmatprep.subr.bf16.mxu0 %v6942_v5  ;;  %3471 = vmatprep.subr.bf16.mxu1 %v6943_v28  ;;  %v6953_v5 = vld [vmem:[#allocation45_spill] sm:$0xff]  ;;  %v6954_v28 = vld [vmem:[#allocation46_spill] sm:$0xff] }
 0x170   :  { %3409 = vmatpush1.bf16.msra.mxu0 %v6944_v1  ;;  %3473 = vmatpush1.bf16.msra.mxu1 %v6945_v6  ;;  %v6955_v1 = vld [vmem:[#allocation47_spill] sm:$0xff]  ;;  %v6956_v6 = vld [vmem:[#allocation48_spill] sm:$0xff] }
 0x171   :  { %3411 = vmatprep.subr.bf16.mxu0 %v6946_v38  ;;  %3475 = vmatprep.subr.bf16.mxu1 %v6947_v40  ;;  %v6957_v38 = vld [vmem:[#allocation49_spill] sm:$0xff]  ;;  %v6958_v40 = vld [vmem:[#allocation50_spill] sm:$0xff] }
 0x174   :  { %3413 = vmatpush1.bf16.msra.mxu0 %v6948_v4  ;;  %3477 = vmatpush1.bf16.msra.mxu1 %v6949_v13  ;;  %v6959_v4 = vld [vmem:[#allocation51_spill] sm:$0xff]  ;;  %v6960_v13 = vld [vmem:[#allocation52_spill] sm:$0xff] }
 0x175   :  { %3415 = vmatprep.subr.bf16.mxu0 %v6950_v32  ;;  %3479 = vmatprep.subr.bf16.mxu1 %v6951_v39  ;;  %v6961_v32 = vld [vmem:[#allocation53_spill] sm:$0xff]  ;;  %v6962_v39 = vld [vmem:[#allocation54_spill] sm:$0xff] }
 0x178   :  { %3417 = vmatpush1.bf16.msra.mxu0 %v6952_v44  ;;  %3481 = vmatpush1.bf16.msra.mxu1 %v6953_v5  ;;  %v6963_v44 = vld [vmem:[#allocation55_spill] sm:$0xff]  ;;  %v6964_v5 = vld [vmem:[#allocation56_spill] sm:$0xff] }
 0x179   :  { %3419 = vmatprep.subr.bf16.mxu0 %v6954_v28  ;;  %3483 = vmatprep.subr.bf16.mxu1 %v6955_v1  ;;  %v6965_v28 = vld [vmem:[#allocation57_spill] sm:$0xff]  ;;  %v6966_v1 = vld [vmem:[#allocation4_spill] sm:$0xff] }
 0x17c   :  { %3421 = vmatpush1.bf16.msra.mxu0 %v6956_v6  ;;  %3485 = vmatpush1.bf16.msra.mxu1 %v6957_v38  ;;  %v6967_v6 = vld [vmem:[#allocation5_spill] sm:$0xff]  ;;  %v232_v38 = vlaneseq }
 0x17d   :  { %3423 = vmatprep.subr.bf16.mxu0 %v6958_v40  ;;  %3487 = vmatprep.subr.bf16.mxu1 %v6959_v4 }
 0x17e   :  { %v233_v40 = vshrl.u32 %v232_v38, 7 }
 0x180   :  { %3425 = vmatpush1.bf16.msra.mxu0 %v6960_v13  ;;  %3489 = vmatpush1.bf16.msra.mxu1 %v6961_v32  ;;  %v234_v12 = vsub.s32 0, %v233_v40  ;;  %v230_v13 = vld [vmem:[%s6749_s5] sm:$0xf]  ;;  %v238_v32 = vsub.s32 1, %v233_v40  ;;  %v246_v3 = vsub.s32 3, %v233_v40  ;;  %v242_v54 = vsub.s32 2, %v233_v40 }
 0x181   :  { %3427 = vmatprep.subr.bf16.mxu0 %v6962_v39  ;;  %3491 = vmatprep.subr.bf16.mxu1 %v6963_v44 }
 0x182   :  { %v5942_v4 = vrot.slane %v230_v13, %v234_v12  ;;  %v5944_v39 = vrot.slane %v230_v13, %v238_v32  ;;  %v5948_v20 = vrot.slane %v230_v13, %v246_v3  ;;  %v5951_v32 = vrot.slane %v230_v13, %v242_v54 }
 0x184   :  { %3429 = vmatpush1.bf16.msra.mxu0 %v6964_v5  ;;  %3493 = vmatpush1.bf16.msra.mxu1 %v6965_v28  ;;  %6968 = vst [vmem:[#allocation58_spill] sm:$0xff] %v5942_v4 }
 0x185   :  { %3495 = vmatprep.subr.bf16.mxu0 %v6966_v1  ;;  %3527 = vmatprep.subr.bf16.mxu1 %v6967_v6 }
 0x1fa   :  { %v498_v44 = vpop.f32.mrb[2].mxu0  ;;  %v569_v5 = vpop.f32.mrb[2].mxu1 }
 0x1fb   :  { %v499_v28 = vadd.f32 %v498_v44, %v5942_v4  ;;  %v500_v1 = vpop.f32.mrb[3].mxu0  ;;  %v571_v49 = vpop.f32.mrb[3].mxu1  ;;  %v570_v35 = vadd.f32 %v569_v5, %v5951_v32 }
 0x1fc   :  { %v501_v6 = vadd.f32 %v500_v1, %v5944_v39  ;;  %v572_v12 = vadd.f32 %v571_v49, %v5948_v20 }
 0x1fd   :  { %v3030_v38 = vmul.f32 -1.442695, %v499_v28 }
 0x1fe   :  { %v3031_v57 = vmul.f32 -1.442695, %v501_v6  ;;  %v3032_v16 = vmul.f32 -1.442695, %v572_v12 }
 0x1ff   :  { %4663 = vpow2.f32 %v3030_v38 }
 0x200   :  { %4665 = vpow2.f32 %v3031_v57  ;;  %v35_v57 = vld [vmem:[%s6748_s2 + $0x8] sm:$0xff] }
 0x201   :  { %4667 = vpow2.f32 %v3032_v16  ;;  %v3034_v16 = vld [vmem:[%s6747_s0 + $0x28] sm:$0xff] }
 0x202   :  { %4669 = vtanh.f32 %v570_v35 }
 0x209   :  { %v4664_v56 = vpop.eup %4663 }
 0x20a   :  { %v4666_v44 = vpop.eup %4665  ;;  %v577_v4 = vadd.f32 1.0, %v4664_v56  ;;  %v3033_v56 = vld [vmem:[%s6747_s0 + $0x20] sm:$0xff] }
 0x20b   :  { %v583_v1 = vadd.f32 1.0, %v4666_v44  ;;  %v4668_v3 = vpop.eup %4667 }
 0x20c   :  { %4671 = vrcp.f32 %v577_v4  ;;  %v4670_v6 = vpop.eup %4669  ;;  %v590_v13 = vadd.f32 1.0, %v4668_v3 }
 0x20d   :  { %4673 = vrcp.f32 %v583_v1 }
 0x20e   :  { %4675 = vrcp.f32 %v590_v13 }
 0x216   :  { %v4672_v49 = vpop.eup %4671 }
 0x217   :  { %v4674_v54 = vpop.eup %4673  ;;  %v594_v40 = vmul.f32 %v4672_v49, %v4670_v6 }
 0x218   :  { %v593_v28 = vmul.f32 %v4674_v54, %v35_v57  ;;  %v3036_v57 = vld [vmem:[%s6747_s0 + $0x38] sm:$0xff]  ;;  %v3035_v54 = vld [vmem:[%s6747_s0 + $0x30] sm:$0xff] }
 0x21a   :  { %v670_v35 = vpop.f32.mrb[4].mxu0  ;;  %v741_v4 = vpop.f32.mrb[4].mxu1  ;;  %v5963_v5 = vadd.f32 %v594_v40, %v593_v28 }
 0x21b   :  { %v746_v38 = vadd.f32 %v3033_v56, %v670_v35  ;;  %v672_v12 = vpop.f32.mrb[5].mxu0  ;;  %v743_v44 = vpop.f32.mrb[5].mxu1  ;;  %v748_v56 = vadd.f32 %v3035_v54, %v741_v4 }
 0x21c   :  { %v747_v1 = vadd.f32 %v3034_v16, %v672_v12  ;;  %4677 = vtanh.f32 %v5963_v5  ;;  %v749_v49 = vadd.f32 %v3036_v57, %v743_v44  ;;  %v4676_v40 = vpop.eup %4675 }
 0x21d   :  { %v3037_v3 = vmul.f32 -1.442695, %v746_v38 }
 0x21e   :  { %v3038_v6 = vmul.f32 -1.442695, %v747_v1  ;;  %v3039_v28 = vmul.f32 -1.442695, %v749_v49 }
 0x21f   :  { %4679 = vpow2.f32 %v3037_v3 }
 0x220   :  { %4681 = vpow2.f32 %v3038_v6 }
 0x221   :  { %4683 = vpow2.f32 %v3039_v28 }
 0x222   :  { %4685 = vtanh.f32 %v748_v56  ;;  %v6970_v56 = vld [vmem:[#allocation9_spill] sm:$0xff] }
 0x226   :  { %v4678_v13 = vpop.eup %4677 }
 0x227   :  { %v597_v16 = vmul.f32 %v4678_v13, %v4676_v40 }
 0x229   :  { %v4680_v35 = vpop.eup %4679  ;;  %598 = vst [vmem:[%s6750_s6] sm:$0xff] %v597_v16  ;;  %838 = vmatprep.mubr.f32.mxu0 %v597_v16  ;;  %909 = vmatprep.mubr.f32.mxu1 %v597_v16 }
 0x22a   :  { %v4682_v38 = vpop.eup %4681  ;;  %v753_v12 = vadd.f32 1.0, %v4680_v35  ;;  %v6971_v35 = vld [vmem:[#allocation7_spill] sm:$0xff] }
 0x22b   :  { %v759_v44 = vadd.f32 1.0, %v4682_v38  ;;  %v4684_v1 = vpop.eup %4683  ;;  %v6972_v38 = vld [vmem:[#allocation11_spill] sm:$0xff] }
 0x22c   :  { %4687 = vrcp.f32 %v753_v12  ;;  %v4686_v3 = vpop.eup %4685  ;;  %v766_v49 = vadd.f32 1.0, %v4684_v1  ;;  %v6973_v12 = vld [vmem:[#allocation8_spill] sm:$0xff]  ;;  %v6975_v1 = vld [vmem:[#allocation10_spill] sm:$0xff] }
 0x22d   :  { %4689 = vrcp.f32 %v759_v44  ;;  %v6974_v44 = vld [vmem:[#allocation12_spill] sm:$0xff] }
 0x22e   :  { %4691 = vrcp.f32 %v766_v49  ;;  %v6980_v49 = vld [vmem:[#allocation17_spill] sm:$0xff] }
 0x236   :  { %v4688_v6 = vpop.eup %4687 }
 0x237   :  { %v4690_v57 = vpop.eup %4689  ;;  %v770_v4 = vmul.f32 %v4688_v6, %v4686_v3  ;;  %v6976_v3 = vld [vmem:[#allocation13_spill] sm:$0xff]  ;;  %v6977_v6 = vld [vmem:[#allocation14_spill] sm:$0xff] }
 0x238   :  { %v769_v54 = vmul.f32 %v4690_v57, %v5838_v22  ;;  %v4692_v13 = vpop.eup %4691  ;;  %v6969_v22 = vld [vmem:[#allocation6_spill] sm:$0xff]  ;;  %v6978_v57 = vld [vmem:[#allocation15_spill] sm:$0xff] }
 0x23a   :  { %v5976_v40 = vadd.f32 %v770_v4, %v769_v54  ;;  %v6979_v4 = vld [vmem:[#allocation16_spill] sm:$0xff]  ;;  %v6981_v54 = vld [vmem:[#allocation18_spill] sm:$0xff] }
 0x23c   :  { %4693 = vtanh.f32 %v5976_v40 }
 0x246   :  { %v4694_v16 = vpop.eup %4693 }
 0x247   :  { %v773_v28 = vmul.f32 %v4694_v16, %v4692_v13  ;;  %v6982_v13 = vld [vmem:[#allocation19_spill] sm:$0xff]  ;;  %v6983_v16 = vld [vmem:[#allocation20_spill] sm:$0xff] }
 0x249   :  { %839 = vmatmul.mubr.f32.vlgmr.msra.gmra.mrb[6].mxu0 %v773_v28  ;;  %910 = vmatmul.mubr.f32.vlgmr.msra.gmra.mrb[6].mxu1 %v773_v28 }
 0x24a   :  { %3497 = vmatpush1.bf16.msra.mxu0 %v4971_v8  ;;  %3529 = vmatpush1.bf16.msra.mxu1 %v5020_v25 }
 0x24b   :  { %3499 = vmatprep.subr.bf16.mxu0 %v4973_v9  ;;  %3531 = vmatprep.subr.bf16.mxu1 %v5045_v33 }
 0x24c   :  { %1011 = vmatprep.mubr.f32.mxu0 %v6919_v59  ;;  %1082 = vmatprep.mubr.f32.mxu1 %v6919_v59 }
 0x24e   :  { %3501 = vmatpush1.bf16.msra.mxu0 %v4989_v14  ;;  %3533 = vmatpush1.bf16.msra.mxu1 %v5056_v37 }
 0x24f   :  { %3503 = vmatprep.subr.bf16.mxu0 %v4998_v17  ;;  %3535 = vmatprep.subr.bf16.mxu1 %v5080_v45 }
 0x252   :  { %3505 = vmatpush1.bf16.msra.mxu0 %v5023_v26  ;;  %3537 = vmatpush1.bf16.msra.mxu1 %v5089_v48 }
 0x253   :  { %3507 = vmatprep.subr.bf16.mxu0 %v5036_v30  ;;  %3539 = vmatprep.subr.bf16.mxu1 %v5101_v52 }
 0x256   :  { %3509 = vmatpush1.bf16.msra.mxu0 %v5072_v42  ;;  %3541 = vmatpush1.bf16.msra.mxu1 %v5131_v62 }
 0x257   :  { %3511 = vmatprep.subr.bf16.mxu0 %v5083_v46  ;;  %3543 = vmatprep.subr.bf16.mxu1 %v5137_v0 }
 0x25a   :  { %3513 = vmatpush1.bf16.msra.mxu0 %v5110_v55  ;;  %3545 = vmatpush1.bf16.msra.mxu1 %v5167_v15 }
 0x25b   :  { %3515 = vmatprep.subr.bf16.mxu0 %v5119_v58  ;;  %3547 = vmatprep.subr.bf16.mxu1 %v5173_v18 }
 0x25e   :  { %3517 = vmatpush1.bf16.msra.mxu0 %v5152_v7  ;;  %3549 = vmatpush1.bf16.msra.mxu1 %v5200_v31 }
 0x25f   :  { %3519 = vmatprep.subr.bf16.mxu0 %v5155_v10  ;;  %3551 = vmatprep.subr.bf16.mxu1 %v5206_v34 }
 0x262   :  { %3521 = vmatpush1.bf16.msra.mxu0 %v5188_v24  ;;  %3553 = vmatpush1.bf16.msra.mxu1 %v5228_v43 }
 0x263   :  { %3523 = vmatprep.subr.bf16.mxu0 %v5191_v27  ;;  %3555 = vmatprep.subr.bf16.mxu1 %v5242_v51 }
 0x266   :  { %3525 = vmatpush1.bf16.msra.mxu0 %v5224_v41  ;;  %3557 = vmatpush1.bf16.msra.mxu1 %v5266_v63 }
 0x267   :  { %3559 = vmatprep.subr.bf16.mxu0 %v5233_v47  ;;  %3623 = vmatprep.subr.bf16.mxu1 %v5281_v11 }
 0x269   :  { %1012 = vmatmul.mubr.f32.vlgmr.msra.gmra.mrb[8].mxu0 %v773_v28  ;;  %1083 = vmatmul.mubr.f32.vlgmr.msra.gmra.mrb[8].mxu1 %v773_v28  ;;  %v6984_v28 = vld [vmem:[#allocation21_spill] sm:$0xff] }
 0x26a   :  { %3561 = vmatpush1.bf16.msra.mxu0 %v5263_v61  ;;  %3625 = vmatpush1.bf16.msra.mxu1 %v5302_v23 }
 0x26b   :  { %3563 = vmatprep.subr.bf16.mxu0 %v5272_v2  ;;  %3627 = vmatprep.subr.bf16.mxu1 %v5317_v36 }
 0x26e   :  { %3565 = vmatpush1.bf16.msra.mxu0 %v5299_v21  ;;  %3629 = vmatpush1.bf16.msra.mxu1 %v5338_v53 }
 0x26f   :  { %3567 = vmatprep.subr.bf16.mxu0 %v5308_v29  ;;  %3631 = vmatprep.subr.bf16.mxu1 %v5353_v60 }
 0x272   :  { %3569 = vmatpush1.bf16.msra.mxu0 %v5335_v50  ;;  %3633 = vmatpush1.bf16.msra.mxu1 %v5374_v19 }
 0x273   :  { %3571 = vmatprep.subr.bf16.mxu0 %v6969_v22  ;;  %3635 = vmatprep.subr.bf16.mxu1 %v6970_v56 }
 0x276   :  { %3573 = vmatpush1.bf16.msra.mxu0 %v6971_v35  ;;  %3637 = vmatpush1.bf16.msra.mxu1 %v6972_v38 }
 0x277   :  { %3575 = vmatprep.subr.bf16.mxu0 %v6973_v12  ;;  %3639 = vmatprep.subr.bf16.mxu1 %v6974_v44  ;;  %v6985_v44 = vld [vmem:[#allocation22_spill] sm:$0xff] }
 0x278   :  { %v7023_v12 = vld [vmem:[#allocation58_spill] sm:$0xff] }
 0x27a   :  { %3577 = vmatpush1.bf16.msra.mxu0 %v6975_v1  ;;  %3641 = vmatpush1.bf16.msra.mxu1 %v6976_v3  ;;  %v6986_v1 = vld [vmem:[#allocation23_spill] sm:$0xff]  ;;  %v6987_v3 = vld [vmem:[#allocation24_spill] sm:$0xff] }
 0x27b   :  { %3579 = vmatprep.subr.bf16.mxu0 %v6977_v6  ;;  %3643 = vmatprep.subr.bf16.mxu1 %v6978_v57  ;;  %v6988_v6 = vld [vmem:[#allocation25_spill] sm:$0xff]  ;;  %v6989_v57 = vld [vmem:[#allocation26_spill] sm:$0xff] }
 0x27e   :  { %3581 = vmatpush1.bf16.msra.mxu0 %v6979_v4  ;;  %3645 = vmatpush1.bf16.msra.mxu1 %v6980_v49  ;;  %v6990_v4 = vld [vmem:[#allocation27_spill] sm:$0xff]  ;;  %v6991_v49 = vld [vmem:[#allocation28_spill] sm:$0xff] }
 0x27f   :  { %3583 = vmatprep.subr.bf16.mxu0 %v6981_v54  ;;  %3647 = vmatprep.subr.bf16.mxu1 %v6982_v13  ;;  %v6992_v54 = vld [vmem:[#allocation29_spill] sm:$0xff]  ;;  %v6993_v13 = vld [vmem:[#allocation30_spill] sm:$0xff] }
 0x282   :  { %3585 = vmatpush1.bf16.msra.mxu0 %v6983_v16  ;;  %3649 = vmatpush1.bf16.msra.mxu1 %v6984_v28  ;;  %v6994_v16 = vld [vmem:[#allocation31_spill] sm:$0xff]  ;;  %v6995_v28 = vld [vmem:[#allocation32_spill] sm:$0xff] }
 0x283   :  { %3587 = vmatprep.subr.bf16.mxu0 %v6985_v44  ;;  %3651 = vmatprep.subr.bf16.mxu1 %v6986_v1  ;;  %v6996_v44 = vld [vmem:[#allocation33_spill] sm:$0xff]  ;;  %v6997_v1 = vld [vmem:[#allocation34_spill] sm:$0xff] }
 0x286   :  { %3589 = vmatpush1.bf16.msra.mxu0 %v6987_v3  ;;  %3653 = vmatpush1.bf16.msra.mxu1 %v6988_v6  ;;  %v6998_v3 = vld [vmem:[#allocation35_spill] sm:$0xff]  ;;  %v6999_v6 = vld [vmem:[#allocation36_spill] sm:$0xff] }
 0x287   :  { %3591 = vmatprep.subr.bf16.mxu0 %v6989_v57  ;;  %3655 = vmatprep.subr.bf16.mxu1 %v6990_v4  ;;  %v7000_v57 = vld [vmem:[#allocation37_spill] sm:$0xff]  ;;  %v7001_v4 = vld [vmem:[#allocation38_spill] sm:$0xff] }
 0x28a   :  { %3593 = vmatpush1.bf16.msra.mxu0 %v6991_v49  ;;  %3657 = vmatpush1.bf16.msra.mxu1 %v6992_v54  ;;  %v7002_v49 = vld [vmem:[#allocation39_spill] sm:$0xff]  ;;  %v7003_v54 = vld [vmem:[#allocation40_spill] sm:$0xff] }
 0x28b   :  { %3595 = vmatprep.subr.bf16.mxu0 %v6993_v13  ;;  %3659 = vmatprep.subr.bf16.mxu1 %v6994_v16  ;;  %v7004_v13 = vld [vmem:[#allocation41_spill] sm:$0xff]  ;;  %v7005_v16 = vld [vmem:[#allocation42_spill] sm:$0xff] }
 0x28e   :  { %3597 = vmatpush1.bf16.msra.mxu0 %v6995_v28  ;;  %3661 = vmatpush1.bf16.msra.mxu1 %v6996_v44  ;;  %v7006_v28 = vld [vmem:[#allocation43_spill] sm:$0xff]  ;;  %v7007_v44 = vld [vmem:[#allocation44_spill] sm:$0xff] }
 0x28f   :  { %3599 = vmatprep.subr.bf16.mxu0 %v6997_v1  ;;  %3663 = vmatprep.subr.bf16.mxu1 %v6998_v3  ;;  %v7008_v1 = vld [vmem:[#allocation45_spill] sm:$0xff]  ;;  %v7009_v3 = vld [vmem:[#allocation46_spill] sm:$0xff] }
 0x292   :  { %3601 = vmatpush1.bf16.msra.mxu0 %v6999_v6  ;;  %3665 = vmatpush1.bf16.msra.mxu1 %v7000_v57  ;;  %v7010_v6 = vld [vmem:[#allocation47_spill] sm:$0xff]  ;;  %v7011_v57 = vld [vmem:[#allocation48_spill] sm:$0xff] }
 0x293   :  { %3603 = vmatprep.subr.bf16.mxu0 %v7001_v4  ;;  %3667 = vmatprep.subr.bf16.mxu1 %v7002_v49  ;;  %v7012_v4 = vld [vmem:[#allocation49_spill] sm:$0xff]  ;;  %v7013_v49 = vld [vmem:[#allocation50_spill] sm:$0xff] }
 0x296   :  { %3605 = vmatpush1.bf16.msra.mxu0 %v7003_v54  ;;  %3669 = vmatpush1.bf16.msra.mxu1 %v7004_v13  ;;  %v7014_v54 = vld [vmem:[#allocation51_spill] sm:$0xff]  ;;  %v7015_v13 = vld [vmem:[#allocation52_spill] sm:$0xff] }
 0x297   :  { %3607 = vmatprep.subr.bf16.mxu0 %v7005_v16  ;;  %3671 = vmatprep.subr.bf16.mxu1 %v7006_v28  ;;  %v7016_v16 = vld [vmem:[#allocation53_spill] sm:$0xff]  ;;  %v7017_v28 = vld [vmem:[#allocation54_spill] sm:$0xff] }
 0x29a   :  { %3609 = vmatpush1.bf16.msra.mxu0 %v7007_v44  ;;  %3673 = vmatpush1.bf16.msra.mxu1 %v7008_v1  ;;  %v7018_v44 = vld [vmem:[#allocation55_spill] sm:$0xff]  ;;  %v7019_v1 = vld [vmem:[#allocation56_spill] sm:$0xff] }
 0x29b   :  { %3611 = vmatprep.subr.bf16.mxu0 %v7009_v3  ;;  %3675 = vmatprep.subr.bf16.mxu1 %v7010_v6  ;;  %v7020_v3 = vld [vmem:[#allocation57_spill] sm:$0xff]  ;;  %v7021_v6 = vld [vmem:[#allocation4_spill] sm:$0xff] }
 0x29e   :  { %3613 = vmatpush1.bf16.msra.mxu0 %v7011_v57  ;;  %3677 = vmatpush1.bf16.msra.mxu1 %v7012_v4  ;;  %v7022_v57 = vld [vmem:[#allocation5_spill] sm:$0xff] }
 0x29f   :  { %3615 = vmatprep.subr.bf16.mxu0 %v7013_v49  ;;  %3679 = vmatprep.subr.bf16.mxu1 %v7014_v54 }
 0x2a2   :  { %3617 = vmatpush1.bf16.msra.mxu0 %v7015_v13  ;;  %3681 = vmatpush1.bf16.msra.mxu1 %v7016_v16 }
 0x2a3   :  { %3619 = vmatprep.subr.bf16.mxu0 %v7017_v28  ;;  %3683 = vmatprep.subr.bf16.mxu1 %v7018_v44 }
 0x2a6   :  { %3621 = vmatpush1.bf16.msra.mxu0 %v7019_v1  ;;  %3685 = vmatpush1.bf16.msra.mxu1 %v7020_v3 }
 0x2a7   :  { %3687 = vmatprep.subr.bf16.mxu0 %v7021_v6  ;;  %3719 = vmatprep.subr.bf16.mxu1 %v7022_v57 }
 0x31c   :  { %v840_v4 = vpop.f32.mrb[6].mxu0  ;;  %v911_v49 = vpop.f32.mrb[6].mxu1 }
 0x31d   :  { %v841_v54 = vadd.f32 %v840_v4, %v7023_v12  ;;  %v842_v38 = vpop.f32.mrb[7].mxu0  ;;  %v913_v13 = vpop.f32.mrb[7].mxu1  ;;  %v912_v3 = vadd.f32 %v911_v49, %v5951_v32 }
 0x31e   :  { %v843_v16 = vadd.f32 %v842_v38, %v5944_v39  ;;  %v914_v1 = vadd.f32 %v913_v13, %v5948_v20 }
 0x31f   :  { %v3040_v35 = vmul.f32 -1.442695, %v841_v54 }
 0x320   :  { %v3041_v28 = vmul.f32 -1.442695, %v843_v16  ;;  %v3042_v44 = vmul.f32 -1.442695, %v914_v1  ;;  %v3044_v1 = vld [vmem:[%s6747_s0 + $0x40] sm:$0xff] }
 0x321   :  { %4695 = vpow2.f32 %v3040_v35 }
 0x322   :  { %4697 = vpow2.f32 %v3041_v28 }
 0x323   :  { %4699 = vpow2.f32 %v3042_v44  ;;  %v3045_v44 = vld [vmem:[%s6747_s0 + $0x48] sm:$0xff] }
 0x324   :  { %4701 = vtanh.f32 %v912_v3 }
 0x32b   :  { %v4696_v6 = vpop.eup %4695 }
 0x32c   :  { %v4698_v56 = vpop.eup %4697  ;;  %v919_v57 = vadd.f32 1.0, %v4696_v6 }
 0x32d   :  { %v925_v22 = vadd.f32 1.0, %v4698_v56  ;;  %v4700_v4 = vpop.eup %4699 }
 0x32e   :  { %4703 = vrcp.f32 %v919_v57  ;;  %v4702_v12 = vpop.eup %4701  ;;  %v932_v35 = vadd.f32 1.0, %v4700_v4  ;;  %v3047_v4 = vld [vmem:[%s6747_s0 + $0x58] sm:$0xff] }
 0x32f   :  { %4705 = vrcp.f32 %v925_v22 }
 0x330   :  { %4707 = vrcp.f32 %v932_v35 }
 0x338   :  { %v4704_v38 = vpop.eup %4703 }
 0x339   :  { %v4706_v54 = vpop.eup %4705  ;;  %v936_v16 = vmul.f32 %v4704_v38, %v4702_v12 }
 0x33a   :  { %v935_v28 = vmul.f32 %v4706_v54, %v5963_v5  ;;  %v3046_v54 = vld [vmem:[%s6747_s0 + $0x50] sm:$0xff] }
 0x33c   :  { %v1013_v3 = vpop.f32.mrb[8].mxu0  ;;  %v1084_v56 = vpop.f32.mrb[8].mxu1  ;;  %v6088_v6 = vadd.f32 %v936_v16, %v935_v28 }
 0x33d   :  { %v1089_v22 = vadd.f32 %v3044_v1, %v1013_v3  ;;  %v1015_v57 = vpop.f32.mrb[9].mxu0  ;;  %v1086_v49 = vpop.f32.mrb[9].mxu1  ;;  %v1091_v1 = vadd.f32 %v3046_v54, %v1084_v56 }
 0x33e   :  { %v1090_v12 = vadd.f32 %v3045_v44, %v1015_v57  ;;  %4709 = vtanh.f32 %v6088_v6  ;;  %v1092_v38 = vadd.f32 %v3047_v4, %v1086_v49  ;;  %v4708_v16 = vpop.eup %4707 }
 0x33f   :  { %v3048_v5 = vmul.f32 -1.442695, %v1089_v22 }
 0x340   :  { %v3049_v13 = vmul.f32 -1.442695, %v1090_v12  ;;  %v3050_v28 = vmul.f32 -1.442695, %v1092_v38 }
 0x341   :  { %4711 = vpow2.f32 %v3048_v5 }
 0x342   :  { %4713 = vpow2.f32 %v3049_v13 }
 0x343   :  { %4715 = vpow2.f32 %v3050_v28 }
 0x344   :  { %4717 = vtanh.f32 %v1091_v1  ;;  %v7025_v1 = vld [vmem:[#allocation9_spill] sm:$0xff] }
 0x348   :  { %v4710_v35 = vpop.eup %4709 }
 0x349   :  { %v939_v44 = vmul.f32 %v4710_v35, %v4708_v16 }
 0x34b   :  { %v4712_v3 = vpop.eup %4711  ;;  %3043 = vst [vmem:[%s6750_s6 + $0x8] sm:$0xff] %v939_v44  ;;  %1181 = vmatprep.mubr.f32.mxu0 %v939_v44  ;;  %1252 = vmatprep.mubr.f32.mxu1 %v939_v44 }
 0x34c   :  { %v4714_v22 = vpop.eup %4713  ;;  %v1096_v57 = vadd.f32 1.0, %v4712_v3  ;;  %v7026_v3 = vld [vmem:[#allocation7_spill] sm:$0xff] }
 0x34d   :  { %v1102_v49 = vadd.f32 1.0, %v4714_v22  ;;  %v4716_v12 = vpop.eup %4715  ;;  %v7027_v22 = vld [vmem:[#allocation11_spill] sm:$0xff] }
 0x34e   :  { %4719 = vrcp.f32 %v1096_v57  ;;  %v4718_v5 = vpop.eup %4717  ;;  %v1109_v38 = vadd.f32 1.0, %v4716_v12  ;;  %v7028_v57 = vld [vmem:[#allocation8_spill] sm:$0xff]  ;;  %v7030_v12 = vld [vmem:[#allocation10_spill] sm:$0xff] }
 0x34f   :  { %4721 = vrcp.f32 %v1102_v49  ;;  %v7029_v49 = vld [vmem:[#allocation12_spill] sm:$0xff] }
 0x350   :  { %4723 = vrcp.f32 %v1109_v38  ;;  %v7035_v38 = vld [vmem:[#allocation17_spill] sm:$0xff] }
 0x358   :  { %v4720_v13 = vpop.eup %4719 }
 0x359   :  { %v4722_v4 = vpop.eup %4721  ;;  %v1113_v56 = vmul.f32 %v4720_v13, %v4718_v5  ;;  %v7031_v5 = vld [vmem:[#allocation13_spill] sm:$0xff]  ;;  %v7032_v13 = vld [vmem:[#allocation14_spill] sm:$0xff] }
 0x35a   :  { %v1112_v54 = vmul.f32 %v4722_v4, %v5976_v40  ;;  %v4724_v35 = vpop.eup %4723  ;;  %v7024_v40 = vld [vmem:[#allocation6_spill] sm:$0xff]  ;;  %v7033_v4 = vld [vmem:[#allocation15_spill] sm:$0xff] }
 0x35c   :  { %v6101_v16 = vadd.f32 %v1113_v56, %v1112_v54  ;;  %v7034_v56 = vld [vmem:[#allocation16_spill] sm:$0xff]  ;;  %v7036_v54 = vld [vmem:[#allocation18_spill] sm:$0xff] }
 0x35e   :  { %4725 = vtanh.f32 %v6101_v16 }
 0x368   :  { %v4726_v44 = vpop.eup %4725 }
 0x369   :  { %v1116_v28 = vmul.f32 %v4726_v44, %v4724_v35  ;;  %v7037_v35 = vld [vmem:[#allocation19_spill] sm:$0xff]  ;;  %v7038_v44 = vld [vmem:[#allocation20_spill] sm:$0xff] }
 0x36b   :  { %1182 = vmatmul.mubr.f32.vlgmr.msra.gmra.mrb[10].mxu0 %v1116_v28  ;;  %1253 = vmatmul.mubr.f32.vlgmr.msra.gmra.mrb[10].mxu1 %v1116_v28 }
 0x36c   :  { %3689 = vmatpush1.bf16.msra.mxu0 %v4971_v8  ;;  %3721 = vmatpush1.bf16.msra.mxu1 %v5020_v25 }
 0x36d   :  { %3691 = vmatprep.subr.bf16.mxu0 %v4973_v9  ;;  %3723 = vmatprep.subr.bf16.mxu1 %v5045_v33 }
 0x36e   :  { %1354 = vmatprep.mubr.f32.mxu0 %v6919_v59  ;;  %1425 = vmatprep.mubr.f32.mxu1 %v6919_v59 }
 0x370   :  { %3693 = vmatpush1.bf16.msra.mxu0 %v4989_v14  ;;  %3725 = vmatpush1.bf16.msra.mxu1 %v5056_v37 }
 0x371   :  { %3695 = vmatprep.subr.bf16.mxu0 %v4998_v17  ;;  %3727 = vmatprep.subr.bf16.mxu1 %v5080_v45 }
 0x374   :  { %3697 = vmatpush1.bf16.msra.mxu0 %v5023_v26  ;;  %3729 = vmatpush1.bf16.msra.mxu1 %v5089_v48 }
 0x375   :  { %3699 = vmatprep.subr.bf16.mxu0 %v5036_v30  ;;  %3731 = vmatprep.subr.bf16.mxu1 %v5101_v52 }
 0x378   :  { %3701 = vmatpush1.bf16.msra.mxu0 %v5072_v42  ;;  %3733 = vmatpush1.bf16.msra.mxu1 %v5131_v62 }
 0x379   :  { %3703 = vmatprep.subr.bf16.mxu0 %v5083_v46  ;;  %3735 = vmatprep.subr.bf16.mxu1 %v5137_v0 }
 0x37c   :  { %3705 = vmatpush1.bf16.msra.mxu0 %v5110_v55  ;;  %3737 = vmatpush1.bf16.msra.mxu1 %v5167_v15 }
 0x37d   :  { %3707 = vmatprep.subr.bf16.mxu0 %v5119_v58  ;;  %3739 = vmatprep.subr.bf16.mxu1 %v5173_v18 }
 0x380   :  { %3709 = vmatpush1.bf16.msra.mxu0 %v5152_v7  ;;  %3741 = vmatpush1.bf16.msra.mxu1 %v5200_v31 }
 0x381   :  { %3711 = vmatprep.subr.bf16.mxu0 %v5155_v10  ;;  %3743 = vmatprep.subr.bf16.mxu1 %v5206_v34 }
 0x384   :  { %3713 = vmatpush1.bf16.msra.mxu0 %v5188_v24  ;;  %3745 = vmatpush1.bf16.msra.mxu1 %v5228_v43 }
 0x385   :  { %3715 = vmatprep.subr.bf16.mxu0 %v5191_v27  ;;  %3747 = vmatprep.subr.bf16.mxu1 %v5242_v51 }
 0x388   :  { %3717 = vmatpush1.bf16.msra.mxu0 %v5224_v41  ;;  %3749 = vmatpush1.bf16.msra.mxu1 %v5266_v63 }
 0x389   :  { %3751 = vmatprep.subr.bf16.mxu0 %v5233_v47  ;;  %3815 = vmatprep.subr.bf16.mxu1 %v5281_v11 }
 0x38b   :  { %1355 = vmatmul.mubr.f32.vlgmr.msra.gmra.mrb[12].mxu0 %v1116_v28  ;;  %1426 = vmatmul.mubr.f32.vlgmr.msra.gmra.mrb[12].mxu1 %v1116_v28  ;;  %v7039_v28 = vld [vmem:[#allocation21_spill] sm:$0xff] }
 0x38c   :  { %3753 = vmatpush1.bf16.msra.mxu0 %v5263_v61  ;;  %3817 = vmatpush1.bf16.msra.mxu1 %v5302_v23 }
 0x38d   :  { %3755 = vmatprep.subr.bf16.mxu0 %v5272_v2  ;;  %3819 = vmatprep.subr.bf16.mxu1 %v5317_v36 }
 0x390   :  { %3757 = vmatpush1.bf16.msra.mxu0 %v5299_v21  ;;  %3821 = vmatpush1.bf16.msra.mxu1 %v5338_v53 }
 0x391   :  { %3759 = vmatprep.subr.bf16.mxu0 %v5308_v29  ;;  %3823 = vmatprep.subr.bf16.mxu1 %v5353_v60 }
 0x394   :  { %3761 = vmatpush1.bf16.msra.mxu0 %v5335_v50  ;;  %3825 = vmatpush1.bf16.msra.mxu1 %v5374_v19 }
 0x395   :  { %3763 = vmatprep.subr.bf16.mxu0 %v7024_v40  ;;  %3827 = vmatprep.subr.bf16.mxu1 %v7025_v1 }
 0x398   :  { %3765 = vmatpush1.bf16.msra.mxu0 %v7026_v3  ;;  %3829 = vmatpush1.bf16.msra.mxu1 %v7027_v22 }
 0x399   :  { %3767 = vmatprep.subr.bf16.mxu0 %v7028_v57  ;;  %3831 = vmatprep.subr.bf16.mxu1 %v7029_v49  ;;  %v7040_v49 = vld [vmem:[#allocation22_spill] sm:$0xff] }
 0x39a   :  { %v7078_v57 = vld [vmem:[#allocation58_spill] sm:$0xff] }
 0x39c   :  { %3769 = vmatpush1.bf16.msra.mxu0 %v7030_v12  ;;  %3833 = vmatpush1.bf16.msra.mxu1 %v7031_v5  ;;  %v7041_v12 = vld [vmem:[#allocation23_spill] sm:$0xff]  ;;  %v7042_v5 = vld [vmem:[#allocation24_spill] sm:$0xff] }
 0x39d   :  { %3771 = vmatprep.subr.bf16.mxu0 %v7032_v13  ;;  %3835 = vmatprep.subr.bf16.mxu1 %v7033_v4  ;;  %v7043_v13 = vld [vmem:[#allocation25_spill] sm:$0xff]  ;;  %v7044_v4 = vld [vmem:[#allocation26_spill] sm:$0xff] }
 0x3a0   :  { %3773 = vmatpush1.bf16.msra.mxu0 %v7034_v56  ;;  %3837 = vmatpush1.bf16.msra.mxu1 %v7035_v38  ;;  %v7045_v56 = vld [vmem:[#allocation27_spill] sm:$0xff]  ;;  %v7046_v38 = vld [vmem:[#allocation28_spill] sm:$0xff] }
 0x3a1   :  { %3775 = vmatprep.subr.bf16.mxu0 %v7036_v54  ;;  %3839 = vmatprep.subr.bf16.mxu1 %v7037_v35  ;;  %v7047_v54 = vld [vmem:[#allocation29_spill] sm:$0xff]  ;;  %v7048_v35 = vld [vmem:[#allocation30_spill] sm:$0xff] }
 0x3a4   :  { %3777 = vmatpush1.bf16.msra.mxu0 %v7038_v44  ;;  %3841 = vmatpush1.bf16.msra.mxu1 %v7039_v28  ;;  %v7049_v44 = vld [vmem:[#allocation31_spill] sm:$0xff]  ;;  %v7050_v28 = vld [vmem:[#allocation32_spill] sm:$0xff] }
 0x3a5   :  { %3779 = vmatprep.subr.bf16.mxu0 %v7040_v49  ;;  %3843 = vmatprep.subr.bf16.mxu1 %v7041_v12  ;;  %v7051_v49 = vld [vmem:[#allocation33_spill] sm:$0xff]  ;;  %v7052_v12 = vld [vmem:[#allocation34_spill] sm:$0xff] }
 0x3a8   :  { %3781 = vmatpush1.bf16.msra.mxu0 %v7042_v5  ;;  %3845 = vmatpush1.bf16.msra.mxu1 %v7043_v13  ;;  %v7053_v5 = vld [vmem:[#allocation35_spill] sm:$0xff]  ;;  %v7054_v13 = vld [vmem:[#allocation36_spill] sm:$0xff] }
 0x3a9   :  { %3783 = vmatprep.subr.bf16.mxu0 %v7044_v4  ;;  %3847 = vmatprep.subr.bf16.mxu1 %v7045_v56  ;;  %v7055_v4 = vld [vmem:[#allocation37_spill] sm:$0xff]  ;;  %v7056_v56 = vld [vmem:[#allocation38_spill] sm:$0xff] }
 0x3ac   :  { %3785 = vmatpush1.bf16.msra.mxu0 %v7046_v38  ;;  %3849 = vmatpush1.bf16.msra.mxu1 %v7047_v54  ;;  %v7057_v38 = vld [vmem:[#allocation39_spill] sm:$0xff]  ;;  %v7058_v54 = vld [vmem:[#allocation40_spill] sm:$0xff] }
 0x3ad   :  { %3787 = vmatprep.subr.bf16.mxu0 %v7048_v35  ;;  %3851 = vmatprep.subr.bf16.mxu1 %v7049_v44  ;;  %v7059_v35 = vld [vmem:[#allocation41_spill] sm:$0xff]  ;;  %v7060_v44 = vld [vmem:[#allocation42_spill] sm:$0xff] }
 0x3b0   :  { %3789 = vmatpush1.bf16.msra.mxu0 %v7050_v28  ;;  %3853 = vmatpush1.bf16.msra.mxu1 %v7051_v49  ;;  %v7061_v28 = vld [vmem:[#allocation43_spill] sm:$0xff]  ;;  %v7062_v49 = vld [vmem:[#allocation44_spill] sm:$0xff] }
 0x3b1   :  { %3791 = vmatprep.subr.bf16.mxu0 %v7052_v12  ;;  %3855 = vmatprep.subr.bf16.mxu1 %v7053_v5  ;;  %v7063_v12 = vld [vmem:[#allocation45_spill] sm:$0xff]  ;;  %v7064_v5 = vld [vmem:[#allocation46_spill] sm:$0xff] }
 0x3b4   :  { %3793 = vmatpush1.bf16.msra.mxu0 %v7054_v13  ;;  %3857 = vmatpush1.bf16.msra.mxu1 %v7055_v4  ;;  %v7065_v13 = vld [vmem:[#allocation47_spill] sm:$0xff]  ;;  %v7066_v4 = vld [vmem:[#allocation48_spill] sm:$0xff] }
 0x3b5   :  { %3795 = vmatprep.subr.bf16.mxu0 %v7056_v56  ;;  %3859 = vmatprep.subr.bf16.mxu1 %v7057_v38  ;;  %v7067_v56 = vld [vmem:[#allocation49_spill] sm:$0xff]  ;;  %v7068_v38 = vld [vmem:[#allocation50_spill] sm:$0xff] }
 0x3b8   :  { %3797 = vmatpush1.bf16.msra.mxu0 %v7058_v54  ;;  %3861 = vmatpush1.bf16.msra.mxu1 %v7059_v35  ;;  %v7069_v54 = vld [vmem:[#allocation51_spill] sm:$0xff]  ;;  %v7070_v35 = vld [vmem:[#allocation52_spill] sm:$0xff] }
 0x3b9   :  { %3799 = vmatprep.subr.bf16.mxu0 %v7060_v44  ;;  %3863 = vmatprep.subr.bf16.mxu1 %v7061_v28  ;;  %v7071_v44 = vld [vmem:[#allocation53_spill] sm:$0xff]  ;;  %v7072_v28 = vld [vmem:[#allocation54_spill] sm:$0xff] }
 0x3bc   :  { %3801 = vmatpush1.bf16.msra.mxu0 %v7062_v49  ;;  %3865 = vmatpush1.bf16.msra.mxu1 %v7063_v12  ;;  %v7073_v49 = vld [vmem:[#allocation55_spill] sm:$0xff]  ;;  %v7074_v12 = vld [vmem:[#allocation56_spill] sm:$0xff] }
 0x3bd   :  { %3803 = vmatprep.subr.bf16.mxu0 %v7064_v5  ;;  %3867 = vmatprep.subr.bf16.mxu1 %v7065_v13  ;;  %v7075_v5 = vld [vmem:[#allocation57_spill] sm:$0xff]  ;;  %v7076_v13 = vld [vmem:[#allocation4_spill] sm:$0xff] }
 0x3c0   :  { %3805 = vmatpush1.bf16.msra.mxu0 %v7066_v4  ;;  %3869 = vmatpush1.bf16.msra.mxu1 %v7067_v56  ;;  %v7077_v4 = vld [vmem:[#allocation5_spill] sm:$0xff] }
 0x3c1   :  { %3807 = vmatprep.subr.bf16.mxu0 %v7068_v38  ;;  %3871 = vmatprep.subr.bf16.mxu1 %v7069_v54 }
 0x3c4   :  { %3809 = vmatpush1.bf16.msra.mxu0 %v7070_v35  ;;  %3873 = vmatpush1.bf16.msra.mxu1 %v7071_v44 }
 0x3c5   :  { %3811 = vmatprep.subr.bf16.mxu0 %v7072_v28  ;;  %3875 = vmatprep.subr.bf16.mxu1 %v7073_v49 }
 0x3c8   :  { %3813 = vmatpush1.bf16.msra.mxu0 %v7074_v12  ;;  %3877 = vmatpush1.bf16.msra.mxu1 %v7075_v5 }
 0x3c9   :  { %3879 = vmatprep.subr.bf16.mxu0 %v7076_v13  ;;  %3911 = vmatprep.subr.bf16.mxu1 %v7077_v4 }
 0x43e   :  { %v1183_v56 = vpop.f32.mrb[10].mxu0  ;;  %v1254_v38 = vpop.f32.mrb[10].mxu1 }
 0x43f   :  { %v1184_v54 = vadd.f32 %v1183_v56, %v7078_v57  ;;  %v1185_v22 = vpop.f32.mrb[11].mxu0  ;;  %v1256_v35 = vpop.f32.mrb[11].mxu1  ;;  %v1255_v5 = vadd.f32 %v1254_v38, %v5951_v32 }
 0x440   :  { %v1186_v44 = vadd.f32 %v1185_v22, %v5944_v39  ;;  %v1257_v12 = vadd.f32 %v1256_v35, %v5948_v20 }
 0x441   :  { %v3051_v3 = vmul.f32 -1.442695, %v1184_v54 }
 0x442   :  { %v3052_v28 = vmul.f32 -1.442695, %v1186_v44  ;;  %v3053_v49 = vmul.f32 -1.442695, %v1257_v12  ;;  %v3055_v12 = vld [vmem:[%s6747_s0 + $0x60] sm:$0xff] }
 0x443   :  { %4727 = vpow2.f32 %v3051_v3 }
 0x444   :  { %4729 = vpow2.f32 %v3052_v28 }
 0x445   :  { %4731 = vpow2.f32 %v3053_v49  ;;  %v3056_v49 = vld [vmem:[%s6747_s0 + $0x68] sm:$0xff] }
 0x446   :  { %4733 = vtanh.f32 %v1255_v5 }
 0x44d   :  { %v4728_v13 = vpop.eup %4727 }
 0x44e   :  { %v4730_v1 = vpop.eup %4729  ;;  %v1262_v4 = vadd.f32 1.0, %v4728_v13 }
 0x44f   :  { %v1268_v40 = vadd.f32 1.0, %v4730_v1  ;;  %v4732_v56 = vpop.eup %4731 }
 0x450   :  { %4735 = vrcp.f32 %v1262_v4  ;;  %v4734_v57 = vpop.eup %4733  ;;  %v1275_v3 = vadd.f32 1.0, %v4732_v56  ;;  %v3058_v56 = vld [vmem:[%s6747_s0 + $0x78] sm:$0xff] }
 0x451   :  { %4737 = vrcp.f32 %v1268_v40 }
 0x452   :  { %4739 = vrcp.f32 %v1275_v3 }
 0x45a   :  { %v4736_v22 = vpop.eup %4735 }
 0x45b   :  { %v4738_v54 = vpop.eup %4737  ;;  %v1279_v44 = vmul.f32 %v4736_v22, %v4734_v57 }
 0x45c   :  { %v1278_v28 = vmul.f32 %v4738_v54, %v6088_v6  ;;  %v3057_v54 = vld [vmem:[%s6747_s0 + $0x70] sm:$0xff] }
 0x45e   :  { %v1356_v5 = vpop.f32.mrb[12].mxu0  ;;  %v1427_v1 = vpop.f32.mrb[12].mxu1  ;;  %v6213_v13 = vadd.f32 %v1279_v44, %v1278_v28 }
 0x45f   :  { %v1432_v40 = vadd.f32 %v3055_v12, %v1356_v5  ;;  %v1358_v4 = vpop.f32.mrb[13].mxu0  ;;  %v1429_v38 = vpop.f32.mrb[13].mxu1  ;;  %v1434_v12 = vadd.f32 %v3057_v54, %v1427_v1 }
 0x460   :  { %v1433_v57 = vadd.f32 %v3056_v49, %v1358_v4  ;;  %4741 = vtanh.f32 %v6213_v13  ;;  %v1435_v22 = vadd.f32 %v3058_v56, %v1429_v38  ;;  %v4740_v44 = vpop.eup %4739 }
 0x461   :  { %v3059_v6 = vmul.f32 -1.442695, %v1432_v40 }
 0x462   :  { %v3060_v35 = vmul.f32 -1.442695, %v1433_v57  ;;  %v3061_v28 = vmul.f32 -1.442695, %v1435_v22 }
 0x463   :  { %4743 = vpow2.f32 %v3059_v6 }
 0x464   :  { %4745 = vpow2.f32 %v3060_v35 }
 0x465   :  { %4747 = vpow2.f32 %v3061_v28 }
 0x466   :  { %4749 = vtanh.f32 %v1434_v12  ;;  %v7080_v12 = vld [vmem:[#allocation9_spill] sm:$0xff] }
 0x46a   :  { %v4742_v3 = vpop.eup %4741 }
 0x46b   :  { %v1282_v49 = vmul.f32 %v4742_v3, %v4740_v44 }
 0x46d   :  { %v4744_v5 = vpop.eup %4743  ;;  %3054 = vst [vmem:[%s6750_s6 + $0x10] sm:$0xff] %v1282_v49  ;;  %1524 = vmatprep.mubr.f32.mxu0 %v1282_v49  ;;  %1595 = vmatprep.mubr.f32.mxu1 %v1282_v49 }
 0x46e   :  { %v4746_v40 = vpop.eup %4745  ;;  %v1439_v4 = vadd.f32 1.0, %v4744_v5  ;;  %v7081_v5 = vld [vmem:[#allocation7_spill] sm:$0xff] }
 0x46f   :  { %v1445_v38 = vadd.f32 1.0, %v4746_v40  ;;  %v4748_v57 = vpop.eup %4747  ;;  %v7082_v40 = vld [vmem:[#allocation11_spill] sm:$0xff] }
 0x470   :  { %4751 = vrcp.f32 %v1439_v4  ;;  %v4750_v6 = vpop.eup %4749  ;;  %v1452_v22 = vadd.f32 1.0, %v4748_v57  ;;  %v7083_v4 = vld [vmem:[#allocation8_spill] sm:$0xff]  ;;  %v7085_v57 = vld [vmem:[#allocation10_spill] sm:$0xff] }
 0x471   :  { %4753 = vrcp.f32 %v1445_v38  ;;  %v7084_v38 = vld [vmem:[#allocation12_spill] sm:$0xff] }
 0x472   :  { %4755 = vrcp.f32 %v1452_v22  ;;  %v7090_v22 = vld [vmem:[#allocation17_spill] sm:$0xff] }
 0x47a   :  { %v4752_v35 = vpop.eup %4751 }
 0x47b   :  { %v4754_v56 = vpop.eup %4753  ;;  %v1456_v1 = vmul.f32 %v4752_v35, %v4750_v6  ;;  %v7086_v6 = vld [vmem:[#allocation13_spill] sm:$0xff]  ;;  %v7087_v35 = vld [vmem:[#allocation14_spill] sm:$0xff] }
 0x47c   :  { %v1455_v54 = vmul.f32 %v4754_v56, %v6101_v16  ;;  %v4756_v3 = vpop.eup %4755  ;;  %v7079_v16 = vld [vmem:[#allocation6_spill] sm:$0xff]  ;;  %v7088_v56 = vld [vmem:[#allocation15_spill] sm:$0xff] }
 0x47e   :  { %v6226_v44 = vadd.f32 %v1456_v1, %v1455_v54  ;;  %v7089_v1 = vld [vmem:[#allocation16_spill] sm:$0xff]  ;;  %v7091_v54 = vld [vmem:[#allocation18_spill] sm:$0xff] }
 0x480   :  { %4757 = vtanh.f32 %v6226_v44 }
 0x48a   :  { %v4758_v49 = vpop.eup %4757 }
 0x48b   :  { %v1459_v28 = vmul.f32 %v4758_v49, %v4756_v3  ;;  %v7092_v3 = vld [vmem:[#allocation19_spill] sm:$0xff]  ;;  %v7093_v49 = vld [vmem:[#allocation20_spill] sm:$0xff] }
 0x48d   :  { %1525 = vmatmul.mubr.f32.vlgmr.msra.gmra.mrb[14].mxu0 %v1459_v28  ;;  %1596 = vmatmul.mubr.f32.vlgmr.msra.gmra.mrb[14].mxu1 %v1459_v28 }
 0x48e   :  { %3881 = vmatpush1.bf16.msra.mxu0 %v4971_v8  ;;  %3913 = vmatpush1.bf16.msra.mxu1 %v5020_v25 }
 0x48f   :  { %3883 = vmatprep.subr.bf16.mxu0 %v4973_v9  ;;  %3915 = vmatprep.subr.bf16.mxu1 %v5045_v33 }
 0x490   :  { %1697 = vmatprep.mubr.f32.mxu0 %v6919_v59  ;;  %1768 = vmatprep.mubr.f32.mxu1 %v6919_v59 }
 0x492   :  { %3885 = vmatpush1.bf16.msra.mxu0 %v4989_v14  ;;  %3917 = vmatpush1.bf16.msra.mxu1 %v5056_v37 }
 0x493   :  { %3887 = vmatprep.subr.bf16.mxu0 %v4998_v17  ;;  %3919 = vmatprep.subr.bf16.mxu1 %v5080_v45 }
 0x496   :  { %3889 = vmatpush1.bf16.msra.mxu0 %v5023_v26  ;;  %3921 = vmatpush1.bf16.msra.mxu1 %v5089_v48 }
 0x497   :  { %3891 = vmatprep.subr.bf16.mxu0 %v5036_v30  ;;  %3923 = vmatprep.subr.bf16.mxu1 %v5101_v52 }
 0x49a   :  { %3893 = vmatpush1.bf16.msra.mxu0 %v5072_v42  ;;  %3925 = vmatpush1.bf16.msra.mxu1 %v5131_v62 }
 0x49b   :  { %3895 = vmatprep.subr.bf16.mxu0 %v5083_v46  ;;  %3927 = vmatprep.subr.bf16.mxu1 %v5137_v0 }
 0x49e   :  { %3897 = vmatpush1.bf16.msra.mxu0 %v5110_v55  ;;  %3929 = vmatpush1.bf16.msra.mxu1 %v5167_v15 }
 0x49f   :  { %3899 = vmatprep.subr.bf16.mxu0 %v5119_v58  ;;  %3931 = vmatprep.subr.bf16.mxu1 %v5173_v18 }
 0x4a2   :  { %3901 = vmatpush1.bf16.msra.mxu0 %v5152_v7  ;;  %3933 = vmatpush1.bf16.msra.mxu1 %v5200_v31 }
 0x4a3   :  { %3903 = vmatprep.subr.bf16.mxu0 %v5155_v10  ;;  %3935 = vmatprep.subr.bf16.mxu1 %v5206_v34 }
 0x4a6   :  { %3905 = vmatpush1.bf16.msra.mxu0 %v5188_v24  ;;  %3937 = vmatpush1.bf16.msra.mxu1 %v5228_v43 }
 0x4a7   :  { %3907 = vmatprep.subr.bf16.mxu0 %v5191_v27  ;;  %3939 = vmatprep.subr.bf16.mxu1 %v5242_v51 }
 0x4aa   :  { %3909 = vmatpush1.bf16.msra.mxu0 %v5224_v41  ;;  %3941 = vmatpush1.bf16.msra.mxu1 %v5266_v63 }
 0x4ab   :  { %3943 = vmatprep.subr.bf16.mxu0 %v5233_v47  ;;  %4007 = vmatprep.subr.bf16.mxu1 %v5281_v11 }
 0x4ad   :  { %1698 = vmatmul.mubr.f32.vlgmr.msra.gmra.mrb[16].mxu0 %v1459_v28  ;;  %1769 = vmatmul.mubr.f32.vlgmr.msra.gmra.mrb[16].mxu1 %v1459_v28  ;;  %v7094_v28 = vld [vmem:[#allocation21_spill] sm:$0xff] }
 0x4ae   :  { %3945 = vmatpush1.bf16.msra.mxu0 %v5263_v61  ;;  %4009 = vmatpush1.bf16.msra.mxu1 %v5302_v23 }
 0x4af   :  { %3947 = vmatprep.subr.bf16.mxu0 %v5272_v2  ;;  %4011 = vmatprep.subr.bf16.mxu1 %v5317_v36 }
 0x4b2   :  { %3949 = vmatpush1.bf16.msra.mxu0 %v5299_v21  ;;  %4013 = vmatpush1.bf16.msra.mxu1 %v5338_v53 }
 0x4b3   :  { %3951 = vmatprep.subr.bf16.mxu0 %v5308_v29  ;;  %4015 = vmatprep.subr.bf16.mxu1 %v5353_v60 }
 0x4b6   :  { %3953 = vmatpush1.bf16.msra.mxu0 %v5335_v50  ;;  %4017 = vmatpush1.bf16.msra.mxu1 %v5374_v19 }
 0x4b7   :  { %3955 = vmatprep.subr.bf16.mxu0 %v7079_v16  ;;  %4019 = vmatprep.subr.bf16.mxu1 %v7080_v12 }
 0x4ba   :  { %3957 = vmatpush1.bf16.msra.mxu0 %v7081_v5  ;;  %4021 = vmatpush1.bf16.msra.mxu1 %v7082_v40 }
 0x4bb   :  { %3959 = vmatprep.subr.bf16.mxu0 %v7083_v4  ;;  %4023 = vmatprep.subr.bf16.mxu1 %v7084_v38  ;;  %v7095_v38 = vld [vmem:[#allocation22_spill] sm:$0xff] }
 0x4bc   :  { %v7133_v4 = vld [vmem:[#allocation58_spill] sm:$0xff] }
 0x4be   :  { %3961 = vmatpush1.bf16.msra.mxu0 %v7085_v57  ;;  %4025 = vmatpush1.bf16.msra.mxu1 %v7086_v6  ;;  %v7096_v57 = vld [vmem:[#allocation23_spill] sm:$0xff]  ;;  %v7097_v6 = vld [vmem:[#allocation24_spill] sm:$0xff] }
 0x4bf   :  { %3963 = vmatprep.subr.bf16.mxu0 %v7087_v35  ;;  %4027 = vmatprep.subr.bf16.mxu1 %v7088_v56  ;;  %v7098_v35 = vld [vmem:[#allocation25_spill] sm:$0xff]  ;;  %v7099_v56 = vld [vmem:[#allocation26_spill] sm:$0xff] }
 0x4c2   :  { %3965 = vmatpush1.bf16.msra.mxu0 %v7089_v1  ;;  %4029 = vmatpush1.bf16.msra.mxu1 %v7090_v22  ;;  %v7100_v1 = vld [vmem:[#allocation27_spill] sm:$0xff]  ;;  %v7101_v22 = vld [vmem:[#allocation28_spill] sm:$0xff] }
 0x4c3   :  { %3967 = vmatprep.subr.bf16.mxu0 %v7091_v54  ;;  %4031 = vmatprep.subr.bf16.mxu1 %v7092_v3  ;;  %v7102_v54 = vld [vmem:[#allocation29_spill] sm:$0xff]  ;;  %v7103_v3 = vld [vmem:[#allocation30_spill] sm:$0xff] }
 0x4c6   :  { %3969 = vmatpush1.bf16.msra.mxu0 %v7093_v49  ;;  %4033 = vmatpush1.bf16.msra.mxu1 %v7094_v28  ;;  %v7104_v49 = vld [vmem:[#allocation31_spill] sm:$0xff]  ;;  %v7105_v28 = vld [vmem:[#allocation32_spill] sm:$0xff] }
 0x4c7   :  { %3971 = vmatprep.subr.bf16.mxu0 %v7095_v38  ;;  %4035 = vmatprep.subr.bf16.mxu1 %v7096_v57  ;;  %v7106_v38 = vld [vmem:[#allocation33_spill] sm:$0xff]  ;;  %v7107_v57 = vld [vmem:[#allocation34_spill] sm:$0xff] }
 0x4ca   :  { %3973 = vmatpush1.bf16.msra.mxu0 %v7097_v6  ;;  %4037 = vmatpush1.bf16.msra.mxu1 %v7098_v35  ;;  %v7108_v6 = vld [vmem:[#allocation35_spill] sm:$0xff]  ;;  %v7109_v35 = vld [vmem:[#allocation36_spill] sm:$0xff] }
 0x4cb   :  { %3975 = vmatprep.subr.bf16.mxu0 %v7099_v56  ;;  %4039 = vmatprep.subr.bf16.mxu1 %v7100_v1  ;;  %v7110_v56 = vld [vmem:[#allocation37_spill] sm:$0xff]  ;;  %v7111_v1 = vld [vmem:[#allocation38_spill] sm:$0xff] }
 0x4ce   :  { %3977 = vmatpush1.bf16.msra.mxu0 %v7101_v22  ;;  %4041 = vmatpush1.bf16.msra.mxu1 %v7102_v54  ;;  %v7112_v22 = vld [vmem:[#allocation39_spill] sm:$0xff]  ;;  %v7113_v54 = vld [vmem:[#allocation40_spill] sm:$0xff] }
 0x4cf   :  { %3979 = vmatprep.subr.bf16.mxu0 %v7103_v3  ;;  %4043 = vmatprep.subr.bf16.mxu1 %v7104_v49  ;;  %v7114_v3 = vld [vmem:[#allocation41_spill] sm:$0xff]  ;;  %v7115_v49 = vld [vmem:[#allocation42_spill] sm:$0xff] }
 0x4d2   :  { %3981 = vmatpush1.bf16.msra.mxu0 %v7105_v28  ;;  %4045 = vmatpush1.bf16.msra.mxu1 %v7106_v38  ;;  %v7116_v28 = vld [vmem:[#allocation43_spill] sm:$0xff]  ;;  %v7117_v38 = vld [vmem:[#allocation44_spill] sm:$0xff] }
 0x4d3   :  { %3983 = vmatprep.subr.bf16.mxu0 %v7107_v57  ;;  %4047 = vmatprep.subr.bf16.mxu1 %v7108_v6  ;;  %v7118_v57 = vld [vmem:[#allocation45_spill] sm:$0xff]  ;;  %v7119_v6 = vld [vmem:[#allocation46_spill] sm:$0xff] }
 0x4d6   :  { %3985 = vmatpush1.bf16.msra.mxu0 %v7109_v35  ;;  %4049 = vmatpush1.bf16.msra.mxu1 %v7110_v56  ;;  %v7120_v35 = vld [vmem:[#allocation47_spill] sm:$0xff]  ;;  %v7121_v56 = vld [vmem:[#allocation48_spill] sm:$0xff] }
 0x4d7   :  { %3987 = vmatprep.subr.bf16.mxu0 %v7111_v1  ;;  %4051 = vmatprep.subr.bf16.mxu1 %v7112_v22  ;;  %v7122_v1 = vld [vmem:[#allocation49_spill] sm:$0xff]  ;;  %v7123_v22 = vld [vmem:[#allocation50_spill] sm:$0xff] }
 0x4da   :  { %3989 = vmatpush1.bf16.msra.mxu0 %v7113_v54  ;;  %4053 = vmatpush1.bf16.msra.mxu1 %v7114_v3  ;;  %v7124_v54 = vld [vmem:[#allocation51_spill] sm:$0xff]  ;;  %v7125_v3 = vld [vmem:[#allocation52_spill] sm:$0xff] }
 0x4db   :  { %3991 = vmatprep.subr.bf16.mxu0 %v7115_v49  ;;  %4055 = vmatprep.subr.bf16.mxu1 %v7116_v28  ;;  %v7126_v49 = vld [vmem:[#allocation53_spill] sm:$0xff]  ;;  %v7127_v28 = vld [vmem:[#allocation54_spill] sm:$0xff] }
 0x4de   :  { %3993 = vmatpush1.bf16.msra.mxu0 %v7117_v38  ;;  %4057 = vmatpush1.bf16.msra.mxu1 %v7118_v57  ;;  %v7128_v38 = vld [vmem:[#allocation55_spill] sm:$0xff]  ;;  %v7129_v57 = vld [vmem:[#allocation56_spill] sm:$0xff] }
 0x4df   :  { %3995 = vmatprep.subr.bf16.mxu0 %v7119_v6  ;;  %4059 = vmatprep.subr.bf16.mxu1 %v7120_v35  ;;  %v7130_v6 = vld [vmem:[#allocation57_spill] sm:$0xff]  ;;  %v7131_v35 = vld [vmem:[#allocation4_spill] sm:$0xff] }
 0x4e2   :  { %3997 = vmatpush1.bf16.msra.mxu0 %v7121_v56  ;;  %4061 = vmatpush1.bf16.msra.mxu1 %v7122_v1  ;;  %v7132_v56 = vld [vmem:[#allocation5_spill] sm:$0xff] }
 0x4e3   :  { %3999 = vmatprep.subr.bf16.mxu0 %v7123_v22  ;;  %4063 = vmatprep.subr.bf16.mxu1 %v7124_v54 }
 0x4e6   :  { %4001 = vmatpush1.bf16.msra.mxu0 %v7125_v3  ;;  %4065 = vmatpush1.bf16.msra.mxu1 %v7126_v49 }
 0x4e7   :  { %4003 = vmatprep.subr.bf16.mxu0 %v7127_v28  ;;  %4067 = vmatprep.subr.bf16.mxu1 %v7128_v38 }
 0x4ea   :  { %4005 = vmatpush1.bf16.msra.mxu0 %v7129_v57  ;;  %4069 = vmatpush1.bf16.msra.mxu1 %v7130_v6 }
 0x4eb   :  { %4071 = vmatprep.subr.bf16.mxu0 %v7131_v35  ;;  %4103 = vmatprep.subr.bf16.mxu1 %v7132_v56 }
 0x560   :  { %v1526_v1 = vpop.f32.mrb[14].mxu0  ;;  %v1597_v22 = vpop.f32.mrb[14].mxu1 }
 0x561   :  { %v1527_v54 = vadd.f32 %v1526_v1, %v7133_v4  ;;  %v1528_v40 = vpop.f32.mrb[15].mxu0  ;;  %v1599_v3 = vpop.f32.mrb[15].mxu1  ;;  %v1598_v6 = vadd.f32 %v1597_v22, %v5951_v32 }
 0x562   :  { %v1529_v49 = vadd.f32 %v1528_v40, %v5944_v39  ;;  %v1600_v57 = vadd.f32 %v1599_v3, %v5948_v20 }
 0x563   :  { %v3062_v5 = vmul.f32 -1.442695, %v1527_v54 }
 0x564   :  { %v3063_v28 = vmul.f32 -1.442695, %v1529_v49  ;;  %v3064_v38 = vmul.f32 -1.442695, %v1600_v57  ;;  %v3066_v57 = vld [vmem:[%s6747_s0 + $0x80] sm:$0xff] }
 0x565   :  { %4759 = vpow2.f32 %v3062_v5 }
 0x566   :  { %4761 = vpow2.f32 %v3063_v28 }
 0x567   :  { %4763 = vpow2.f32 %v3064_v38  ;;  %v3067_v38 = vld [vmem:[%s6747_s0 + $0x88] sm:$0xff] }
 0x568   :  { %4765 = vtanh.f32 %v1598_v6 }
 0x56f   :  { %v4760_v35 = vpop.eup %4759 }
 0x570   :  { %v4762_v12 = vpop.eup %4761  ;;  %v1605_v56 = vadd.f32 1.0, %v4760_v35 }
 0x571   :  { %v1611_v16 = vadd.f32 1.0, %v4762_v12  ;;  %v4764_v1 = vpop.eup %4763 }
 0x572   :  { %4767 = vrcp.f32 %v1605_v56  ;;  %v4766_v4 = vpop.eup %4765  ;;  %v1618_v5 = vadd.f32 1.0, %v4764_v1  ;;  %v3069_v1 = vld [vmem:[%s6747_s0 + $0x98] sm:$0xff] }
 0x573   :  { %4769 = vrcp.f32 %v1611_v16 }
 0x574   :  { %4771 = vrcp.f32 %v1618_v5 }
 0x57c   :  { %v4768_v40 = vpop.eup %4767 }
 0x57d   :  { %v4770_v54 = vpop.eup %4769  ;;  %v1622_v49 = vmul.f32 %v4768_v40, %v4766_v4 }
 0x57e   :  { %v1621_v28 = vmul.f32 %v4770_v54, %v6213_v13  ;;  %v3068_v54 = vld [vmem:[%s6747_s0 + $0x90] sm:$0xff] }
 0x580   :  { %v1699_v6 = vpop.f32.mrb[16].mxu0  ;;  %v1770_v12 = vpop.f32.mrb[16].mxu1  ;;  %v6338_v35 = vadd.f32 %v1622_v49, %v1621_v28 }
 0x581   :  { %v1775_v16 = vadd.f32 %v3066_v57, %v1699_v6  ;;  %v1701_v56 = vpop.f32.mrb[17].mxu0  ;;  %v1772_v22 = vpop.f32.mrb[17].mxu1  ;;  %v1777_v57 = vadd.f32 %v3068_v54, %v1770_v12 }
 0x582   :  { %v1776_v4 = vadd.f32 %v3067_v38, %v1701_v56  ;;  %4773 = vtanh.f32 %v6338_v35  ;;  %v1778_v40 = vadd.f32 %v3069_v1, %v1772_v22  ;;  %v4772_v49 = vpop.eup %4771 }
 0x583   :  { %v3070_v13 = vmul.f32 -1.442695, %v1775_v16 }
 0x584   :  { %v3071_v3 = vmul.f32 -1.442695, %v1776_v4  ;;  %v3072_v28 = vmul.f32 -1.442695, %v1778_v40 }
 0x585   :  { %4775 = vpow2.f32 %v3070_v13 }
 0x586   :  { %4777 = vpow2.f32 %v3071_v3 }
 0x587   :  { %4779 = vpow2.f32 %v3072_v28 }
 0x588   :  { %4781 = vtanh.f32 %v1777_v57  ;;  %v7135_v57 = vld [vmem:[#allocation9_spill] sm:$0xff] }
 0x58c   :  { %v4774_v5 = vpop.eup %4773 }
 0x58d   :  { %v1625_v38 = vmul.f32 %v4774_v5, %v4772_v49 }
 0x58f   :  { %v4776_v6 = vpop.eup %4775  ;;  %3065 = vst [vmem:[%s6750_s6 + $0x18] sm:$0xff] %v1625_v38  ;;  %1867 = vmatprep.mubr.f32.mxu0 %v1625_v38  ;;  %1938 = vmatprep.mubr.f32.mxu1 %v1625_v38 }
 0x590   :  { %v4778_v16 = vpop.eup %4777  ;;  %v1782_v56 = vadd.f32 1.0, %v4776_v6  ;;  %v7136_v6 = vld [vmem:[#allocation7_spill] sm:$0xff] }
 0x591   :  { %v1788_v22 = vadd.f32 1.0, %v4778_v16  ;;  %v4780_v4 = vpop.eup %4779  ;;  %v7137_v16 = vld [vmem:[#allocation11_spill] sm:$0xff] }
 0x592   :  { %4783 = vrcp.f32 %v1782_v56  ;;  %v4782_v13 = vpop.eup %4781  ;;  %v1795_v40 = vadd.f32 1.0, %v4780_v4  ;;  %v7138_v56 = vld [vmem:[#allocation8_spill] sm:$0xff]  ;;  %v7140_v4 = vld [vmem:[#allocation10_spill] sm:$0xff] }
 0x593   :  { %4785 = vrcp.f32 %v1788_v22  ;;  %v7139_v22 = vld [vmem:[#allocation12_spill] sm:$0xff] }
 0x594   :  { %4787 = vrcp.f32 %v1795_v40  ;;  %v7145_v40 = vld [vmem:[#allocation17_spill] sm:$0xff] }
 0x59c   :  { %v4784_v3 = vpop.eup %4783 }
 0x59d   :  { %v4786_v1 = vpop.eup %4785  ;;  %v1799_v12 = vmul.f32 %v4784_v3, %v4782_v13  ;;  %v7141_v13 = vld [vmem:[#allocation13_spill] sm:$0xff]  ;;  %v7142_v3 = vld [vmem:[#allocation14_spill] sm:$0xff] }
 0x59e   :  { %v1798_v54 = vmul.f32 %v4786_v1, %v6226_v44  ;;  %v4788_v5 = vpop.eup %4787  ;;  %v7134_v44 = vld [vmem:[#allocation6_spill] sm:$0xff]  ;;  %v7143_v1 = vld [vmem:[#allocation15_spill] sm:$0xff] }
 0x5a0   :  { %v6351_v49 = vadd.f32 %v1799_v12, %v1798_v54  ;;  %v7144_v12 = vld [vmem:[#allocation16_spill] sm:$0xff]  ;;  %v7146_v54 = vld [vmem:[#allocation18_spill] sm:$0xff] }
 0x5a2   :  { %4789 = vtanh.f32 %v6351_v49 }
 0x5ac   :  { %v4790_v38 = vpop.eup %4789 }
 0x5ad   :  { %v1802_v28 = vmul.f32 %v4790_v38, %v4788_v5  ;;  %v7147_v5 = vld [vmem:[#allocation19_spill] sm:$0xff]  ;;  %v7148_v38 = vld [vmem:[#allocation20_spill] sm:$0xff] }
 0x5af   :  { %1868 = vmatmul.mubr.f32.vlgmr.msra.gmra.mrb[18].mxu0 %v1802_v28  ;;  %1939 = vmatmul.mubr.f32.vlgmr.msra.gmra.mrb[18].mxu1 %v1802_v28 }
 0x5b0   :  { %4073 = vmatpush1.bf16.msra.mxu0 %v4971_v8  ;;  %4105 = vmatpush1.bf16.msra.mxu1 %v5020_v25 }
 0x5b1   :  { %4075 = vmatprep.subr.bf16.mxu0 %v4973_v9  ;;  %4107 = vmatprep.subr.bf16.mxu1 %v5045_v33 }
 0x5b2   :  { %2040 = vmatprep.mubr.f32.mxu0 %v6919_v59  ;;  %2111 = vmatprep.mubr.f32.mxu1 %v6919_v59 }
 0x5b4   :  { %4077 = vmatpush1.bf16.msra.mxu0 %v4989_v14  ;;  %4109 = vmatpush1.bf16.msra.mxu1 %v5056_v37 }
 0x5b5   :  { %4079 = vmatprep.subr.bf16.mxu0 %v4998_v17  ;;  %4111 = vmatprep.subr.bf16.mxu1 %v5080_v45 }
 0x5b8   :  { %4081 = vmatpush1.bf16.msra.mxu0 %v5023_v26  ;;  %4113 = vmatpush1.bf16.msra.mxu1 %v5089_v48 }
 0x5b9   :  { %4083 = vmatprep.subr.bf16.mxu0 %v5036_v30  ;;  %4115 = vmatprep.subr.bf16.mxu1 %v5101_v52 }
 0x5bc   :  { %4085 = vmatpush1.bf16.msra.mxu0 %v5072_v42  ;;  %4117 = vmatpush1.bf16.msra.mxu1 %v5131_v62 }
 0x5bd   :  { %4087 = vmatprep.subr.bf16.mxu0 %v5083_v46  ;;  %4119 = vmatprep.subr.bf16.mxu1 %v5137_v0 }
 0x5c0   :  { %4089 = vmatpush1.bf16.msra.mxu0 %v5110_v55  ;;  %4121 = vmatpush1.bf16.msra.mxu1 %v5167_v15 }
 0x5c1   :  { %4091 = vmatprep.subr.bf16.mxu0 %v5119_v58  ;;  %4123 = vmatprep.subr.bf16.mxu1 %v5173_v18 }
 0x5c4   :  { %4093 = vmatpush1.bf16.msra.mxu0 %v5152_v7  ;;  %4125 = vmatpush1.bf16.msra.mxu1 %v5200_v31 }
 0x5c5   :  { %4095 = vmatprep.subr.bf16.mxu0 %v5155_v10  ;;  %4127 = vmatprep.subr.bf16.mxu1 %v5206_v34 }
 0x5c8   :  { %4097 = vmatpush1.bf16.msra.mxu0 %v5188_v24  ;;  %4129 = vmatpush1.bf16.msra.mxu1 %v5228_v43 }
 0x5c9   :  { %4099 = vmatprep.subr.bf16.mxu0 %v5191_v27  ;;  %4131 = vmatprep.subr.bf16.mxu1 %v5242_v51 }
 0x5cc   :  { %4101 = vmatpush1.bf16.msra.mxu0 %v5224_v41  ;;  %4133 = vmatpush1.bf16.msra.mxu1 %v5266_v63 }
 0x5cd   :  { %4135 = vmatprep.subr.bf16.mxu0 %v5233_v47  ;;  %4199 = vmatprep.subr.bf16.mxu1 %v5281_v11 }
 0x5cf   :  { %2041 = vmatmul.mubr.f32.vlgmr.msra.gmra.mrb[20].mxu0 %v1802_v28  ;;  %2112 = vmatmul.mubr.f32.vlgmr.msra.gmra.mrb[20].mxu1 %v1802_v28  ;;  %v7149_v28 = vld [vmem:[#allocation21_spill] sm:$0xff] }
 0x5d0   :  { %4137 = vmatpush1.bf16.msra.mxu0 %v5263_v61  ;;  %4201 = vmatpush1.bf16.msra.mxu1 %v5302_v23 }
 0x5d1   :  { %4139 = vmatprep.subr.bf16.mxu0 %v5272_v2  ;;  %4203 = vmatprep.subr.bf16.mxu1 %v5317_v36 }
 0x5d4   :  { %4141 = vmatpush1.bf16.msra.mxu0 %v5299_v21  ;;  %4205 = vmatpush1.bf16.msra.mxu1 %v5338_v53 }
 0x5d5   :  { %4143 = vmatprep.subr.bf16.mxu0 %v5308_v29  ;;  %4207 = vmatprep.subr.bf16.mxu1 %v5353_v60 }
 0x5d8   :  { %4145 = vmatpush1.bf16.msra.mxu0 %v5335_v50  ;;  %4209 = vmatpush1.bf16.msra.mxu1 %v5374_v19 }
 0x5d9   :  { %4147 = vmatprep.subr.bf16.mxu0 %v7134_v44  ;;  %4211 = vmatprep.subr.bf16.mxu1 %v7135_v57 }
 0x5dc   :  { %4149 = vmatpush1.bf16.msra.mxu0 %v7136_v6  ;;  %4213 = vmatpush1.bf16.msra.mxu1 %v7137_v16 }
 0x5dd   :  { %4151 = vmatprep.subr.bf16.mxu0 %v7138_v56  ;;  %4215 = vmatprep.subr.bf16.mxu1 %v7139_v22  ;;  %v7150_v22 = vld [vmem:[#allocation22_spill] sm:$0xff] }
 0x5de   :  { %v7188_v56 = vld [vmem:[#allocation58_spill] sm:$0xff] }
 0x5e0   :  { %4153 = vmatpush1.bf16.msra.mxu0 %v7140_v4  ;;  %4217 = vmatpush1.bf16.msra.mxu1 %v7141_v13  ;;  %v7151_v4 = vld [vmem:[#allocation23_spill] sm:$0xff]  ;;  %v7152_v13 = vld [vmem:[#allocation24_spill] sm:$0xff] }
 0x5e1   :  { %4155 = vmatprep.subr.bf16.mxu0 %v7142_v3  ;;  %4219 = vmatprep.subr.bf16.mxu1 %v7143_v1  ;;  %v7153_v3 = vld [vmem:[#allocation25_spill] sm:$0xff]  ;;  %v7154_v1 = vld [vmem:[#allocation26_spill] sm:$0xff] }
 0x5e4   :  { %4157 = vmatpush1.bf16.msra.mxu0 %v7144_v12  ;;  %4221 = vmatpush1.bf16.msra.mxu1 %v7145_v40  ;;  %v7155_v12 = vld [vmem:[#allocation27_spill] sm:$0xff]  ;;  %v7156_v40 = vld [vmem:[#allocation28_spill] sm:$0xff] }
 0x5e5   :  { %4159 = vmatprep.subr.bf16.mxu0 %v7146_v54  ;;  %4223 = vmatprep.subr.bf16.mxu1 %v7147_v5  ;;  %v7157_v54 = vld [vmem:[#allocation29_spill] sm:$0xff]  ;;  %v7158_v5 = vld [vmem:[#allocation30_spill] sm:$0xff] }
 0x5e8   :  { %4161 = vmatpush1.bf16.msra.mxu0 %v7148_v38  ;;  %4225 = vmatpush1.bf16.msra.mxu1 %v7149_v28  ;;  %v7159_v38 = vld [vmem:[#allocation31_spill] sm:$0xff]  ;;  %v7160_v28 = vld [vmem:[#allocation32_spill] sm:$0xff] }
 0x5e9   :  { %4163 = vmatprep.subr.bf16.mxu0 %v7150_v22  ;;  %4227 = vmatprep.subr.bf16.mxu1 %v7151_v4  ;;  %v7161_v22 = vld [vmem:[#allocation33_spill] sm:$0xff]  ;;  %v7162_v4 = vld [vmem:[#allocation34_spill] sm:$0xff] }
 0x5ec   :  { %4165 = vmatpush1.bf16.msra.mxu0 %v7152_v13  ;;  %4229 = vmatpush1.bf16.msra.mxu1 %v7153_v3  ;;  %v7163_v13 = vld [vmem:[#allocation35_spill] sm:$0xff]  ;;  %v7164_v3 = vld [vmem:[#allocation36_spill] sm:$0xff] }
 0x5ed   :  { %4167 = vmatprep.subr.bf16.mxu0 %v7154_v1  ;;  %4231 = vmatprep.subr.bf16.mxu1 %v7155_v12  ;;  %v7165_v1 = vld [vmem:[#allocation37_spill] sm:$0xff]  ;;  %v7166_v12 = vld [vmem:[#allocation38_spill] sm:$0xff] }
 0x5f0   :  { %4169 = vmatpush1.bf16.msra.mxu0 %v7156_v40  ;;  %4233 = vmatpush1.bf16.msra.mxu1 %v7157_v54  ;;  %v7167_v40 = vld [vmem:[#allocation39_spill] sm:$0xff]  ;;  %v7168_v54 = vld [vmem:[#allocation40_spill] sm:$0xff] }
 0x5f1   :  { %4171 = vmatprep.subr.bf16.mxu0 %v7158_v5  ;;  %4235 = vmatprep.subr.bf16.mxu1 %v7159_v38  ;;  %v7169_v5 = vld [vmem:[#allocation41_spill] sm:$0xff]  ;;  %v7170_v38 = vld [vmem:[#allocation42_spill] sm:$0xff] }
 0x5f4   :  { %4173 = vmatpush1.bf16.msra.mxu0 %v7160_v28  ;;  %4237 = vmatpush1.bf16.msra.mxu1 %v7161_v22  ;;  %v7171_v28 = vld [vmem:[#allocation43_spill] sm:$0xff]  ;;  %v7172_v22 = vld [vmem:[#allocation44_spill] sm:$0xff] }
 0x5f5   :  { %4175 = vmatprep.subr.bf16.mxu0 %v7162_v4  ;;  %4239 = vmatprep.subr.bf16.mxu1 %v7163_v13  ;;  %v7173_v4 = vld [vmem:[#allocation45_spill] sm:$0xff]  ;;  %v7174_v13 = vld [vmem:[#allocation46_spill] sm:$0xff] }
 0x5f8   :  { %4177 = vmatpush1.bf16.msra.mxu0 %v7164_v3  ;;  %4241 = vmatpush1.bf16.msra.mxu1 %v7165_v1  ;;  %v7175_v3 = vld [vmem:[#allocation47_spill] sm:$0xff]  ;;  %v7176_v1 = vld [vmem:[#allocation48_spill] sm:$0xff] }
 0x5f9   :  { %4179 = vmatprep.subr.bf16.mxu0 %v7166_v12  ;;  %4243 = vmatprep.subr.bf16.mxu1 %v7167_v40  ;;  %v7177_v12 = vld [vmem:[#allocation49_spill] sm:$0xff]  ;;  %v7178_v40 = vld [vmem:[#allocation50_spill] sm:$0xff] }
 0x5fc   :  { %4181 = vmatpush1.bf16.msra.mxu0 %v7168_v54  ;;  %4245 = vmatpush1.bf16.msra.mxu1 %v7169_v5  ;;  %v7179_v54 = vld [vmem:[#allocation51_spill] sm:$0xff]  ;;  %v7180_v5 = vld [vmem:[#allocation52_spill] sm:$0xff] }
 0x5fd   :  { %4183 = vmatprep.subr.bf16.mxu0 %v7170_v38  ;;  %4247 = vmatprep.subr.bf16.mxu1 %v7171_v28  ;;  %v7181_v38 = vld [vmem:[#allocation53_spill] sm:$0xff]  ;;  %v7182_v28 = vld [vmem:[#allocation54_spill] sm:$0xff] }
 0x600   :  { %4185 = vmatpush1.bf16.msra.mxu0 %v7172_v22  ;;  %4249 = vmatpush1.bf16.msra.mxu1 %v7173_v4  ;;  %v7183_v22 = vld [vmem:[#allocation55_spill] sm:$0xff]  ;;  %v7184_v4 = vld [vmem:[#allocation56_spill] sm:$0xff] }
 0x601   :  { %4187 = vmatprep.subr.bf16.mxu0 %v7174_v13  ;;  %4251 = vmatprep.subr.bf16.mxu1 %v7175_v3  ;;  %v7185_v13 = vld [vmem:[#allocation57_spill] sm:$0xff]  ;;  %v7186_v3 = vld [vmem:[#allocation4_spill] sm:$0xff] }
 0x604   :  { %4189 = vmatpush1.bf16.msra.mxu0 %v7176_v1  ;;  %4253 = vmatpush1.bf16.msra.mxu1 %v7177_v12  ;;  %v7187_v1 = vld [vmem:[#allocation5_spill] sm:$0xff] }
 0x605   :  { %4191 = vmatprep.subr.bf16.mxu0 %v7178_v40  ;;  %4255 = vmatprep.subr.bf16.mxu1 %v7179_v54 }
 0x608   :  { %4193 = vmatpush1.bf16.msra.mxu0 %v7180_v5  ;;  %4257 = vmatpush1.bf16.msra.mxu1 %v7181_v38 }
 0x609   :  { %4195 = vmatprep.subr.bf16.mxu0 %v7182_v28  ;;  %4259 = vmatprep.subr.bf16.mxu1 %v7183_v22 }
 0x60c   :  { %4197 = vmatpush1.bf16.msra.mxu0 %v7184_v4  ;;  %4261 = vmatpush1.bf16.msra.mxu1 %v7185_v13 }
 0x60d   :  { %4263 = vmatprep.subr.bf16.mxu0 %v7186_v3  ;;  %4295 = vmatprep.subr.bf16.mxu1 %v7187_v1 }
 0x682   :  { %v1869_v12 = vpop.f32.mrb[18].mxu0  ;;  %v1940_v40 = vpop.f32.mrb[18].mxu1 }
 0x683   :  { %v1870_v54 = vadd.f32 %v1869_v12, %v7188_v56  ;;  %v1871_v16 = vpop.f32.mrb[19].mxu0  ;;  %v1942_v5 = vpop.f32.mrb[19].mxu1  ;;  %v1941_v13 = vadd.f32 %v1940_v40, %v5951_v32 }
 0x684   :  { %v1872_v38 = vadd.f32 %v1871_v16, %v5944_v39  ;;  %v1943_v4 = vadd.f32 %v1942_v5, %v5948_v20 }
 0x685   :  { %v3073_v6 = vmul.f32 -1.442695, %v1870_v54 }
 0x686   :  { %v3074_v28 = vmul.f32 -1.442695, %v1872_v38  ;;  %v3075_v22 = vmul.f32 -1.442695, %v1943_v4  ;;  %v3077_v4 = vld [vmem:[%s6747_s0 + $0xa0] sm:$0xff] }
 0x687   :  { %4791 = vpow2.f32 %v3073_v6 }
 0x688   :  { %4793 = vpow2.f32 %v3074_v28 }
 0x689   :  { %4795 = vpow2.f32 %v3075_v22  ;;  %v3078_v22 = vld [vmem:[%s6747_s0 + $0xa8] sm:$0xff] }
 0x68a   :  { %4797 = vtanh.f32 %v1941_v13 }
 0x691   :  { %v4792_v3 = vpop.eup %4791 }
 0x692   :  { %v4794_v57 = vpop.eup %4793  ;;  %v1948_v1 = vadd.f32 1.0, %v4792_v3 }
 0x693   :  { %v1954_v44 = vadd.f32 1.0, %v4794_v57  ;;  %v4796_v12 = vpop.eup %4795 }
 0x694   :  { %4799 = vrcp.f32 %v1948_v1  ;;  %v4798_v56 = vpop.eup %4797  ;;  %v1961_v6 = vadd.f32 1.0, %v4796_v12  ;;  %v3080_v12 = vld [vmem:[%s6747_s0 + $0xb8] sm:$0xff] }
 0x695   :  { %4801 = vrcp.f32 %v1954_v44 }
 0x696   :  { %4803 = vrcp.f32 %v1961_v6 }
 0x69e   :  { %v4800_v16 = vpop.eup %4799 }
 0x69f   :  { %v4802_v54 = vpop.eup %4801  ;;  %v1965_v38 = vmul.f32 %v4800_v16, %v4798_v56 }
 0x6a0   :  { %v1964_v28 = vmul.f32 %v4802_v54, %v6338_v35  ;;  %v3079_v54 = vld [vmem:[%s6747_s0 + $0xb0] sm:$0xff] }
 0x6a2   :  { %v2042_v13 = vpop.f32.mrb[20].mxu0  ;;  %v2113_v57 = vpop.f32.mrb[20].mxu1  ;;  %v6463_v3 = vadd.f32 %v1965_v38, %v1964_v28 }
 0x6a3   :  { %v2118_v44 = vadd.f32 %v3077_v4, %v2042_v13  ;;  %v2044_v1 = vpop.f32.mrb[21].mxu0  ;;  %v2115_v40 = vpop.f32.mrb[21].mxu1  ;;  %v2120_v4 = vadd.f32 %v3079_v54, %v2113_v57 }
 0x6a4   :  { %v2119_v56 = vadd.f32 %v3078_v22, %v2044_v1  ;;  %4805 = vtanh.f32 %v6463_v3  ;;  %v2121_v16 = vadd.f32 %v3080_v12, %v2115_v40  ;;  %v4804_v38 = vpop.eup %4803 }
 0x6a5   :  { %v3081_v35 = vmul.f32 -1.442695, %v2118_v44 }
 0x6a6   :  { %v3082_v5 = vmul.f32 -1.442695, %v2119_v56  ;;  %v3083_v28 = vmul.f32 -1.442695, %v2121_v16 }
 0x6a7   :  { %4807 = vpow2.f32 %v3081_v35 }
 0x6a8   :  { %4809 = vpow2.f32 %v3082_v5 }
 0x6a9   :  { %4811 = vpow2.f32 %v3083_v28 }
 0x6aa   :  { %4813 = vtanh.f32 %v2120_v4  ;;  %v7190_v4 = vld [vmem:[#allocation9_spill] sm:$0xff] }
 0x6ae   :  { %v4806_v6 = vpop.eup %4805 }
 0x6af   :  { %v1968_v22 = vmul.f32 %v4806_v6, %v4804_v38 }
 0x6b1   :  { %v4808_v13 = vpop.eup %4807  ;;  %3076 = vst [vmem:[%s6750_s6 + $0x20] sm:$0xff] %v1968_v22  ;;  %2210 = vmatprep.mubr.f32.mxu0 %v1968_v22  ;;  %2281 = vmatprep.mubr.f32.mxu1 %v1968_v22 }
 0x6b2   :  { %v4810_v44 = vpop.eup %4809  ;;  %v2125_v1 = vadd.f32 1.0, %v4808_v13  ;;  %v7191_v13 = vld [vmem:[#allocation7_spill] sm:$0xff] }
 0x6b3   :  { %v2131_v40 = vadd.f32 1.0, %v4810_v44  ;;  %v4812_v56 = vpop.eup %4811  ;;  %v7192_v44 = vld [vmem:[#allocation11_spill] sm:$0xff] }
 0x6b4   :  { %4815 = vrcp.f32 %v2125_v1  ;;  %v4814_v35 = vpop.eup %4813  ;;  %v2138_v16 = vadd.f32 1.0, %v4812_v56  ;;  %v7193_v1 = vld [vmem:[#allocation8_spill] sm:$0xff]  ;;  %v7195_v56 = vld [vmem:[#allocation10_spill] sm:$0xff] }
 0x6b5   :  { %4817 = vrcp.f32 %v2131_v40  ;;  %v7194_v40 = vld [vmem:[#allocation12_spill] sm:$0xff] }
 0x6b6   :  { %4819 = vrcp.f32 %v2138_v16  ;;  %v7200_v16 = vld [vmem:[#allocation17_spill] sm:$0xff] }
 0x6be   :  { %v4816_v5 = vpop.eup %4815 }
 0x6bf   :  { %v4818_v12 = vpop.eup %4817  ;;  %v2142_v57 = vmul.f32 %v4816_v5, %v4814_v35  ;;  %v7196_v35 = vld [vmem:[#allocation13_spill] sm:$0xff]  ;;  %v7197_v5 = vld [vmem:[#allocation14_spill] sm:$0xff] }
 0x6c0   :  { %v2141_v54 = vmul.f32 %v4818_v12, %v6351_v49  ;;  %v4820_v6 = vpop.eup %4819  ;;  %v7189_v49 = vld [vmem:[#allocation6_spill] sm:$0xff]  ;;  %v7198_v12 = vld [vmem:[#allocation15_spill] sm:$0xff] }
 0x6c2   :  { %v6476_v38 = vadd.f32 %v2142_v57, %v2141_v54  ;;  %v7199_v57 = vld [vmem:[#allocation16_spill] sm:$0xff]  ;;  %v7201_v54 = vld [vmem:[#allocation18_spill] sm:$0xff] }
 0x6c4   :  { %4821 = vtanh.f32 %v6476_v38 }
 0x6ce   :  { %v4822_v22 = vpop.eup %4821 }
 0x6cf   :  { %v2145_v28 = vmul.f32 %v4822_v22, %v4820_v6  ;;  %v7202_v6 = vld [vmem:[#allocation19_spill] sm:$0xff]  ;;  %v7203_v22 = vld [vmem:[#allocation20_spill] sm:$0xff] }
 0x6d1   :  { %2211 = vmatmul.mubr.f32.vlgmr.msra.gmra.mrb[22].mxu0 %v2145_v28  ;;  %2282 = vmatmul.mubr.f32.vlgmr.msra.gmra.mrb[22].mxu1 %v2145_v28 }
 0x6d2   :  { %4265 = vmatpush1.bf16.msra.mxu0 %v4971_v8  ;;  %4297 = vmatpush1.bf16.msra.mxu1 %v5020_v25 }
 0x6d3   :  { %4267 = vmatprep.subr.bf16.mxu0 %v4973_v9  ;;  %4299 = vmatprep.subr.bf16.mxu1 %v5045_v33 }
 0x6d4   :  { %2383 = vmatprep.mubr.f32.mxu0 %v6919_v59  ;;  %2454 = vmatprep.mubr.f32.mxu1 %v6919_v59 }
 0x6d6   :  { %4269 = vmatpush1.bf16.msra.mxu0 %v4989_v14  ;;  %4301 = vmatpush1.bf16.msra.mxu1 %v5056_v37 }
 0x6d7   :  { %4271 = vmatprep.subr.bf16.mxu0 %v4998_v17  ;;  %4303 = vmatprep.subr.bf16.mxu1 %v5080_v45 }
 0x6da   :  { %4273 = vmatpush1.bf16.msra.mxu0 %v5023_v26  ;;  %4305 = vmatpush1.bf16.msra.mxu1 %v5089_v48 }
 0x6db   :  { %4275 = vmatprep.subr.bf16.mxu0 %v5036_v30  ;;  %4307 = vmatprep.subr.bf16.mxu1 %v5101_v52 }
 0x6de   :  { %4277 = vmatpush1.bf16.msra.mxu0 %v5072_v42  ;;  %4309 = vmatpush1.bf16.msra.mxu1 %v5131_v62 }
 0x6df   :  { %4279 = vmatprep.subr.bf16.mxu0 %v5083_v46  ;;  %4311 = vmatprep.subr.bf16.mxu1 %v5137_v0 }
 0x6e2   :  { %4281 = vmatpush1.bf16.msra.mxu0 %v5110_v55  ;;  %4313 = vmatpush1.bf16.msra.mxu1 %v5167_v15 }
 0x6e3   :  { %4283 = vmatprep.subr.bf16.mxu0 %v5119_v58  ;;  %4315 = vmatprep.subr.bf16.mxu1 %v5173_v18 }
 0x6e6   :  { %4285 = vmatpush1.bf16.msra.mxu0 %v5152_v7  ;;  %4317 = vmatpush1.bf16.msra.mxu1 %v5200_v31 }
 0x6e7   :  { %4287 = vmatprep.subr.bf16.mxu0 %v5155_v10  ;;  %4319 = vmatprep.subr.bf16.mxu1 %v5206_v34 }
 0x6ea   :  { %4289 = vmatpush1.bf16.msra.mxu0 %v5188_v24  ;;  %4321 = vmatpush1.bf16.msra.mxu1 %v5228_v43 }
 0x6eb   :  { %4291 = vmatprep.subr.bf16.mxu0 %v5191_v27  ;;  %4323 = vmatprep.subr.bf16.mxu1 %v5242_v51 }
 0x6ee   :  { %4293 = vmatpush1.bf16.msra.mxu0 %v5224_v41  ;;  %4325 = vmatpush1.bf16.msra.mxu1 %v5266_v63 }
 0x6ef   :  { %4327 = vmatprep.subr.bf16.mxu0 %v5233_v47  ;;  %4391 = vmatprep.subr.bf16.mxu1 %v5281_v11 }
 0x6f1   :  { %2384 = vmatmul.mubr.f32.vlgmr.msra.gmra.mrb[24].mxu0 %v2145_v28  ;;  %2455 = vmatmul.mubr.f32.vlgmr.msra.gmra.mrb[24].mxu1 %v2145_v28  ;;  %v7204_v28 = vld [vmem:[#allocation21_spill] sm:$0xff] }
 0x6f2   :  { %4329 = vmatpush1.bf16.msra.mxu0 %v5263_v61  ;;  %4393 = vmatpush1.bf16.msra.mxu1 %v5302_v23 }
 0x6f3   :  { %4331 = vmatprep.subr.bf16.mxu0 %v5272_v2  ;;  %4395 = vmatprep.subr.bf16.mxu1 %v5317_v36 }
 0x6f6   :  { %4333 = vmatpush1.bf16.msra.mxu0 %v5299_v21  ;;  %4397 = vmatpush1.bf16.msra.mxu1 %v5338_v53 }
 0x6f7   :  { %4335 = vmatprep.subr.bf16.mxu0 %v5308_v29  ;;  %4399 = vmatprep.subr.bf16.mxu1 %v5353_v60 }
 0x6fa   :  { %4337 = vmatpush1.bf16.msra.mxu0 %v5335_v50  ;;  %4401 = vmatpush1.bf16.msra.mxu1 %v5374_v19 }
 0x6fb   :  { %4339 = vmatprep.subr.bf16.mxu0 %v7189_v49  ;;  %4403 = vmatprep.subr.bf16.mxu1 %v7190_v4 }
 0x6fe   :  { %4341 = vmatpush1.bf16.msra.mxu0 %v7191_v13  ;;  %4405 = vmatpush1.bf16.msra.mxu1 %v7192_v44 }
 0x6ff   :  { %4343 = vmatprep.subr.bf16.mxu0 %v7193_v1  ;;  %4407 = vmatprep.subr.bf16.mxu1 %v7194_v40  ;;  %v7205_v40 = vld [vmem:[#allocation22_spill] sm:$0xff] }
 0x700   :  { %v7243_v1 = vld [vmem:[#allocation58_spill] sm:$0xff] }
 0x702   :  { %4345 = vmatpush1.bf16.msra.mxu0 %v7195_v56  ;;  %4409 = vmatpush1.bf16.msra.mxu1 %v7196_v35  ;;  %v7206_v56 = vld [vmem:[#allocation23_spill] sm:$0xff]  ;;  %v7207_v35 = vld [vmem:[#allocation24_spill] sm:$0xff] }
 0x703   :  { %4347 = vmatprep.subr.bf16.mxu0 %v7197_v5  ;;  %4411 = vmatprep.subr.bf16.mxu1 %v7198_v12  ;;  %v7208_v5 = vld [vmem:[#allocation25_spill] sm:$0xff]  ;;  %v7209_v12 = vld [vmem:[#allocation26_spill] sm:$0xff] }
 0x706   :  { %4349 = vmatpush1.bf16.msra.mxu0 %v7199_v57  ;;  %4413 = vmatpush1.bf16.msra.mxu1 %v7200_v16  ;;  %v7210_v57 = vld [vmem:[#allocation27_spill] sm:$0xff]  ;;  %v7211_v16 = vld [vmem:[#allocation28_spill] sm:$0xff] }
 0x707   :  { %4351 = vmatprep.subr.bf16.mxu0 %v7201_v54  ;;  %4415 = vmatprep.subr.bf16.mxu1 %v7202_v6  ;;  %v7212_v54 = vld [vmem:[#allocation29_spill] sm:$0xff]  ;;  %v7213_v6 = vld [vmem:[#allocation30_spill] sm:$0xff] }
 0x70a   :  { %4353 = vmatpush1.bf16.msra.mxu0 %v7203_v22  ;;  %4417 = vmatpush1.bf16.msra.mxu1 %v7204_v28  ;;  %v7214_v22 = vld [vmem:[#allocation31_spill] sm:$0xff]  ;;  %v7215_v28 = vld [vmem:[#allocation32_spill] sm:$0xff] }
 0x70b   :  { %4355 = vmatprep.subr.bf16.mxu0 %v7205_v40  ;;  %4419 = vmatprep.subr.bf16.mxu1 %v7206_v56  ;;  %v7216_v40 = vld [vmem:[#allocation33_spill] sm:$0xff]  ;;  %v7217_v56 = vld [vmem:[#allocation34_spill] sm:$0xff] }
 0x70e   :  { %4357 = vmatpush1.bf16.msra.mxu0 %v7207_v35  ;;  %4421 = vmatpush1.bf16.msra.mxu1 %v7208_v5  ;;  %v7218_v35 = vld [vmem:[#allocation35_spill] sm:$0xff]  ;;  %v7219_v5 = vld [vmem:[#allocation36_spill] sm:$0xff] }
 0x70f   :  { %4359 = vmatprep.subr.bf16.mxu0 %v7209_v12  ;;  %4423 = vmatprep.subr.bf16.mxu1 %v7210_v57  ;;  %v7220_v12 = vld [vmem:[#allocation37_spill] sm:$0xff]  ;;  %v7221_v57 = vld [vmem:[#allocation38_spill] sm:$0xff] }
 0x712   :  { %4361 = vmatpush1.bf16.msra.mxu0 %v7211_v16  ;;  %4425 = vmatpush1.bf16.msra.mxu1 %v7212_v54  ;;  %v7222_v16 = vld [vmem:[#allocation39_spill] sm:$0xff]  ;;  %v7223_v54 = vld [vmem:[#allocation40_spill] sm:$0xff] }
 0x713   :  { %4363 = vmatprep.subr.bf16.mxu0 %v7213_v6  ;;  %4427 = vmatprep.subr.bf16.mxu1 %v7214_v22  ;;  %v7224_v6 = vld [vmem:[#allocation41_spill] sm:$0xff]  ;;  %v7225_v22 = vld [vmem:[#allocation42_spill] sm:$0xff] }
 0x716   :  { %4365 = vmatpush1.bf16.msra.mxu0 %v7215_v28  ;;  %4429 = vmatpush1.bf16.msra.mxu1 %v7216_v40  ;;  %v7226_v28 = vld [vmem:[#allocation43_spill] sm:$0xff]  ;;  %v7227_v40 = vld [vmem:[#allocation44_spill] sm:$0xff] }
 0x717   :  { %4367 = vmatprep.subr.bf16.mxu0 %v7217_v56  ;;  %4431 = vmatprep.subr.bf16.mxu1 %v7218_v35  ;;  %v7228_v56 = vld [vmem:[#allocation45_spill] sm:$0xff]  ;;  %v7229_v35 = vld [vmem:[#allocation46_spill] sm:$0xff] }
 0x71a   :  { %4369 = vmatpush1.bf16.msra.mxu0 %v7219_v5  ;;  %4433 = vmatpush1.bf16.msra.mxu1 %v7220_v12  ;;  %v7230_v5 = vld [vmem:[#allocation47_spill] sm:$0xff]  ;;  %v7231_v12 = vld [vmem:[#allocation48_spill] sm:$0xff] }
 0x71b   :  { %4371 = vmatprep.subr.bf16.mxu0 %v7221_v57  ;;  %4435 = vmatprep.subr.bf16.mxu1 %v7222_v16  ;;  %v7232_v57 = vld [vmem:[#allocation49_spill] sm:$0xff]  ;;  %v7233_v16 = vld [vmem:[#allocation50_spill] sm:$0xff] }
 0x71e   :  { %4373 = vmatpush1.bf16.msra.mxu0 %v7223_v54  ;;  %4437 = vmatpush1.bf16.msra.mxu1 %v7224_v6  ;;  %v7234_v54 = vld [vmem:[#allocation51_spill] sm:$0xff]  ;;  %v7235_v6 = vld [vmem:[#allocation52_spill] sm:$0xff] }
 0x71f   :  { %4375 = vmatprep.subr.bf16.mxu0 %v7225_v22  ;;  %4439 = vmatprep.subr.bf16.mxu1 %v7226_v28  ;;  %v7236_v22 = vld [vmem:[#allocation53_spill] sm:$0xff]  ;;  %v7237_v28 = vld [vmem:[#allocation54_spill] sm:$0xff] }
 0x722   :  { %4377 = vmatpush1.bf16.msra.mxu0 %v7227_v40  ;;  %4441 = vmatpush1.bf16.msra.mxu1 %v7228_v56  ;;  %v7238_v40 = vld [vmem:[#allocation55_spill] sm:$0xff]  ;;  %v7239_v56 = vld [vmem:[#allocation56_spill] sm:$0xff] }
 0x723   :  { %4379 = vmatprep.subr.bf16.mxu0 %v7229_v35  ;;  %4443 = vmatprep.subr.bf16.mxu1 %v7230_v5  ;;  %v7240_v35 = vld [vmem:[#allocation57_spill] sm:$0xff]  ;;  %v7241_v5 = vld [vmem:[#allocation4_spill] sm:$0xff] }
 0x726   :  { %4381 = vmatpush1.bf16.msra.mxu0 %v7231_v12  ;;  %4445 = vmatpush1.bf16.msra.mxu1 %v7232_v57  ;;  %v7242_v12 = vld [vmem:[#allocation5_spill] sm:$0xff] }
 0x727   :  { %4383 = vmatprep.subr.bf16.mxu0 %v7233_v16  ;;  %4447 = vmatprep.subr.bf16.mxu1 %v7234_v54 }
 0x72a   :  { %4385 = vmatpush1.bf16.msra.mxu0 %v7235_v6  ;;  %4449 = vmatpush1.bf16.msra.mxu1 %v7236_v22 }
 0x72b   :  { %4387 = vmatprep.subr.bf16.mxu0 %v7237_v28  ;;  %4451 = vmatprep.subr.bf16.mxu1 %v7238_v40 }
 0x72e   :  { %4389 = vmatpush1.bf16.msra.mxu0 %v7239_v56  ;;  %4453 = vmatpush1.bf16.msra.mxu1 %v7240_v35 }
 0x72f   :  { %4455 = vmatprep.subr.bf16.mxu0 %v7241_v5  ;;  %4487 = vmatprep.subr.bf16.mxu1 %v7242_v12 }
 0x7a4   :  { %v2212_v57 = vpop.f32.mrb[22].mxu0  ;;  %v2283_v16 = vpop.f32.mrb[22].mxu1 }
 0x7a5   :  { %v2213_v54 = vadd.f32 %v2212_v57, %v7243_v1  ;;  %v2214_v44 = vpop.f32.mrb[23].mxu0  ;;  %v2285_v6 = vpop.f32.mrb[23].mxu1  ;;  %v2284_v35 = vadd.f32 %v2283_v16, %v5951_v32 }
 0x7a6   :  { %v2215_v22 = vadd.f32 %v2214_v44, %v5944_v39  ;;  %v2286_v56 = vadd.f32 %v2285_v6, %v5948_v20 }
 0x7a7   :  { %v3084_v13 = vmul.f32 -1.442695, %v2213_v54 }
 0x7a8   :  { %v3085_v28 = vmul.f32 -1.442695, %v2215_v22  ;;  %v3086_v40 = vmul.f32 -1.442695, %v2286_v56  ;;  %v3088_v56 = vld [vmem:[%s6747_s0 + $0xc0] sm:$0xff] }
 0x7a9   :  { %4823 = vpow2.f32 %v3084_v13 }
 0x7aa   :  { %4825 = vpow2.f32 %v3085_v28 }
 0x7ab   :  { %4827 = vpow2.f32 %v3086_v40  ;;  %v3089_v40 = vld [vmem:[%s6747_s0 + $0xc8] sm:$0xff] }
 0x7ac   :  { %4829 = vtanh.f32 %v2284_v35 }
 0x7b3   :  { %v4824_v5 = vpop.eup %4823 }
 0x7b4   :  { %v4826_v4 = vpop.eup %4825  ;;  %v2291_v12 = vadd.f32 1.0, %v4824_v5 }
 0x7b5   :  { %v2297_v49 = vadd.f32 1.0, %v4826_v4  ;;  %v4828_v57 = vpop.eup %4827 }
 0x7b6   :  { %4831 = vrcp.f32 %v2291_v12  ;;  %v4830_v1 = vpop.eup %4829  ;;  %v2304_v13 = vadd.f32 1.0, %v4828_v57  ;;  %v3091_v57 = vld [vmem:[%s6747_s0 + $0xd8] sm:$0xff] }
 0x7b7   :  { %4833 = vrcp.f32 %v2297_v49 }
 0x7b8   :  { %4835 = vrcp.f32 %v2304_v13 }
 0x7c0   :  { %v4832_v44 = vpop.eup %4831 }
 0x7c1   :  { %v4834_v54 = vpop.eup %4833  ;;  %v2308_v22 = vmul.f32 %v4832_v44, %v4830_v1 }
 0x7c2   :  { %v2307_v28 = vmul.f32 %v4834_v54, %v6463_v3  ;;  %v3090_v54 = vld [vmem:[%s6747_s0 + $0xd0] sm:$0xff] }
 0x7c4   :  { %v2385_v35 = vpop.f32.mrb[24].mxu0  ;;  %v2456_v4 = vpop.f32.mrb[24].mxu1  ;;  %v6588_v16 = vadd.f32 %v2308_v22, %v2307_v28 }
 0x7c5   :  { %v2461_v49 = vadd.f32 %v3088_v56, %v2385_v35  ;;  %v2387_v6 = vpop.f32.mrb[25].mxu0  ;;  %v2458_v5 = vpop.f32.mrb[25].mxu1  ;;  %v2463_v56 = vadd.f32 %v3090_v54, %v2456_v4 }
 0x7c6   :  { %v2462_v1 = vadd.f32 %v3089_v40, %v2387_v6  ;;  %4837 = vtanh.f32 %v6588_v16  ;;  %v2464_v44 = vadd.f32 %v3091_v57, %v2458_v5  ;;  %v4836_v22 = vpop.eup %4835 }
 0x7c7   :  { %v3092_v3 = vmul.f32 -1.442695, %v2461_v49 }
 0x7c8   :  { %v3093_v12 = vmul.f32 -1.442695, %v2462_v1  ;;  %v3094_v28 = vmul.f32 -1.442695, %v2464_v44 }
 0x7c9   :  { %4839 = vpow2.f32 %v3092_v3 }
 0x7ca   :  { %4841 = vpow2.f32 %v3093_v12 }
 0x7cb   :  { %4843 = vpow2.f32 %v3094_v28 }
 0x7cc   :  { %4845 = vtanh.f32 %v2463_v56  ;;  %v7288_v56 = vld [vmem:[#allocation50_spill] sm:$0xff] }
 0x7d0   :  { %v4838_v13 = vpop.eup %4837 }
 0x7d1   :  { %v2311_v40 = vmul.f32 %v4838_v13, %v4836_v22 }
 0x7d3   :  { %v4840_v35 = vpop.eup %4839  ;;  %3087 = vst [vmem:[%s6750_s6 + $0x28] sm:$0xff] %v2311_v40  ;;  %2553 = vmatprep.mubr.f32.mxu0 %v2311_v40  ;;  %2624 = vmatprep.mubr.f32.mxu1 %v2311_v40 }
 0x7d4   :  { %v4842_v49 = vpop.eup %4841  ;;  %v2468_v6 = vadd.f32 1.0, %v4840_v35  ;;  %v7289_v35 = vld [vmem:[#allocation51_spill] sm:$0xff] }
 0x7d5   :  { %v2474_v5 = vadd.f32 1.0, %v4842_v49  ;;  %v4844_v1 = vpop.eup %4843  ;;  %v7290_v49 = vld [vmem:[#allocation52_spill] sm:$0xff] }
 0x7d6   :  { %4847 = vrcp.f32 %v2468_v6  ;;  %v4846_v3 = vpop.eup %4845  ;;  %v2481_v44 = vadd.f32 1.0, %v4844_v1  ;;  %v7291_v6 = vld [vmem:[#allocation53_spill] sm:$0xff]  ;;  %v7293_v1 = vld [vmem:[#allocation55_spill] sm:$0xff] }
 0x7d7   :  { %4849 = vrcp.f32 %v2474_v5  ;;  %v7292_v5 = vld [vmem:[#allocation54_spill] sm:$0xff] }
 0x7d8   :  { %4851 = vrcp.f32 %v2481_v44  ;;  %v7296_v44 = vld [vmem:[#allocation58_spill] sm:$0xff] }
 0x7e0   :  { %v4848_v12 = vpop.eup %4847 }
 0x7e1   :  { %v4850_v57 = vpop.eup %4849  ;;  %v2485_v4 = vmul.f32 %v4848_v12, %v4846_v3  ;;  %v7294_v3 = vld [vmem:[#allocation56_spill] sm:$0xff]  ;;  %v7295_v12 = vld [vmem:[#allocation57_spill] sm:$0xff] }
 0x7e2   :  { %v2484_v54 = vmul.f32 %v4850_v57, %v6476_v38  ;;  %v4852_v13 = vpop.eup %4851  ;;  %v7287_v38 = vld [vmem:[#allocation49_spill] sm:$0xff] }
 0x7e4   :  { %v6601_v22 = vadd.f32 %v2485_v4, %v2484_v54 }
 0x7e6   :  { %4853 = vtanh.f32 %v6601_v22 }
 0x7f0   :  { %v4854_v40 = vpop.eup %4853 }
 0x7f1   :  { %v2488_v28 = vmul.f32 %v4854_v40, %v4852_v13 }
 0x7f3   :  { %2554 = vmatmul.mubr.f32.vlgmr.msra.gmra.mrb[26].mxu0 %v2488_v28  ;;  %2625 = vmatmul.mubr.f32.vlgmr.msra.gmra.mrb[26].mxu1 %v2488_v28 }
 0x7f4   :  { %4457 = vmatpush1.bf16.msra.mxu0 %v4971_v8  ;;  %4489 = vmatpush1.bf16.msra.mxu1 %v5020_v25  ;;  %v7244_v8 = vld [vmem:[#allocation6_spill] sm:$0xff]  ;;  %v7248_v25 = vld [vmem:[#allocation8_spill] sm:$0xff] }
 0x7f5   :  { %4459 = vmatprep.subr.bf16.mxu0 %v4973_v9  ;;  %4491 = vmatprep.subr.bf16.mxu1 %v5045_v33  ;;  %v7245_v9 = vld [vmem:[#allocation9_spill] sm:$0xff] }
 0x7f6   :  { %2726 = vmatprep.mubr.f32.mxu0 %v6919_v59  ;;  %2797 = vmatprep.mubr.f32.mxu1 %v6919_v59  ;;  %v7251_v33 = vld [vmem:[#allocation13_spill] sm:$0xff]  ;;  %v7286_v59 = vld [vmem:[#allocation48_spill] sm:$0xff] }
 0x7f8   :  { %4461 = vmatpush1.bf16.msra.mxu0 %v4989_v14  ;;  %4493 = vmatpush1.bf16.msra.mxu1 %v5056_v37  ;;  %v7246_v14 = vld [vmem:[#allocation7_spill] sm:$0xff]  ;;  %v7252_v37 = vld [vmem:[#allocation14_spill] sm:$0xff] }
 0x7f9   :  { %4463 = vmatprep.subr.bf16.mxu0 %v4998_v17  ;;  %4495 = vmatprep.subr.bf16.mxu1 %v5080_v45  ;;  %v7247_v17 = vld [vmem:[#allocation11_spill] sm:$0xff]  ;;  %v7254_v45 = vld [vmem:[#allocation16_spill] sm:$0xff] }
 0x7fc   :  { %4465 = vmatpush1.bf16.msra.mxu0 %v5023_v26  ;;  %4497 = vmatpush1.bf16.msra.mxu1 %v5089_v48  ;;  %v7249_v26 = vld [vmem:[#allocation12_spill] sm:$0xff]  ;;  %v7256_v48 = vld [vmem:[#allocation18_spill] sm:$0xff] }
 0x7fd   :  { %4467 = vmatprep.subr.bf16.mxu0 %v5036_v30  ;;  %4499 = vmatprep.subr.bf16.mxu1 %v5101_v52  ;;  %v7250_v30 = vld [vmem:[#allocation10_spill] sm:$0xff]  ;;  %v7257_v52 = vld [vmem:[#allocation19_spill] sm:$0xff] }
 0x800   :  { %4469 = vmatpush1.bf16.msra.mxu0 %v5072_v42  ;;  %4501 = vmatpush1.bf16.msra.mxu1 %v5131_v62  ;;  %v7253_v42 = vld [vmem:[#allocation15_spill] sm:$0xff]  ;;  %v7260_v62 = vld [vmem:[#allocation22_spill] sm:$0xff] }
 0x801   :  { %4471 = vmatprep.subr.bf16.mxu0 %v5083_v46  ;;  %4503 = vmatprep.subr.bf16.mxu1 %v5137_v0  ;;  %v7255_v46 = vld [vmem:[#allocation17_spill] sm:$0xff]  ;;  %v7261_v0 = vld [vmem:[#allocation23_spill] sm:$0xff] }
 0x804   :  { %4473 = vmatpush1.bf16.msra.mxu0 %v5110_v55  ;;  %4505 = vmatpush1.bf16.msra.mxu1 %v5167_v15  ;;  %v7258_v55 = vld [vmem:[#allocation20_spill] sm:$0xff]  ;;  %v7264_v15 = vld [vmem:[#allocation26_spill] sm:$0xff] }
 0x805   :  { %4475 = vmatprep.subr.bf16.mxu0 %v5119_v58  ;;  %4507 = vmatprep.subr.bf16.mxu1 %v5173_v18  ;;  %v7259_v58 = vld [vmem:[#allocation21_spill] sm:$0xff]  ;;  %v7265_v18 = vld [vmem:[#allocation27_spill] sm:$0xff] }
 0x808   :  { %4477 = vmatpush1.bf16.msra.mxu0 %v5152_v7  ;;  %4509 = vmatpush1.bf16.msra.mxu1 %v5200_v31  ;;  %v7262_v7 = vld [vmem:[#allocation24_spill] sm:$0xff]  ;;  %v7268_v31 = vld [vmem:[#allocation30_spill] sm:$0xff] }
 0x809   :  { %4479 = vmatprep.subr.bf16.mxu0 %v5155_v10  ;;  %4511 = vmatprep.subr.bf16.mxu1 %v5206_v34  ;;  %v7263_v10 = vld [vmem:[#allocation25_spill] sm:$0xff]  ;;  %v7269_v34 = vld [vmem:[#allocation31_spill] sm:$0xff] }
 0x80c   :  { %4481 = vmatpush1.bf16.msra.mxu0 %v5188_v24  ;;  %4513 = vmatpush1.bf16.msra.mxu1 %v5228_v43  ;;  %v7266_v24 = vld [vmem:[#allocation28_spill] sm:$0xff]  ;;  %v7271_v43 = vld [vmem:[#allocation33_spill] sm:$0xff] }
 0x80d   :  { %4483 = vmatprep.subr.bf16.mxu0 %v5191_v27  ;;  %4515 = vmatprep.subr.bf16.mxu1 %v5242_v51  ;;  %v7267_v27 = vld [vmem:[#allocation29_spill] sm:$0xff]  ;;  %v7273_v51 = vld [vmem:[#allocation35_spill] sm:$0xff] }
 0x810   :  { %4485 = vmatpush1.bf16.msra.mxu0 %v5224_v41  ;;  %4517 = vmatpush1.bf16.msra.mxu1 %v5266_v63  ;;  %v7270_v41 = vld [vmem:[#allocation32_spill] sm:$0xff]  ;;  %v7275_v63 = vld [vmem:[#allocation37_spill] sm:$0xff] }
 0x811   :  { %4519 = vmatprep.subr.bf16.mxu0 %v5233_v47  ;;  %4583 = vmatprep.subr.bf16.mxu1 %v5281_v11  ;;  %v7272_v47 = vld [vmem:[#allocation34_spill] sm:$0xff]  ;;  %v7277_v11 = vld [vmem:[#allocation39_spill] sm:$0xff] }
 0x813   :  { %2727 = vmatmul.mubr.f32.vlgmr.msra.gmra.mrb[28].mxu0 %v2488_v28  ;;  %2798 = vmatmul.mubr.f32.vlgmr.msra.gmra.mrb[28].mxu1 %v2488_v28 }
 0x814   :  { %4521 = vmatpush1.bf16.msra.mxu0 %v5263_v61  ;;  %4585 = vmatpush1.bf16.msra.mxu1 %v5302_v23  ;;  %v7274_v61 = vld [vmem:[#allocation36_spill] sm:$0xff]  ;;  %v7279_v23 = vld [vmem:[#allocation41_spill] sm:$0xff] }
 0x815   :  { %4523 = vmatprep.subr.bf16.mxu0 %v5272_v2  ;;  %4587 = vmatprep.subr.bf16.mxu1 %v5317_v36  ;;  %v7276_v2 = vld [vmem:[#allocation38_spill] sm:$0xff]  ;;  %v7281_v36 = vld [vmem:[#allocation43_spill] sm:$0xff] }
 0x818   :  { %4525 = vmatpush1.bf16.msra.mxu0 %v5299_v21  ;;  %4589 = vmatpush1.bf16.msra.mxu1 %v5338_v53  ;;  %v7278_v21 = vld [vmem:[#allocation40_spill] sm:$0xff]  ;;  %v7283_v53 = vld [vmem:[#allocation45_spill] sm:$0xff] }
 0x819   :  { %4527 = vmatprep.subr.bf16.mxu0 %v5308_v29  ;;  %4591 = vmatprep.subr.bf16.mxu1 %v5353_v60  ;;  %v7280_v29 = vld [vmem:[#allocation42_spill] sm:$0xff] }
 0x81a   :  { %v7284_v60 = vld [vmem:[#allocation46_spill] sm:$0xff] }
 0x81c   :  { %4529 = vmatpush1.bf16.msra.mxu0 %v5335_v50  ;;  %4593 = vmatpush1.bf16.msra.mxu1 %v5374_v19  ;;  %v7282_v50 = vld [vmem:[#allocation44_spill] sm:$0xff]  ;;  %v7285_v19 = vld [vmem:[#allocation47_spill] sm:$0xff] }
 0x81d   :  { %4531 = vmatprep.subr.bf16.mxu0 %v7244_v8  ;;  %4595 = vmatprep.subr.bf16.mxu1 %v7245_v9 }
 0x820   :  { %4533 = vmatpush1.bf16.msra.mxu0 %v7246_v14  ;;  %4597 = vmatpush1.bf16.msra.mxu1 %v7247_v17 }
 0x821   :  { %4535 = vmatprep.subr.bf16.mxu0 %v7248_v25  ;;  %4599 = vmatprep.subr.bf16.mxu1 %v7249_v26 }
 0x824   :  { %4537 = vmatpush1.bf16.msra.mxu0 %v7250_v30  ;;  %4601 = vmatpush1.bf16.msra.mxu1 %v7251_v33 }
 0x825   :  { %4539 = vmatprep.subr.bf16.mxu0 %v7252_v37  ;;  %4603 = vmatprep.subr.bf16.mxu1 %v7253_v42 }
 0x828   :  { %4541 = vmatpush1.bf16.msra.mxu0 %v7254_v45  ;;  %4605 = vmatpush1.bf16.msra.mxu1 %v7255_v46 }
 0x829   :  { %4543 = vmatprep.subr.bf16.mxu0 %v7256_v48  ;;  %4607 = vmatprep.subr.bf16.mxu1 %v7257_v52 }
 0x82c   :  { %4545 = vmatpush1.bf16.msra.mxu0 %v7258_v55  ;;  %4609 = vmatpush1.bf16.msra.mxu1 %v7259_v58 }
 0x82d   :  { %4547 = vmatprep.subr.bf16.mxu0 %v7260_v62  ;;  %4611 = vmatprep.subr.bf16.mxu1 %v7261_v0  ;;  %v3099_v62 = vld [vmem:[%s6747_s0 + $0xe0] sm:$0xff]  ;;  %v3100_v0 = vld [vmem:[%s6747_s0 + $0xe8] sm:$0xff] }
 0x830   :  { %4549 = vmatpush1.bf16.msra.mxu0 %v7262_v7  ;;  %4613 = vmatpush1.bf16.msra.mxu1 %v7263_v10 }
 0x831   :  { %4551 = vmatprep.subr.bf16.mxu0 %v7264_v15  ;;  %4615 = vmatprep.subr.bf16.mxu1 %v7265_v18 }
 0x834   :  { %4553 = vmatpush1.bf16.msra.mxu0 %v7266_v24  ;;  %4617 = vmatpush1.bf16.msra.mxu1 %v7267_v27 }
 0x835   :  { %4555 = vmatprep.subr.bf16.mxu0 %v7268_v31  ;;  %4619 = vmatprep.subr.bf16.mxu1 %v7269_v34 }
 0x838   :  { %4557 = vmatpush1.bf16.msra.mxu0 %v7270_v41  ;;  %4621 = vmatpush1.bf16.msra.mxu1 %v7271_v43  ;;  %v3102_v41 = vld [vmem:[%s6747_s0 + $0xf8] sm:$0xff] }
 0x839   :  { %4559 = vmatprep.subr.bf16.mxu0 %v7272_v47  ;;  %4623 = vmatprep.subr.bf16.mxu1 %v7273_v51  ;;  %v3101_v47 = vld [vmem:[%s6747_s0 + $0xf0] sm:$0xff] }
 0x83c   :  { %4561 = vmatpush1.bf16.msra.mxu0 %v7274_v61  ;;  %4625 = vmatpush1.bf16.msra.mxu1 %v7275_v63 }
 0x83d   :  { %4563 = vmatprep.subr.bf16.mxu0 %v7276_v2  ;;  %4627 = vmatprep.subr.bf16.mxu1 %v7277_v11 }
 0x840   :  { %4565 = vmatpush1.bf16.msra.mxu0 %v7278_v21  ;;  %4629 = vmatpush1.bf16.msra.mxu1 %v7279_v23 }
 0x841   :  { %4567 = vmatprep.subr.bf16.mxu0 %v7280_v29  ;;  %4631 = vmatprep.subr.bf16.mxu1 %v7281_v36 }
 0x844   :  { %4569 = vmatpush1.bf16.msra.mxu0 %v7282_v50  ;;  %4633 = vmatpush1.bf16.msra.mxu1 %v7283_v53 }
 0x845   :  { %4571 = vmatprep.subr.bf16.mxu0 %v7284_v60  ;;  %4635 = vmatprep.subr.bf16.mxu1 %v7285_v19 }
 0x848   :  { %4573 = vmatpush1.bf16.msra.mxu0 %v7286_v59  ;;  %4637 = vmatpush1.bf16.msra.mxu1 %v7287_v38 }
 0x849   :  { %4575 = vmatprep.subr.bf16.mxu0 %v7288_v56  ;;  %4639 = vmatprep.subr.bf16.mxu1 %v7289_v35 }
 0x84c   :  { %4577 = vmatpush1.bf16.msra.mxu0 %v7290_v49  ;;  %4641 = vmatpush1.bf16.msra.mxu1 %v7291_v6 }
 0x84d   :  { %4579 = vmatprep.subr.bf16.mxu0 %v7292_v5  ;;  %4643 = vmatprep.subr.bf16.mxu1 %v7293_v1 }
 0x850   :  { %4581 = vmatpush1.bf16.msra.mxu0 %v7294_v3  ;;  %4645 = vmatpush1.bf16.msra.mxu1 %v7295_v12 }
 0x8c6   :  { %v2555_v57 = vpop.f32.mrb[26].mxu0  ;;  %v2626_v4 = vpop.f32.mrb[26].mxu1 }
 0x8c7   :  { %v2556_v54 = vadd.f32 %v2555_v57, %v7296_v44  ;;  %v2557_v13 = vpop.f32.mrb[27].mxu0  ;;  %v2628_v40 = vpop.f32.mrb[27].mxu1  ;;  %v2627_v25 = vadd.f32 %v2626_v4, %v5951_v32 }
 0x8c8   :  { %v2558_v28 = vadd.f32 %v2557_v13, %v5944_v39  ;;  %v2629_v14 = vadd.f32 %v2628_v40, %v5948_v20 }
 0x8c9   :  { %v3095_v8 = vmul.f32 -1.442695, %v2556_v54 }
 0x8ca   :  { %v3096_v9 = vmul.f32 -1.442695, %v2558_v28  ;;  %v3097_v17 = vmul.f32 -1.442695, %v2629_v14 }
 0x8cb   :  { %4855 = vpow2.f32 %v3095_v8 }
 0x8cc   :  { %4857 = vpow2.f32 %v3096_v9 }
 0x8cd   :  { %4859 = vpow2.f32 %v3097_v17 }
 0x8ce   :  { %4861 = vtanh.f32 %v2627_v25 }
 0x8d5   :  { %v4856_v26 = vpop.eup %4855 }
 0x8d6   :  { %v4858_v30 = vpop.eup %4857  ;;  %v2634_v33 = vadd.f32 1.0, %v4856_v26 }
 0x8d7   :  { %v2640_v37 = vadd.f32 1.0, %v4858_v30  ;;  %v4860_v42 = vpop.eup %4859 }
 0x8d8   :  { %4863 = vrcp.f32 %v2634_v33  ;;  %v4862_v45 = vpop.eup %4861  ;;  %v2647_v55 = vadd.f32 1.0, %v4860_v42 }
 0x8d9   :  { %4865 = vrcp.f32 %v2640_v37 }
 0x8da   :  { %4867 = vrcp.f32 %v2647_v55 }
 0x8e2   :  { %v4864_v46 = vpop.eup %4863 }
 0x8e3   :  { %v4866_v48 = vpop.eup %4865  ;;  %v2651_v52 = vmul.f32 %v4864_v46, %v4862_v45 }
 0x8e4   :  { %v2650_v58 = vmul.f32 %v4866_v48, %v6588_v16  ;;  %v4868_v51 = vpop.eup %4867 }
 0x8e6   :  { %v2728_v7 = vpop.f32.mrb[28].mxu0  ;;  %v2799_v10 = vpop.f32.mrb[28].mxu1  ;;  %v6711_v15 = vadd.f32 %v2651_v52, %v2650_v58 }
 0x8e7   :  { %v2804_v18 = vadd.f32 %v3099_v62, %v2728_v7  ;;  %v2730_v24 = vpop.f32.mrb[29].mxu0  ;;  %v2801_v27 = vpop.f32.mrb[29].mxu1  ;;  %v2806_v2 = vadd.f32 %v3101_v47, %v2799_v10 }
 0x8e8   :  { %v2805_v31 = vadd.f32 %v3100_v0, %v2730_v24  ;;  %4869 = vtanh.f32 %v6711_v15  ;;  %v2807_v43 = vadd.f32 %v3102_v41, %v2801_v27 }
 0x8e9   :  { %v3103_v16 = vmul.f32 -1.442695, %v2804_v18 }
 0x8ea   :  { %v3104_v34 = vmul.f32 -1.442695, %v2805_v31  ;;  %v3105_v63 = vmul.f32 -1.442695, %v2807_v43 }
 0x8eb   :  { %4871 = vpow2.f32 %v3103_v16 }
 0x8ec   :  { %4873 = vpow2.f32 %v3104_v34 }
 0x8ed   :  { %4875 = vpow2.f32 %v3105_v63 }
 0x8ee   :  { %4877 = vtanh.f32 %v2806_v2 }
 0x8f2   :  { %v4870_v61 = vpop.eup %4869 }
 0x8f3   :  { %v2654_v11 = vmul.f32 %v4870_v61, %v4868_v51 }
 0x8f5   :  { %v4872_v21 = vpop.eup %4871  ;;  %3098 = vst [vmem:[%s6750_s6 + $0x30] sm:$0xff] %v2654_v11  ;;  %2896 = vmatprep.mubr.f32.mxu0 %v2654_v11  ;;  %2967 = vmatprep.mubr.f32.mxu1 %v2654_v11 }
 0x8f6   :  { %v4874_v23 = vpop.eup %4873  ;;  %v2811_v29 = vadd.f32 1.0, %v4872_v21 }
 0x8f7   :  { %v2817_v36 = vadd.f32 1.0, %v4874_v23  ;;  %v4876_v50 = vpop.eup %4875 }
 0x8f8   :  { %4879 = vrcp.f32 %v2811_v29  ;;  %v4878_v53 = vpop.eup %4877  ;;  %v2824_v38 = vadd.f32 1.0, %v4876_v50 }
 0x8f9   :  { %4881 = vrcp.f32 %v2817_v36 }
 0x8fa   :  { %4883 = vrcp.f32 %v2824_v38 }
 0x902   :  { %v4880_v60 = vpop.eup %4879 }
 0x903   :  { %v4882_v19 = vpop.eup %4881  ;;  %v2828_v59 = vmul.f32 %v4880_v60, %v4878_v53 }
 0x904   :  { %v2827_v56 = vmul.f32 %v4882_v19, %v6601_v22  ;;  %v4884_v49 = vpop.eup %4883 }
 0x906   :  { %v2829_v35 = vadd.f32 %v2828_v59, %v2827_v56 }
 0x908   :  { %3013 = vst [vmem:[%s6751_s8] sm:$0xff] %v2829_v35  ;;  %4885 = vtanh.f32 %v2829_v35 }
 0x912   :  { %v4886_v6 = vpop.eup %4885 }
 0x913   :  { %v2831_v5 = vmul.f32 %v4886_v6, %v4884_v49 }
 0x915   :  { %2897 = vmatmul.mubr.f32.vlgmr.msra.gmra.mrb[30].mxu0 %v2831_v5  ;;  %3009 = vst [vmem:[%s6752_s7] sm:$0xff] %v2831_v5  ;;  %2968 = vmatmul.mubr.f32.vlgmr.msra.gmra.mrb[30].mxu1 %v2831_v5 }
 0x9e8   :  { %v2898_v1 = vpop.f32.mrb[30].mxu0  ;;  %v2969_v3 = vpop.f32.mrb[30].mxu1 }
 0x9e9   :  { %v2899_v22 = vadd.f32 %v2898_v1, %v7296_v44  ;;  %v2900_v12 = vpop.f32.mrb[31].mxu0  ;;  %v2971_v57 = vpop.f32.mrb[31].mxu1  ;;  %v2970_v8 = vadd.f32 %v2969_v3, %v5951_v32 }
 0x9ea   :  { %v2901_v4 = vadd.f32 %v2900_v12, %v5944_v39  ;;  %v2972_v40 = vadd.f32 %v2971_v57, %v5948_v20 }
 0x9eb   :  { %v3106_v54 = vmul.f32 -1.442695, %v2899_v22 }
 0x9ec   :  { %v3107_v13 = vmul.f32 -1.442695, %v2901_v4  ;;  %v3108_v28 = vmul.f32 -1.442695, %v2972_v40 }
 0x9ed   :  { %4887 = vpow2.f32 %v3106_v54 }
 0x9ee   :  { %4889 = vpow2.f32 %v3107_v13 }
 0x9ef   :  { %4891 = vpow2.f32 %v3108_v28 }
 0x9f0   :  { %4893 = vtanh.f32 %v2970_v8 }
 0x9f7   :  { %v4888_v9 = vpop.eup %4887 }
 0x9f8   :  { %v4890_v14 = vpop.eup %4889  ;;  %v2977_v17 = vadd.f32 1.0, %v4888_v9 }
 0x9f9   :  { %v2983_v25 = vadd.f32 1.0, %v4890_v14  ;;  %v4892_v44 = vpop.eup %4891 }
 0x9fa   :  { %4895 = vrcp.f32 %v2977_v17  ;;  %v4894_v26 = vpop.eup %4893  ;;  %v2990_v37 = vadd.f32 1.0, %v4892_v44 }
 0x9fb   :  { %4897 = vrcp.f32 %v2983_v25 }
 0x9fc   :  { %4899 = vrcp.f32 %v2990_v37 }
 0xa04   :  { %v4896_v39 = vpop.eup %4895 }
 0xa05   :  { %v4898_v30 = vpop.eup %4897  ;;  %v2994_v33 = vmul.f32 %v4896_v39, %v4894_v26 }
 0xa06   :  { %v2993_v42 = vmul.f32 %v4898_v30, %v6711_v15  ;;  %v4900_v32 = vpop.eup %4899 }
 0xa08   :  { %v2995_v20 = vadd.f32 %v2994_v33, %v2993_v42 }
 0xa0a   :  { %4901 = vtanh.f32 %v2995_v20  ;;  %3014 = vst [vmem:[%s6751_s8 + $0x8] sm:$0xff] %v2995_v20 }
 0xa14   :  { %v4902_v45 = vpop.eup %4901 }
 0xa15   :  { %v2997_v46 = vmul.f32 %v4902_v45, %v4900_v32 }
 0xa17   :  { %3109 = vst [vmem:[%s6750_s6 + $0x38] sm:$0xff] %v2997_v46  ;;  %3010 = vst [vmem:[%s6752_s7 + $0x8] sm:$0xff] %v2997_v46 }

</bundles_post_ra>
